<compile_context>
chip_gen: v7x
topology: tpu7x:2x2x1
jax: 0.10.0
libtpu: 0.0.40
codegen_flags: <defaults>
</compile_context>

<pallas_src>
import functools
import math

import jax
import jax.numpy as jnp
import numpy as np
from jax.experimental import pallas as pl
from jax.experimental.pallas import tpu as pltpu

LN_EPS = 1e-5


def _erf_approx(x):
    # Abramowitz & Stegun 7.1.26 rational approximation of erf (max abs err ~1.5e-7),
    # built from exp/mul/add + an EUP approx reciprocal so it lowers cleanly in Mosaic.
    a1, a2, a3, a4, a5 = 0.254829592, -0.284496736, 1.421413741, -1.453152027, 1.061405429
    p = 0.3275911
    sgn = jnp.where(x >= 0.0, 1.0, -1.0)
    ax = jnp.abs(x)
    t = pl.reciprocal(1.0 + p * ax, approx=True)      # EUP slot instead of VPU divide
    poly = ((((a5 * t + a4) * t + a3) * t + a2) * t + a1) * t
    return sgn * (1.0 - poly * jnp.exp(-ax * ax))


def _gelu_exact(x):
    # PyTorch nn.GELU() default (exact, erf-based).
    return 0.5 * x * (1.0 + _erf_approx(x * (1.0 / math.sqrt(2.0))))


def _layernorm(x, g, b):
    mu = jnp.mean(x, axis=-1, keepdims=True)
    var = jnp.mean((x - mu) ** 2, axis=-1, keepdims=True)
    return (x - mu) * jax.lax.rsqrt(var + LN_EPS) * g + b


def _block_kernel(x_ref,
                  ln1g_ref, ln1b_ref,
                  wqkv_ref, bqkv_ref,
                  wp_ref, bp_ref,
                  ln2g_ref, ln2b_ref,
                  w1_ref, b1_ref, w2_ref, b2_ref,
                  o_ref, *, n_head):
    f32, bf16 = jnp.float32, jnp.bfloat16

    x = x_ref[0]                                  # (T, C) f32
    T, C = x.shape
    H = n_head
    hd = C // H

    # ---- ln1 (f32 statistics) ----
    h = _layernorm(x, ln1g_ref[...], ln1b_ref[...])

    # ---- fused QKV: one lane-dense (T, C) @ (C, 3C) matmul (scale folded into q cols) ----
    qkv = jnp.dot(h.astype(bf16), wqkv_ref[...], preferred_element_type=f32) + bqkv_ref[...]

    def to_heads(m2d):                            # (T, C) f32 -> (H, T, hd)
        return jnp.swapaxes(m2d.reshape(T, H, hd), 0, 1)

    q3 = to_heads(qkv[:, :C]).astype(bf16)
    k3 = to_heads(qkv[:, C:2 * C]).astype(bf16)
    v3 = to_heads(qkv[:, 2 * C:]).astype(bf16)

    # ---- causal attention, heads batched; head-invariant (T, T) mask ----
    att = jnp.einsum('htd,hsd->hts', q3, k3, preferred_element_type=f32)     # (H, T, T)
    row = jax.lax.broadcasted_iota(jnp.int32, (T, T), 0)
    col = jax.lax.broadcasted_iota(jnp.int32, (T, T), 1)
    att = jnp.where((row >= col)[None], att, jnp.float32(-1e30))             # bcast over H
    att = att - jnp.max(att, axis=-1, keepdims=True)
    e = jnp.exp(att)                                                         # unnormalized
    inv = pl.reciprocal(jnp.sum(e, axis=-1, keepdims=True), approx=True)     # (H, T, 1)

    yh = jnp.einsum('hts,hsd->htd', e.astype(bf16), v3, preferred_element_type=f32)
    yh = yh * inv                                 # normalize after PV: T*hd muls, not T*T

    # ---- output projection fused over heads: concat heads -> one (T,C)@(C,C) matmul ----
    y2 = jnp.swapaxes(yh, 0, 1).reshape(T, C)     # == torch transpose(1,2).view(T, C)
    y = jnp.dot(y2.astype(bf16), wp_ref[...], preferred_element_type=f32) + bp_ref[...]

    x1 = x + y                                    # residual 1

    # ---- ln2 + MLP (GELU): bf16 matmuls, f32 math ----
    h2 = _layernorm(x1, ln2g_ref[...], ln2b_ref[...])
    m = jnp.dot(h2.astype(bf16), w1_ref[...], preferred_element_type=f32) + b1_ref[...]
    m = _gelu_exact(m)
    m = jnp.dot(m.astype(bf16), w2_ref[...], preferred_element_type=f32) + b2_ref[...]

    o_ref[0] = (x1 + m).astype(o_ref.dtype)


def block_forward(x, params, n_head):
    B, T, C = x.shape
    hd = C // n_head
    bf16, f32 = jnp.bfloat16, jnp.float32
    scale = 1.0 / math.sqrt(hd)

    # Fused QKV weight/bias; 1/sqrt(hd) folded into the query columns (host side, once).
    wqkv = jnp.concatenate([params["wq"] * scale, params["wk"], params["wv"]],
                           axis=1).astype(bf16)                        # (C, 3C)
    bqkv = jnp.concatenate([params["bq"] * scale, params["bk"], params["bv"]],
                           axis=1).astype(f32)                         # (1, 3C)

    ordered = [
        params["ln1_g"].astype(f32), params["ln1_b"].astype(f32),
        wqkv, bqkv,
        params["wp"].astype(bf16), params["bp"].astype(f32),
        params["ln2_g"].astype(f32), params["ln2_b"].astype(f32),
        params["w1"].astype(bf16), params["b1"].astype(f32),
        params["w2"].astype(bf16), params["b2"].astype(f32),
    ]

    in_specs = [pl.BlockSpec((1, T, C), lambda b: (b, 0, 0))]
    for p in ordered:
        # Grid-invariant weights/biases: single-buffer them (no pointless 2x VMEM copy).
        in_specs.append(
            pl.BlockSpec(p.shape, (lambda b, _nd=p.ndim: (0,) * _nd),
                         pipeline_mode=pl.Buffered(1)))

    # Explicit VMEM budget: single-buffered weights + double-buffered x/o slabs + working set.
    weight_bytes = sum(int(p.size) * p.dtype.itemsize for p in ordered)
    slab = T * C * 4
    working = (2 * T * 3 * C * 4                 # qkv + head-major copies (f32)
               + 3 * n_head * T * T * 4          # scores / exp / mask headroom (f32)
               + 2 * T * 4 * C * 4               # MLP hidden (f32)
               + 4 * slab)                       # h, x1, y, ...
    vmem_limit = int(min(max(weight_bytes + 4 * slab + working + (8 << 20), 32 << 20),
                         64 << 20))              # stay under v7x's 64 MiB physical VMEM

    return pl.pallas_call(
        functools.partial(_block_kernel, n_head=n_head),
        out_shape=jax.ShapeDtypeStruct((B, T, C), x.dtype),
        grid=(B,),
        in_specs=in_specs,
        out_specs=pl.BlockSpec((1, T, C), lambda b: (b, 0, 0)),
        compiler_params=pltpu.CompilerParams(
            dimension_semantics=("parallel",),
            vmem_limit_bytes=vmem_limit),
    )(x, *ordered)


# ---------------- pure-JAX reference (mirrors the PyTorch forward, eval mode) ----------------
def ref_block(x, p, n_head):
    B, T, C = x.shape
    hd = C // n_head

    def ln(v, g, b):
        mu = v.mean(-1, keepdims=True)
        var = ((v - mu) ** 2).mean(-1, keepdims=True)
        return (v - mu) / jnp.sqrt(var + LN_EPS) * g + b

    h = ln(x, p["ln1_g"], p["ln1_b"])
    q = (h @ p["wq"] + p["bq"]).reshape(B, T, n_head, hd).transpose(0, 2, 1, 3)
    k = (h @ p["wk"] + p["bk"]).reshape(B, T, n_head, hd).transpose(0, 2, 1, 3)
    v = (h @ p["wv"] + p["bv"]).reshape(B, T, n_head, hd).transpose(0, 2, 1, 3)
    att = jnp.einsum("bhqd,bhkd->bhqk", q, k) / math.sqrt(hd)
    mask = jnp.tril(jnp.ones((T, T), bool))
    att = jnp.where(mask[None, None], att, -jnp.inf)
    att = jax.nn.softmax(att, axis=-1)
    y = jnp.einsum("bhqk,bhkd->bhqd", att, v).transpose(0, 2, 1, 3).reshape(B, T, C)
    y = y @ p["wp"] + p["bp"]
    x1 = x + y
    h2 = ln(x1, p["ln2_g"], p["ln2_b"])
    m = h2 @ p["w1"] + p["b1"]
    m = 0.5 * m * (1.0 + jax.scipy.special.erf(m / math.sqrt(2.0)))
    m = m @ p["w2"] + p["b2"]
    return x1 + m


if __name__ == "__main__":
    # Small, TPU-friendly config: head_dim = C // n_head = 128 (lane-native head width).
    B, T, C, n_head = 2, 16, 256, 2
    key = jax.random.PRNGKey(0)
    ks = jax.random.split(key, 16)

    def w(k, shape, scale=0.02):
        return (scale * jax.random.normal(k, shape)).astype(jnp.float32)

    # Linear weights are stored as (in, out), i.e. the transpose of torch's (out, in).
    params = {
        "ln1_g": (1.0 + 0.1 * jax.random.normal(ks[7], (1, C))).astype(jnp.float32),
        "ln1_b": w(ks[8], (1, C), 0.05),
        "wq": w(ks[0], (C, C)), "bq": w(ks[9], (1, C), 0.01),
        "wk": w(ks[1], (C, C)), "bk": w(ks[10], (1, C), 0.01),
        "wv": w(ks[2], (C, C)), "bv": w(ks[11], (1, C), 0.01),
        "wp": w(ks[3], (C, C)), "bp": w(ks[12], (1, C), 0.01),
        "ln2_g": (1.0 + 0.1 * jax.random.normal(ks[13], (1, C))).astype(jnp.float32),
        "ln2_b": w(ks[14], (1, C), 0.05),
        "w1": w(ks[4], (C, 4 * C)), "b1": w(ks[15], (1, 4 * C), 0.01),
        "w2": w(ks[5], (4 * C, C)), "b2": jnp.zeros((1, C), jnp.float32),
    }
    x = jax.random.normal(ks[6], (B, T, C), jnp.float32)

    out = jax.block_until_ready(block_forward(x, params, n_head))

    ref = ref_block(x, params, n_head)
    np.testing.assert_allclose(np.asarray(out), np.asarray(ref), rtol=2e-2, atol=2e-2)
    print("KERNEL_OK")
</pallas_src>

<mosaic_0001>
module attributes {stable_mosaic.version = 11 : i64} {
  func.func @_block_kernel(%arg0: i32, %arg1: memref<1x16x256xf32, #tpu.memory_space<vmem>>, %arg2: memref<1x256xf32, #tpu.memory_space<vmem>>, %arg3: memref<1x256xf32, #tpu.memory_space<vmem>>, %arg4: memref<256x768xbf16, #tpu.memory_space<vmem>>, %arg5: memref<1x768xf32, #tpu.memory_space<vmem>>, %arg6: memref<256x256xbf16, #tpu.memory_space<vmem>>, %arg7: memref<1x256xf32, #tpu.memory_space<vmem>>, %arg8: memref<1x256xf32, #tpu.memory_space<vmem>>, %arg9: memref<1x256xf32, #tpu.memory_space<vmem>>, %arg10: memref<256x1024xbf16, #tpu.memory_space<vmem>>, %arg11: memref<1x1024xf32, #tpu.memory_space<vmem>>, %arg12: memref<1024x256xbf16, #tpu.memory_space<vmem>>, %arg13: memref<1x256xf32, #tpu.memory_space<vmem>>, %arg14: memref<1x16x256xf32, #tpu.memory_space<vmem>>) attributes {dimension_semantics = [#tpu.dimension_semantics<parallel>], iteration_bounds = array<i64: 2>, scalar_prefetch = 0 : i64, scratch_operands = 0 : i64, tpu.core_type = #tpu.core_type<tc>, window_params = [{transform_indices = @transform_0, window_bounds = array<i64: 1, 16, 256>}, {pipeline_mode = #tpu.pipeline_mode<synchronous>, transform_indices = @transform_1, window_bounds = array<i64: 1, 256>}, {pipeline_mode = #tpu.pipeline_mode<synchronous>, transform_indices = @transform_2, window_bounds = array<i64: 1, 256>}, {pipeline_mode = #tpu.pipeline_mode<synchronous>, transform_indices = @transform_3, window_bounds = array<i64: 256, 768>}, {pipeline_mode = #tpu.pipeline_mode<synchronous>, transform_indices = @transform_4, window_bounds = array<i64: 1, 768>}, {pipeline_mode = #tpu.pipeline_mode<synchronous>, transform_indices = @transform_5, window_bounds = array<i64: 256, 256>}, {pipeline_mode = #tpu.pipeline_mode<synchronous>, transform_indices = @transform_6, window_bounds = array<i64: 1, 256>}, {pipeline_mode = #tpu.pipeline_mode<synchronous>, transform_indices = @transform_7, window_bounds = array<i64: 1, 256>}, {pipeline_mode = #tpu.pipeline_mode<synchronous>, transform_indices = @transform_8, window_bounds = array<i64: 1, 256>}, {pipeline_mode = #tpu.pipeline_mode<synchronous>, transform_indices = @transform_9, window_bounds = array<i64: 256, 1024>}, {pipeline_mode = #tpu.pipeline_mode<synchronous>, transform_indices = @transform_10, window_bounds = array<i64: 1, 1024>}, {pipeline_mode = #tpu.pipeline_mode<synchronous>, transform_indices = @transform_11, window_bounds = array<i64: 1024, 256>}, {pipeline_mode = #tpu.pipeline_mode<synchronous>, transform_indices = @transform_12, window_bounds = array<i64: 1, 256>}, {transform_indices = @transform_13, window_bounds = array<i64: 1, 16, 256>}]} {
    %c0 = arith.constant 0 : index
    %c0_0 = arith.constant 0 : index
    %c0_1 = arith.constant 0 : index
    %0 = vector.load %arg1[%c0, %c0_0, %c0_1] : memref<1x16x256xf32, #tpu.memory_space<vmem>>, vector<1x16x256xf32>
    %1 = vector.shape_cast %0 : vector<1x16x256xf32> to vector<16x256xf32>
    %c0_2 = arith.constant 0 : index
    %c0_3 = arith.constant 0 : index
    %2 = vector.load %arg2[%c0_2, %c0_3] : memref<1x256xf32, #tpu.memory_space<vmem>>, vector<1x256xf32>
    %c0_4 = arith.constant 0 : index
    %c0_5 = arith.constant 0 : index
    %3 = vector.load %arg3[%c0_4, %c0_5] : memref<1x256xf32, #tpu.memory_space<vmem>>, vector<1x256xf32>
    %cst = arith.constant dense<0.000000e+00> : vector<16xf32>
    %4 = vector.multi_reduction <add>, %1, %cst [1] : vector<16x256xf32> to vector<16xf32>
    %5 = vector.shape_cast %4 : vector<16xf32> to vector<16x1xf32>
    %cst_6 = arith.constant 2.560000e+02 : f32
    %6 = vector.broadcast %cst_6 : f32 to vector<16x1xf32>
    %7 = arith.divf %5, %6 : vector<16x1xf32>
    %8 = vector.broadcast %7 : vector<16x1xf32> to vector<16x256xf32>
    %9 = arith.subf %1, %8 : vector<16x256xf32>
    %10 = arith.mulf %9, %9 : vector<16x256xf32>
    %cst_7 = arith.constant dense<0.000000e+00> : vector<16xf32>
    %11 = vector.multi_reduction <add>, %10, %cst_7 [1] : vector<16x256xf32> to vector<16xf32>
    %12 = vector.shape_cast %11 : vector<16xf32> to vector<16x1xf32>
    %cst_8 = arith.constant 2.560000e+02 : f32
    %13 = vector.broadcast %cst_8 : f32 to vector<16x1xf32>
    %14 = arith.divf %12, %13 : vector<16x1xf32>
    %15 = vector.broadcast %7 : vector<16x1xf32> to vector<16x256xf32>
    %16 = arith.subf %1, %15 : vector<16x256xf32>
    %cst_9 = arith.constant 9.99999974E-6 : f32
    %17 = vector.broadcast %cst_9 : f32 to vector<16x1xf32>
    %18 = arith.addf %14, %17 : vector<16x1xf32>
    %19 = math.rsqrt %18 : vector<16x1xf32>
    %20 = vector.broadcast %19 : vector<16x1xf32> to vector<16x256xf32>
    %21 = arith.mulf %16, %20 : vector<16x256xf32>
    %22 = vector.broadcast %2 : vector<1x256xf32> to vector<16x256xf32>
    %23 = arith.mulf %21, %22 : vector<16x256xf32>
    %24 = vector.broadcast %3 : vector<1x256xf32> to vector<16x256xf32>
    %25 = arith.addf %23, %24 : vector<16x256xf32>
    %26 = arith.truncf %25 : vector<16x256xf32> to vector<16x256xbf16>
    %c0_10 = arith.constant 0 : index
    %c0_11 = arith.constant 0 : index
    %27 = vector.load %arg4[%c0_10, %c0_11] : memref<256x768xbf16, #tpu.memory_space<vmem>>, vector<256x768xbf16>
    %cst_12 = arith.constant dense<0.000000e+00> : vector<16x768xf32>
    %28 = tpu.matmul %26, %27, %cst_12 {dimension_numbers = #tpu.dot_dimension_numbers<[1], [0], [0], [1], [0, 0, 1, 1], [], []>} : vector<16x256xbf16>, vector<256x768xbf16>, vector<16x768xf32> -> vector<16x768xf32>
    %c0_13 = arith.constant 0 : index
    %c0_14 = arith.constant 0 : index
    %29 = vector.load %arg5[%c0_13, %c0_14] : memref<1x768xf32, #tpu.memory_space<vmem>>, vector<1x768xf32>
    %30 = vector.broadcast %29 : vector<1x768xf32> to vector<16x768xf32>
    %31 = arith.addf %28, %30 : vector<16x768xf32>
    %32 = vector.extract_strided_slice %31 {offsets = [0, 0], sizes = [16, 256], strides = [1, 1]} : vector<16x768xf32> to vector<16x256xf32>
    %33 = vector.shape_cast %32 : vector<16x256xf32> to vector<16x2x128xf32>
    %34 = tpu.transpose %33, [1, 0, 2] : vector<16x2x128xf32> -> vector<2x16x128xf32>
    %35 = arith.truncf %34 : vector<2x16x128xf32> to vector<2x16x128xbf16>
    %36 = vector.extract_strided_slice %31 {offsets = [0, 256], sizes = [16, 256], strides = [1, 1]} : vector<16x768xf32> to vector<16x256xf32>
    %37 = vector.shape_cast %36 : vector<16x256xf32> to vector<16x2x128xf32>
    %38 = tpu.transpose %37, [1, 0, 2] : vector<16x2x128xf32> -> vector<2x16x128xf32>
    %39 = arith.truncf %38 : vector<2x16x128xf32> to vector<2x16x128xbf16>
    %40 = vector.extract_strided_slice %31 {offsets = [0, 512], sizes = [16, 256], strides = [1, 1]} : vector<16x768xf32> to vector<16x256xf32>
    %41 = vector.shape_cast %40 : vector<16x256xf32> to vector<16x2x128xf32>
    %42 = tpu.transpose %41, [1, 0, 2] : vector<16x2x128xf32> -> vector<2x16x128xf32>
    %43 = arith.truncf %42 : vector<2x16x128xf32> to vector<2x16x128xbf16>
    "tpu.trace_start"() <{level = 10 : i32, message = "htd,hsd->hts"}> : () -> ()
    %cst_15 = arith.constant dense<0.000000e+00> : vector<2x16x16xf32>
    %44 = tpu.matmul %35, %39, %cst_15 {dimension_numbers = #tpu.dot_dimension_numbers<[2], [2], [1], [1], [0, 0, 0, 1, 1, 1], [0], [0]>} : vector<2x16x128xbf16>, vector<2x16x128xbf16>, vector<2x16x16xf32> -> vector<2x16x16xf32>
    "tpu.trace_stop"() : () -> ()
    %45 = tpu.iota {dimensions = array<i32: 0>} : vector<16x16xi32>
    %46 = tpu.iota {dimensions = array<i32: 1>} : vector<16x16xi32>
    %47 = arith.cmpi sge, %45, %46 : vector<16x16xi32>
    %48 = vector.shape_cast %47 : vector<16x16xi1> to vector<1x16x16xi1>
    %cst_16 = arith.constant -1.000000e+30 : f32
    %49 = vector.shape_cast %48 : vector<1x16x16xi1> to vector<1x16x16xi1>
    %50 = vector.broadcast %49 : vector<1x16x16xi1> to vector<2x16x16xi1>
    %51 = vector.broadcast %cst_16 : f32 to vector<2x16x16xf32>
    %52 = arith.select %50, %44, %51 : vector<2x16x16xi1>, vector<2x16x16xf32>
    %cst_17 = arith.constant dense<0xFF800000> : vector<2x16xf32>
    %53 = vector.multi_reduction <maximumf>, %52, %cst_17 [2] : vector<2x16x16xf32> to vector<2x16xf32>
    %54 = vector.shape_cast %53 : vector<2x16xf32> to vector<2x16x1xf32>
    %55 = vector.broadcast %54 : vector<2x16x1xf32> to vector<2x16x16xf32>
    %56 = arith.subf %52, %55 : vector<2x16x16xf32>
    %57 = math.exp %56 : vector<2x16x16xf32>
    %cst_18 = arith.constant dense<0.000000e+00> : vector<2x16xf32>
    %58 = vector.multi_reduction <add>, %57, %cst_18 [2] : vector<2x16x16xf32> to vector<2x16xf32>
    %59 = vector.shape_cast %58 : vector<2x16xf32> to vector<2x16x1xf32>
    %60 = tpu.reciprocal %59 {approx = true} : vector<2x16x1xf32> -> vector<2x16x1xf32>
    %61 = arith.truncf %57 : vector<2x16x16xf32> to vector<2x16x16xbf16>
    "tpu.trace_start"() <{level = 10 : i32, message = "hts,hsd->htd"}> : () -> ()
    %cst_19 = arith.constant dense<0.000000e+00> : vector<2x16x128xf32>
    %62 = tpu.matmul %61, %43, %cst_19 {dimension_numbers = #tpu.dot_dimension_numbers<[2], [1], [1], [2], [0, 0, 0, 1, 1, 2], [0], [0]>} : vector<2x16x16xbf16>, vector<2x16x128xbf16>, vector<2x16x128xf32> -> vector<2x16x128xf32>
    "tpu.trace_stop"() : () -> ()
    %63 = vector.broadcast %60 : vector<2x16x1xf32> to vector<2x16x128xf32>
    %64 = arith.mulf %62, %63 : vector<2x16x128xf32>
    %65 = tpu.transpose %64, [1, 0, 2] : vector<2x16x128xf32> -> vector<16x2x128xf32>
    %66 = vector.shape_cast %65 : vector<16x2x128xf32> to vector<16x256xf32>
    %67 = arith.truncf %66 : vector<16x256xf32> to vector<16x256xbf16>
    %c0_20 = arith.constant 0 : index
    %c0_21 = arith.constant 0 : index
    %68 = vector.load %arg6[%c0_20, %c0_21] : memref<256x256xbf16, #tpu.memory_space<vmem>>, vector<256x256xbf16>
    %cst_22 = arith.constant dense<0.000000e+00> : vector<16x256xf32>
    %69 = tpu.matmul %67, %68, %cst_22 {dimension_numbers = #tpu.dot_dimension_numbers<[1], [0], [0], [1], [0, 0, 1, 1], [], []>} : vector<16x256xbf16>, vector<256x256xbf16>, vector<16x256xf32> -> vector<16x256xf32>
    %c0_23 = arith.constant 0 : index
    %c0_24 = arith.constant 0 : index
    %70 = vector.load %arg7[%c0_23, %c0_24] : memref<1x256xf32, #tpu.memory_space<vmem>>, vector<1x256xf32>
    %71 = vector.broadcast %70 : vector<1x256xf32> to vector<16x256xf32>
    %72 = arith.addf %69, %71 : vector<16x256xf32>
    %73 = arith.addf %1, %72 : vector<16x256xf32>
    %c0_25 = arith.constant 0 : index
    %c0_26 = arith.constant 0 : index
    %74 = vector.load %arg8[%c0_25, %c0_26] : memref<1x256xf32, #tpu.memory_space<vmem>>, vector<1x256xf32>
    %c0_27 = arith.constant 0 : index
    %c0_28 = arith.constant 0 : index
    %75 = vector.load %arg9[%c0_27, %c0_28] : memref<1x256xf32, #tpu.memory_space<vmem>>, vector<1x256xf32>
    %cst_29 = arith.constant dense<0.000000e+00> : vector<16xf32>
    %76 = vector.multi_reduction <add>, %73, %cst_29 [1] : vector<16x256xf32> to vector<16xf32>
    %77 = vector.shape_cast %76 : vector<16xf32> to vector<16x1xf32>
    %cst_30 = arith.constant 2.560000e+02 : f32
    %78 = vector.broadcast %cst_30 : f32 to vector<16x1xf32>
    %79 = arith.divf %77, %78 : vector<16x1xf32>
    %80 = vector.broadcast %79 : vector<16x1xf32> to vector<16x256xf32>
    %81 = arith.subf %73, %80 : vector<16x256xf32>
    %82 = arith.mulf %81, %81 : vector<16x256xf32>
    %cst_31 = arith.constant dense<0.000000e+00> : vector<16xf32>
    %83 = vector.multi_reduction <add>, %82, %cst_31 [1] : vector<16x256xf32> to vector<16xf32>
    %84 = vector.shape_cast %83 : vector<16xf32> to vector<16x1xf32>
    %cst_32 = arith.constant 2.560000e+02 : f32
    %85 = vector.broadcast %cst_32 : f32 to vector<16x1xf32>
    %86 = arith.divf %84, %85 : vector<16x1xf32>
    %87 = vector.broadcast %79 : vector<16x1xf32> to vector<16x256xf32>
    %88 = arith.subf %73, %87 : vector<16x256xf32>
    %cst_33 = arith.constant 9.99999974E-6 : f32
    %89 = vector.broadcast %cst_33 : f32 to vector<16x1xf32>
    %90 = arith.addf %86, %89 : vector<16x1xf32>
    %91 = math.rsqrt %90 : vector<16x1xf32>
    %92 = vector.broadcast %91 : vector<16x1xf32> to vector<16x256xf32>
    %93 = arith.mulf %88, %92 : vector<16x256xf32>
    %94 = vector.broadcast %74 : vector<1x256xf32> to vector<16x256xf32>
    %95 = arith.mulf %93, %94 : vector<16x256xf32>
    %96 = vector.broadcast %75 : vector<1x256xf32> to vector<16x256xf32>
    %97 = arith.addf %95, %96 : vector<16x256xf32>
    %98 = arith.truncf %97 : vector<16x256xf32> to vector<16x256xbf16>
    %c0_34 = arith.constant 0 : index
    %c0_35 = arith.constant 0 : index
    %99 = vector.load %arg10[%c0_34, %c0_35] : memref<256x1024xbf16, #tpu.memory_space<vmem>>, vector<256x1024xbf16>
    %cst_36 = arith.constant dense<0.000000e+00> : vector<16x1024xf32>
    %100 = tpu.matmul %98, %99, %cst_36 {dimension_numbers = #tpu.dot_dimension_numbers<[1], [0], [0], [1], [0, 0, 1, 1], [], []>} : vector<16x256xbf16>, vector<256x1024xbf16>, vector<16x1024xf32> -> vector<16x1024xf32>
    %c0_37 = arith.constant 0 : index
    %c0_38 = arith.constant 0 : index
    %101 = vector.load %arg11[%c0_37, %c0_38] : memref<1x1024xf32, #tpu.memory_space<vmem>>, vector<1x1024xf32>
    %102 = vector.broadcast %101 : vector<1x1024xf32> to vector<16x1024xf32>
    %103 = arith.addf %100, %102 : vector<16x1024xf32>
    %cst_39 = arith.constant 5.000000e-01 : f32
    %104 = vector.broadcast %cst_39 : f32 to vector<16x1024xf32>
    %105 = arith.mulf %104, %103 : vector<16x1024xf32>
    %cst_40 = arith.constant 0.707106769 : f32
    %106 = vector.broadcast %cst_40 : f32 to vector<16x1024xf32>
    %107 = arith.mulf %103, %106 : vector<16x1024xf32>
    %cst_41 = arith.constant 0.000000e+00 : f32
    %108 = vector.broadcast %cst_41 : f32 to vector<16x1024xf32>
    %109 = arith.cmpf oge, %107, %108 : vector<16x1024xf32>
    %cst_42 = arith.constant 1.000000e+00 : f32
    %cst_43 = arith.constant -1.000000e+00 : f32
    %110 = vector.broadcast %cst_42 : f32 to vector<16x1024xf32>
    %111 = vector.broadcast %cst_43 : f32 to vector<16x1024xf32>
    %112 = arith.select %109, %110, %111 : vector<16x1024xi1>, vector<16x1024xf32>
    %113 = math.absf %107 : vector<16x1024xf32>
    %cst_44 = arith.constant 0.327591091 : f32
    %114 = vector.broadcast %cst_44 : f32 to vector<16x1024xf32>
    %115 = arith.mulf %114, %113 : vector<16x1024xf32>
    %cst_45 = arith.constant 1.000000e+00 : f32
    %116 = vector.broadcast %cst_45 : f32 to vector<16x1024xf32>
    %117 = arith.addf %116, %115 : vector<16x1024xf32>
    %118 = tpu.reciprocal %117 {approx = true} : vector<16x1024xf32> -> vector<16x1024xf32>
    %cst_46 = arith.constant 1.06140542 : f32
    %119 = vector.broadcast %cst_46 : f32 to vector<16x1024xf32>
    %120 = arith.mulf %119, %118 : vector<16x1024xf32>
    %cst_47 = arith.constant -1.45315206 : f32
    %121 = vector.broadcast %cst_47 : f32 to vector<16x1024xf32>
    %122 = arith.addf %120, %121 : vector<16x1024xf32>
    %123 = arith.mulf %122, %118 : vector<16x1024xf32>
    %cst_48 = arith.constant 1.42141378 : f32
    %124 = vector.broadcast %cst_48 : f32 to vector<16x1024xf32>
    %125 = arith.addf %123, %124 : vector<16x1024xf32>
    %126 = arith.mulf %125, %118 : vector<16x1024xf32>
    %cst_49 = arith.constant -0.284496725 : f32
    %127 = vector.broadcast %cst_49 : f32 to vector<16x1024xf32>
    %128 = arith.addf %126, %127 : vector<16x1024xf32>
    %129 = arith.mulf %128, %118 : vector<16x1024xf32>
    %cst_50 = arith.constant 0.254829586 : f32
    %130 = vector.broadcast %cst_50 : f32 to vector<16x1024xf32>
    %131 = arith.addf %129, %130 : vector<16x1024xf32>
    %132 = arith.mulf %131, %118 : vector<16x1024xf32>
    %cst_51 = arith.constant 0.000000e+00 : f32
    %133 = vector.broadcast %cst_51 : f32 to vector<16x1024xf32>
    %134 = arith.subf %133, %113 : vector<16x1024xf32>
    %135 = arith.mulf %134, %113 : vector<16x1024xf32>
    %136 = math.exp %135 : vector<16x1024xf32>
    %137 = arith.mulf %132, %136 : vector<16x1024xf32>
    %cst_52 = arith.constant 1.000000e+00 : f32
    %138 = vector.broadcast %cst_52 : f32 to vector<16x1024xf32>
    %139 = arith.subf %138, %137 : vector<16x1024xf32>
    %140 = arith.mulf %112, %139 : vector<16x1024xf32>
    %cst_53 = arith.constant 1.000000e+00 : f32
    %141 = vector.broadcast %cst_53 : f32 to vector<16x1024xf32>
    %142 = arith.addf %141, %140 : vector<16x1024xf32>
    %143 = arith.mulf %105, %142 : vector<16x1024xf32>
    %144 = arith.truncf %143 : vector<16x1024xf32> to vector<16x1024xbf16>
    %c0_54 = arith.constant 0 : index
    %c0_55 = arith.constant 0 : index
    %145 = vector.load %arg12[%c0_54, %c0_55] : memref<1024x256xbf16, #tpu.memory_space<vmem>>, vector<1024x256xbf16>
    %cst_56 = arith.constant dense<0.000000e+00> : vector<16x256xf32>
    %146 = tpu.matmul %144, %145, %cst_56 {dimension_numbers = #tpu.dot_dimension_numbers<[1], [0], [0], [1], [0, 0, 1, 1], [], []>} : vector<16x1024xbf16>, vector<1024x256xbf16>, vector<16x256xf32> -> vector<16x256xf32>
    %c0_57 = arith.constant 0 : index
    %c0_58 = arith.constant 0 : index
    %147 = vector.load %arg13[%c0_57, %c0_58] : memref<1x256xf32, #tpu.memory_space<vmem>>, vector<1x256xf32>
    %148 = vector.broadcast %147 : vector<1x256xf32> to vector<16x256xf32>
    %149 = arith.addf %146, %148 : vector<16x256xf32>
    %150 = arith.addf %73, %149 : vector<16x256xf32>
    %c0_59 = arith.constant 0 : index
    %c0_60 = arith.constant 0 : index
    %c0_61 = arith.constant 0 : index
    %151 = vector.load %arg14[%c0_59, %c0_60, %c0_61] : memref<1x16x256xf32, #tpu.memory_space<vmem>>, vector<1x16x256xf32>
    %152 = vector.shape_cast %151 : vector<1x16x256xf32> to vector<16x256xf32>
    %153 = vector.shape_cast %150 : vector<16x256xf32> to vector<1x16x256xf32>
    tpu.vector_store %arg14[%c0_59, %c0_60, %c0_61], %153 {strides = array<i32>} : memref<1x16x256xf32, #tpu.memory_space<vmem>>, vector<1x16x256xf32>,
    return
  }
  func.func @transform_0(%arg0: i32) -> (i32, i32, i32) {
    %c0_i32 = arith.constant 0 : i32
    %c0_i32_0 = arith.constant 0 : i32
    %c0_i32_1 = arith.constant 0 : i32
    return %arg0, %c0_i32, %c0_i32_0 : i32, i32, i32
  }
  func.func @transform_1(%arg0: i32) -> (i32, i32) {
    %c0_i32 = arith.constant 0 : i32
    %c0_i32_0 = arith.constant 0 : i32
    %c0_i32_1 = arith.constant 0 : i32
    return %c0_i32, %c0_i32_0 : i32, i32
  }
  func.func @transform_2(%arg0: i32) -> (i32, i32) {
    %c0_i32 = arith.constant 0 : i32
    %c0_i32_0 = arith.constant 0 : i32
    %c0_i32_1 = arith.constant 0 : i32
    return %c0_i32, %c0_i32_0 : i32, i32
  }
  func.func @transform_3(%arg0: i32) -> (i32, i32) {
    %c0_i32 = arith.constant 0 : i32
    %c0_i32_0 = arith.constant 0 : i32
    %c0_i32_1 = arith.constant 0 : i32
    return %c0_i32, %c0_i32_0 : i32, i32
  }
  func.func @transform_4(%arg0: i32) -> (i32, i32) {
    %c0_i32 = arith.constant 0 : i32
    %c0_i32_0 = arith.constant 0 : i32
    %c0_i32_1 = arith.constant 0 : i32
    return %c0_i32, %c0_i32_0 : i32, i32
  }
  func.func @transform_5(%arg0: i32) -> (i32, i32) {
    %c0_i32 = arith.constant 0 : i32
    %c0_i32_0 = arith.constant 0 : i32
    %c0_i32_1 = arith.constant 0 : i32
    return %c0_i32, %c0_i32_0 : i32, i32
  }
  func.func @transform_6(%arg0: i32) -> (i32, i32) {
    %c0_i32 = arith.constant 0 : i32
    %c0_i32_0 = arith.constant 0 : i32
    %c0_i32_1 = arith.constant 0 : i32
    return %c0_i32, %c0_i32_0 : i32, i32
  }
  func.func @transform_7(%arg0: i32) -> (i32, i32) {
    %c0_i32 = arith.constant 0 : i32
    %c0_i32_0 = arith.constant 0 : i32
    %c0_i32_1 = arith.constant 0 : i32
    return %c0_i32, %c0_i32_0 : i32, i32
  }
  func.func @transform_8(%arg0: i32) -> (i32, i32) {
    %c0_i32 = arith.constant 0 : i32
    %c0_i32_0 = arith.constant 0 : i32
    %c0_i32_1 = arith.constant 0 : i32
    return %c0_i32, %c0_i32_0 : i32, i32
  }
  func.func @transform_9(%arg0: i32) -> (i32, i32) {
    %c0_i32 = arith.constant 0 : i32
    %c0_i32_0 = arith.constant 0 : i32
    %c0_i32_1 = arith.constant 0 : i32
    return %c0_i32, %c0_i32_0 : i32, i32
  }
  func.func @transform_10(%arg0: i32) -> (i32, i32) {
    %c0_i32 = arith.constant 0 : i32
    %c0_i32_0 = arith.constant 0 : i32
    %c0_i32_1 = arith.constant 0 : i32
    return %c0_i32, %c0_i32_0 : i32, i32
  }
  func.func @transform_11(%arg0: i32) -> (i32, i32) {
    %c0_i32 = arith.constant 0 : i32
    %c0_i32_0 = arith.constant 0 : i32
    %c0_i32_1 = arith.constant 0 : i32
    return %c0_i32, %c0_i32_0 : i32, i32
  }
  func.func @transform_12(%arg0: i32) -> (i32, i32) {
    %c0_i32 = arith.constant 0 : i32
    %c0_i32_0 = arith.constant 0 : i32
    %c0_i32_1 = arith.constant 0 : i32
    return %c0_i32, %c0_i32_0 : i32, i32
  }
  func.func @transform_13(%arg0: i32) -> (i32, i32, i32) {
    %c0_i32 = arith.constant 0 : i32
    %c0_i32_0 = arith.constant 0 : i32
    %c0_i32_1 = arith.constant 0 : i32
    return %arg0, %c0_i32, %c0_i32_0 : i32, i32, i32
  }
}

</mosaic_0001>

<bundles_post_ra>
// kernel: tpu_custom_call.1
= control target key start
LH: loop header
LB: loop body
LE: loop exit
PB: predicated region body
PF: predicated region fallthrough
CT: control target
= control target key end

     0   :  { %s7811_s0 = inlined_call_operand.hbm [shape: f32[2,16,256], index: 0, kind: input, shape index: {}]   ;;  %s7812_s1 = inlined_call_operand.hbm [shape: f32[1,256], index: 1, kind: input, shape index: {}]   ;;  %s7813_s2 = inlined_call_operand.hbm [shape: f32[1,256], index: 2, kind: input, shape index: {}]   ;;  %s7814_s3 = inlined_call_operand.hbm [shape: bf16[256,768], index: 3, kind: input, shape index: {}]   ;;  %s7815_s4 = inlined_call_operand.vmem [shape: f32[1,768], index: 4, kind: input, shape index: {}]   ;;  %s7816_s5 = inlined_call_operand.hbm [shape: bf16[256,256], index: 5, kind: input, shape index: {}]   ;;  %s7817_s6 = inlined_call_operand.vmem [shape: f32[1,256], index: 6, kind: input, shape index: {}]   ;;  %s7818_s7 = inlined_call_operand.vmem [shape: f32[1,256], index: 7, kind: input, shape index: {}]   ;;  %s7819_s8 = inlined_call_operand.vmem [shape: f32[1,256], index: 8, kind: input, shape index: {}]   ;;  %s7820_s9 = inlined_call_operand.hbm [shape: bf16[256,1024], index: 9, kind: input, shape index: {}]   ;;  %s7821_s10 = inlined_call_operand.vmem [shape: f32[1,1024], index: 10, kind: input, shape index: {}]   ;;  %s7822_s11 = inlined_call_operand.hbm [shape: bf16[1024,256], index: 11, kind: input, shape index: {}]   ;;  %s7823_s12 = inlined_call_operand.vmem [shape: f32[1,256], index: 12, kind: input, shape index: {}]   ;;  %s7824_s13 = inlined_call_operand.hbm [shape: f32[2,16,256], index: 13, kind: output, shape index: {}]  }
   0x1   :  { %7829 = sst [smem:[#allocation20_spill]] %s7812_s1 }
   0x2   :  { %7830 = sst [smem:[#allocation21_spill]] %s7814_s3 }
   0x3   :  { %7831 = sst [smem:[#allocation22_spill]] %s7818_s7 }
   0x4   :  { %7832 = sst [smem:[#allocation23_spill]] %s7819_s8 }
   0x5   :  { %7833 = sst [smem:[#allocation24_spill]] %s7821_s10 }
   0x6   :  { %7834 = sst [smem:[#allocation25_spill]] %s7823_s12 }
   0x7   :  { %7835 = sst [smem:[#allocation26_spill]] %s7824_s13 }
   0x8   :  { %18 = vsyncpa [#allocation3], 0 }
   0x9   :  { %20 = vsyncpa [#allocation3 + $0x1], 0 }
   0xa   :  { %21 = vsyncpa [#allocation6], 0 }
   0xb   :  { %22 = vsyncpa [#allocation9], 0 }
   0xc   :  { %23 = vsyncpa [#allocation12], 0 }
   0xd   :  { %24 = vsyncpa [#allocation4], 0 }
   0xe   :  { %26 = vsyncpa [#allocation4 + $0x1], 0  ;;  %s6793_s25 = smov 0   ;;  %s6795_s26 = smov 0  }
   0xf   :  { %s6797_s27 = smov 0   ;;  %s6799_s28 = smov 0  }
  0x10 LB: > { %s6700_s29 = smov [#allocation5]   ;;  %s6814_s14 = sadd.s32 4294967295, %s6698_s28   ;;  %s6698_s28 = sphi %s6799_s28, %s7865_s28   ;;  %s6694_s27 = sphi %s6797_s27, %s7864_s27   ;;  %s6690_s26 = sphi %s6795_s26, %s7863_s26   ;;  %s6686_s25 = sphi %s6793_s25, %s7862_s25  }
  0x11   : > { %s354_s30 = sshll.u32 %s6700_s29, 4  ;;  %p5347_p0 = scmp.ge.s32.totalorder %s6698_s28, 1  ;;  %s355_s30 = int_to_ptr.vmem [resolvable:$true] %s354_s30 }
  0x12   : > { %p7826_p1 = scmp.eq.s32.totalorder %s6814_s14, 0  ;;  %p341_p2 = scmp.lt.s32.totalorder %s6698_s28, 3 }
  0x13   : > { %s6701_s16 = smov [#allocation8]   ;;  %s6702_s19 = smov [#allocation11]  }
  0x14   : > { %p6819_p3 = pnand %p5347_p0, %p341_p2  ;;  %s375_s17 = sshll.u32 %s6701_s16, 4  ;;  %s6826_s17 = int_to_ptr.vmem [resolvable:$true] %s375_s17 }
  0x15   : > { %s413_s20 = sshll.u32 %s6702_s19, 4  ;;  %s7838_s1 = sld [smem:[#allocation20_spill]]  ;;  %s6834_s20 = int_to_ptr.vmem [resolvable:$true] %s413_s20 }
  0x16   : > { %s7836_s15 = scalar_select %p6819_p3, 1, 0 }
  0x17   : > { %p5852_p5 = pneg %p6819_p3 }
  0x19   : > { %p6830_p6 = pnand %p5852_p5, %p7826_p1 }
  0x1b   : > { %s6422_s23 = scalar_lea.hbm %s7838_s1, 32  ;;  %p6844_p8 = pneg %p6830_p6 }
  0x1c   : > { %p6423_p7 = scmp.ne.s32.totalorder %s7838_s1, %s6422_s23  ;;  %p6429_p11 = scmp.lt.u32.totalorder %s6422_s23, %s7838_s1 }
  0x1e   : > { %p6425_p9 = pnand %p6844_p8, %p6423_p7 }
  0x20   : > { %p6426_p10 = pneg %p6425_p9 }
  0x22   : > { %p6431_p12 = pnand %p6429_p11, %p6426_p10 }
  0x24   : > { %6434 = shalt.err (!%p6431_p12)
}
  0x25   : > { %s6435_s21 = scalar_lea.vmem %s355_s30, 32  ;;  %p6443_p5 = scmp.lt.s32.totalorder %s355_s30, %s355_s30 }
  0x26   : > { %p6436_p13 = scmp.ne.s32.totalorder %s355_s30, %s6435_s21  ;;  %p6444_p4 = scmp.lt.s32.totalorder %s6435_s21, %s6435_s21 }
  0x28   : > { %p6438_p0 = pnand %p6436_p13, %p6844_p8  ;;  %p6445_p1 = por %p6444_p4, %p6443_p5 }
  0x2a   : > { %p6439_p2 = pneg %p6438_p0 }
  0x2c   : > { %p6446_p3 = pnand %p6445_p1, %p6439_p2 }
  0x2e   : > { %6449 = shalt.err (!%p6446_p3)
}
  0x2f   : > { %5855 = dma.hbm_to_vmem [thread:$0]  (!%p6830_p6), %s7838_s1, 32, %s355_s30, [#allocation6]  }
  0x30   : > { %s7840_s3 = sld [smem:[#allocation21_spill]] }
  0x36   : > { %s6450_s29 = scalar_lea.hbm %s7840_s3, 12288 }
  0x37   : > { %p6451_p7 = scmp.ne.s32.totalorder %s7840_s3, %s6450_s29  ;;  %p6457_p1 = scmp.lt.u32.totalorder %s6450_s29, %s7840_s3 }
  0x39   : > { %p6453_p9 = pnand %p6451_p7, %p6844_p8 }
  0x3b   : > { %p6454_p4 = pneg %p6453_p9 }
  0x3d   : > { %p6459_p3 = pnand %p6457_p1, %p6454_p4 }
  0x3f   : > { %6462 = shalt.err (!%p6459_p3)
}
  0x40   : > { %s6463_s30 = scalar_lea.vmem %s6826_s17, 12288  ;;  %p6471_p13 = scmp.lt.s32.totalorder %s6826_s17, %s6826_s17 }
  0x41   : > { %p6464_p10 = scmp.ne.s32.totalorder %s6826_s17, %s6463_s30  ;;  %p6472_p0 = scmp.lt.s32.totalorder %s6463_s30, %s6463_s30 }
  0x43   : > { %p6466_p11 = pnand %p6464_p10, %p6844_p8  ;;  %p6473_p2 = por %p6472_p0, %p6471_p13 }
  0x45   : > { %p6467_p12 = pneg %p6466_p11 }
  0x47   : > { %p6474_p5 = pnand %p6473_p2, %p6467_p12 }
  0x49   : > { %6477 = shalt.err (!%p6474_p5)
}
  0x4a   : > { %s6703_s12 = smov 384   ;;  %s6704_s10 = smov 24  }
  0x4b   : > { %5861 = dma.hbm_to_vmem [thread:$0]  (!%p6830_p6), %s7840_s3, 12288, %s6826_s17, [#allocation9], %s6703_s12, %s6703_s12, %s6704_s10  }
  0x4c   : > { %s6478_s29 = scalar_lea.hbm %s7820_s9, 16384 }
  0x4d   : > { %p6479_p7 = scmp.ne.s32.totalorder %s7820_s9, %s6478_s29  ;;  %p6485_p1 = scmp.lt.u32.totalorder %s6478_s29, %s7820_s9 }
  0x4f   : > { %p6481_p9 = pnand %p6479_p7, %p6844_p8 }
  0x51   : > { %p6482_p4 = pneg %p6481_p9 }
  0x53   : > { %p6487_p3 = pnand %p6485_p1, %p6482_p4 }
  0x55   : > { %6490 = shalt.err (!%p6487_p3)
}
  0x56   : > { %s6491_s17 = scalar_lea.vmem %s6834_s20, 16384  ;;  %p6499_p13 = scmp.lt.s32.totalorder %s6834_s20, %s6834_s20 }
  0x57   : > { %p6492_p10 = scmp.ne.s32.totalorder %s6834_s20, %s6491_s17  ;;  %p6500_p0 = scmp.lt.s32.totalorder %s6491_s17, %s6491_s17 }
  0x59   : > { %p6494_p11 = pnand %p6492_p10, %p6844_p8  ;;  %p6501_p2 = por %p6500_p0, %p6499_p13 }
  0x5b   : > { %p6495_p12 = pneg %p6494_p11 }
  0x5d   : > { %p6502_p5 = pnand %p6501_p2, %p6495_p12 }
  0x5f   : > { %6505 = shalt.err (!%p6502_p5)
}
  0x60   : > { %s6705_s12 = smov 512   ;;  %s6706_s1 = smov 32  }
  0x61   : > { %5867 = dma.hbm_to_vmem [thread:$0]  (!%p6830_p6), %s7820_s9, 16384, %s6834_s20, [#allocation12], %s6705_s12, %s6705_s12, %s6706_s1  }
  0x62   : > { %s6707_s24 = smov [#allocation7]   ;;  %s6708_s23 = smov [#allocation10]  }
  0x63   : > { %s365_s13 = sshll.u32 %s6707_s24, 4  ;;  %s391_s29 = sshll.u32 %s6708_s23, 4  ;;  %s366_s13 = int_to_ptr.vmem [resolvable:$true] %s365_s13  ;;  %s392_s29 = int_to_ptr.vmem [resolvable:$true] %s391_s29 }
  0x64   : > { %s6506_s30 = scalar_lea.hbm %s7813_s2, 32 }
  0x65   : > { %p6507_p7 = scmp.ne.s32.totalorder %s7813_s2, %s6506_s30  ;;  %p6513_p1 = scmp.lt.u32.totalorder %s6506_s30, %s7813_s2 }
  0x67   : > { %p6509_p9 = pnand %p6507_p7, %p6844_p8 }
  0x69   : > { %p6510_p4 = pneg %p6509_p9 }
  0x6b   : > { %p6515_p3 = pnand %p6513_p1, %p6510_p4 }
  0x6d   : > { %6518 = shalt.err (!%p6515_p3)
}
  0x6e   : > { %s6519_s20 = scalar_lea.vmem %s366_s13, 32  ;;  %p6527_p13 = scmp.lt.s32.totalorder %s366_s13, %s366_s13 }
  0x6f   : > { %p6520_p10 = scmp.ne.s32.totalorder %s366_s13, %s6519_s20  ;;  %p6528_p0 = scmp.lt.s32.totalorder %s6519_s20, %s6519_s20 }
  0x71   : > { %p6522_p11 = pnand %p6520_p10, %p6844_p8  ;;  %p6529_p2 = por %p6528_p0, %p6527_p13 }
  0x73   : > { %p6523_p12 = pneg %p6522_p11 }
  0x75   : > { %p6530_p5 = pnand %p6529_p2, %p6523_p12 }
  0x77   : > { %6533 = shalt.err (!%p6530_p5)
}
  0x78   : > { %5858 = dma.hbm_to_vmem [thread:$0]  (!%p6830_p6), %s7813_s2, 32, %s366_s13, [#allocation6]  }
  0x79   : > { %s6534_s1 = scalar_lea.hbm %s7816_s5, 4096 }
  0x7a   : > { %p6535_p7 = scmp.ne.s32.totalorder %s7816_s5, %s6534_s1  ;;  %p6541_p1 = scmp.lt.u32.totalorder %s6534_s1, %s7816_s5 }
  0x7c   : > { %p6537_p9 = pnand %p6535_p7, %p6844_p8 }
  0x7e   : > { %p6538_p4 = pneg %p6537_p9 }
  0x80   : > { %p6543_p3 = pnand %p6541_p1, %p6538_p4 }
  0x82   : > { %6546 = shalt.err (!%p6543_p3)
}
  0x83   : > { %s6547_s19 = scalar_lea.vmem %s392_s29, 4096  ;;  %p6555_p13 = scmp.lt.s32.totalorder %s392_s29, %s392_s29 }
  0x84   : > { %p6548_p10 = scmp.ne.s32.totalorder %s392_s29, %s6547_s19  ;;  %p6556_p0 = scmp.lt.s32.totalorder %s6547_s19, %s6547_s19 }
  0x86   : > { %p6550_p11 = pnand %p6548_p10, %p6844_p8  ;;  %p6557_p2 = por %p6556_p0, %p6555_p13 }
  0x88   : > { %p6551_p12 = pneg %p6550_p11 }
  0x8a   : > { %p6558_p5 = pnand %p6557_p2, %p6551_p12 }
  0x8c   : > { %6561 = shalt.err (!%p6558_p5)
}
  0x8d   : > { %s6709_s13 = smov 128   ;;  %s6710_s21 = smov 8  }
  0x8e   : > { %5864 = dma.hbm_to_vmem [thread:$0]  (!%p6830_p6), %s7816_s5, 4096, %s392_s29, [#allocation9], %s6709_s13, %s6709_s13, %s6710_s21  }
  0x8f   : > { %s6711_s20 = smov [#allocation13]   ;;  %s6562_s8 = scalar_lea.hbm %s7822_s11, 16384 }
  0x90   : > { %s429_s3 = sshll.u32 %s6711_s20, 4  ;;  %p6563_p7 = scmp.ne.s32.totalorder %s7822_s11, %s6562_s8  ;;  %s430_s3 = int_to_ptr.vmem [resolvable:$true] %s429_s3 }
  0x91   : > { %p6569_p1 = scmp.lt.u32.totalorder %s6562_s8, %s7822_s11 }
  0x92   : > { %p6565_p9 = pnand %p6563_p7, %p6844_p8 }
  0x94   : > { %p6566_p4 = pneg %p6565_p9 }
  0x96   : > { %p6571_p3 = pnand %p6569_p1, %p6566_p4 }
  0x98   : > { %6574 = shalt.err (!%p6571_p3)
}
  0x99   : > { %s6575_s29 = scalar_lea.vmem %s430_s3, 16384  ;;  %p6583_p13 = scmp.lt.s32.totalorder %s430_s3, %s430_s3 }
  0x9a   : > { %p6576_p10 = scmp.ne.s32.totalorder %s430_s3, %s6575_s29  ;;  %p6584_p0 = scmp.lt.s32.totalorder %s6575_s29, %s6575_s29 }
  0x9c   : > { %p6578_p11 = pnand %p6576_p10, %p6844_p8  ;;  %p6585_p2 = por %p6584_p0, %p6583_p13 }
  0x9e   : > { %p6579_p12 = pneg %p6578_p11 }
  0xa0   : > { %p6586_p5 = pnand %p6585_p2, %p6579_p12 }
  0xa2   : > { %6589 = shalt.err (!%p6586_p5)
}
  0xa3   : > { %5870 = dma.hbm_to_vmem [thread:$0]  (!%p6830_p6), %s7822_s11, 16384, %s430_s3, [#allocation12], %s6709_s13, %s6709_s13, %s6710_s21  }
  0xa4   : > { %s5346_s16 = sadd.s32 4294967294, %s6698_s28   ;;  %s6962_s18 = sadd.s32 1, %s6698_s28  }
  0xa5   : > { %s36_s30 = ssub.s32 %s6698_s28, %s6962_s18  ;;  %s39_s17 = sadd.s32 1, %s6694_s27 }
  0xa6   : > { %p37_p8 = scmp.eq.s32.totalorder %s36_s30, 0  ;;  %p46_p7 = scmp.ne.s32.totalorder %s6694_s27, %s6690_s26 }
  0xa7   : > { %p47_p9 = scmp.eq.s32.totalorder %s6698_s28, 0  ;;  %p52_p4 = scmp.ne.s32.totalorder %s6690_s26, %s6686_s25 }
  0xa8   : > { %s6973_s20 = scalar_select %p37_p8, %s6694_s27, %s39_s17  }
  0xa9   : > { %p6975_p1 = por %p47_p9, %p46_p7  ;;  %p7842_p3 = scmp.eq.s32.totalorder %s6814_s14, 0 }
  0xaa   : > { %p328_p10 = scmp.eq.s32.totalorder %s6814_s14, 1  ;;  %p334_p11 = scmp.eq.s32.totalorder %s5346_s16, 1 }
  0xab   : > { %p6981_p6 = por %p7842_p3, %p52_p4  ;;  %p5885_p12 = scmp.lt.s32.totalorder %s6698_s28, 2 }
  0xac   : > { %s446_s21 = sand.u32 1, %s6694_s27   ;;  %p6988_p13 = por %p328_p10, %p46_p7 }
  0xad   : > { %p6992_p0 = por %p334_p11, %p52_p4  ;;  %s5355_s8 = sshll.u32 %s446_s21, 5 }
  0xae   : > { %s7844_s3 = scalar_select %p6988_p13, 1, 0 }
  0xaf   : > { %s7845_s7 = scalar_select %p6992_p0, 1, 0 }
  0xb0   : > { %s5774_s1 = sshll.u32 %s6698_s28, 9  ;;  %s450_s29 = scalar_lea.vmem [#allocation2], %s5355_s8 }
  0xb1   : > { %s7000_s24 = scalar_lea.hbm %s7811_s0, %s5774_s1  ;;  %s457_s23 = sshll.u32 %s450_s29, 4  ;;  %s7002_s23 = int_to_ptr.vmem [resolvable:$true] %s457_s23 }
  0xb2   : > { %p7006_p2 = pnand %p5885_p12, %p6975_p1  ;;  %s7010_s16 = scalar_lea.sflag [#allocation3], %s446_s21 }
  0xb3   : > { %s6590_s30 = scalar_lea.hbm %s7000_s24, 512  ;;  %s6595_s12 = scalar_lea.hbm %s7811_s0, 1024 }
  0xb4   : > { %p6591_p5 = scmp.ne.s32.totalorder %s7000_s24, %s6590_s30  ;;  %p6592_p8 = pneg %p7006_p2 }
  0xb5   : > { %p6596_p4 = scmp.lt.u32.totalorder %s7000_s24, %s7811_s0  ;;  %p6597_p1 = scmp.lt.u32.totalorder %s6595_s12, %s6590_s30 }
  0xb6   : > { %p6593_p7 = pnand %p6592_p8, %p6591_p5  ;;  %p6599_p10 = scmp.lt.u32.totalorder %s6590_s30, %s7000_s24 }
  0xb7   : > { %p6598_p3 = por %p6597_p1, %p6596_p4 }
  0xb8   : > { %p6594_p9 = pneg %p6593_p7 }
  0xb9   : > { %p6600_p11 = por %p6599_p10, %p6598_p3 }
  0xbb   : > { %p6601_p12 = pnand %p6600_p11, %p6594_p9 }
  0xbd   : > { %6604 = shalt.err (!%p6601_p12)
}
  0xbe   : > { %s6605_s21 = scalar_lea.vmem %s7002_s23, 512  ;;  %s6712_s22 = smov [#allocation2]  }
  0xbf   : > { %p6606_p5 = scmp.ne.s32.totalorder %s7002_s23, %s6605_s21  ;;  %s6610_s29 = sshll.u32 %s6712_s22, 4  ;;  %s6611_s29 = int_to_ptr.vmem [resolvable:$false] %s6610_s29 }
  0xc0   : > { %s6612_s17 = scalar_lea.vmem %s6611_s29, 1024  ;;  %p6613_p13 = scmp.lt.s32.totalorder %s7002_s23, %s6611_s29 }
  0xc1   : > { %p6608_p7 = pnand %p6606_p5, %p6592_p8  ;;  %p6614_p4 = scmp.lt.s32.totalorder %s6612_s17, %s6605_s21 }
  0xc3   : > { %p6609_p0 = pneg %p6608_p7  ;;  %p6615_p1 = por %p6614_p4, %p6613_p13 }
  0xc5   : > { %p6616_p3 = pnand %p6615_p1, %p6609_p0 }
  0xc7   : > { %6619 = shalt.err (!%p6616_p3)
}
  0xc8   : > { %s6713_s30 = smov 256   ;;  %s6714_s8 = smov 16  }
  0xc9   : > { %5874 = dma.hbm_to_vmem [thread:$0]  (!%p7006_p2), %s7000_s24, 512, %s7002_s23, %s7010_s16, %s6713_s30, %s6713_s30, %s6714_s8  }
  0xca   : > { %p7847_p8 = scmp.ne.s32.totalorder %s7836_s15, 0 }
  0xcb   : > { %s7041_s12 = sand.u32 (!%p7847_p8), 1, %s6690_s26  }
  0xcc   : > { %469 = sbr.rel (%p7847_p8) target bundleno = 2715 (0xa9b), region = 72  ;;  %s5359_s1 = sshll.u32 (!%p7847_p8), %s7041_s12, 5 }
  0xcd   : > { %s472_s10 = scalar_lea.sflag (!%p7847_p8), [#allocation3], %s7041_s12  ;;  %s7047_s21 = scalar_lea.vmem (!%p7847_p8), [#allocation2], %s5359_s1 }
  0xd3   : > { %6665 = dma.done.wait (%p6981_p6), %s472_s10, 512  }
  0xd4   : > { %6667 = vsyncadd (%p6981_p6), %s472_s10, 4294966784  ;;  %p7848_p13 = scmp.eq.s32.totalorder %s6814_s14, 0 }
  0xd6   : > { %6669 = dma.done.wait (%p7848_p13), [#allocation6], 64   ;;  %p7849_p0 = pmov %p7848_p13 }
  0xd8   : > { %6671 = vsyncadd (%p7849_p0), [#allocation6], 4294967232  ;;  %p7850_p2 = pmov %p7849_p0 }
  0xd9   : > { %p7851_p9 = pmov %p7849_p0 }
  0xda   : > { %6673 = dma.done.wait (%p7850_p2), [#allocation9], 16384  }
  0xdb   : > { %6675 = vsyncadd (%p7851_p9), [#allocation9], 4294950912  ;;  %p7852_p10 = pmov %p7849_p0 }
  0xdc   : > { %p7853_p11 = pmov %p7849_p0 }
  0xdd   : > { %6677 = dma.done.wait (%p7852_p10), [#allocation12], 32768  }
  0xde   : > { %6679 = vsyncadd (%p7853_p11), [#allocation12], 4294934528  ;;  %v543_v0 = vld [vmem:[%s7047_s21] sm:$0xff]  ;;  %v544_v1 = vld [vmem:[%s7047_s21 + $0x8] sm:$0xff]  ;;  %v583_v57 = vlaneseq  ;;  %vm6716_vm0 = vmmov 0   ;;  %vm2150_vm2 = vcmask 130048  }
  0xdf   : > { %v545_v2 = vld [vmem:[%s7047_s21 + $0x10] sm:$0xff]  ;;  %v549_v3 = vadd.f32 %v544_v1, %v543_v0  ;;  %v546_v4 = vld [vmem:[%s7047_s21 + $0x18] sm:$0xff]  ;;  %v5946_v6 = vld [vmem:[#allocation8 + $0x4] ss:$24 sps:$4 sm:$0xff]   ;;  %s7854_s22 = sld [smem:[#allocation22_spill]]  ;;  %s7855_s30 = sld [smem:[#allocation23_spill]] }
  0xe0   : > { %v552_v5 = vadd.f32 %v546_v4, %v545_v2  ;;  %v5948_v7 = vld [vmem:[#allocation8] ss:$24 sps:$4 sm:$0xff]   ;;  %v5949_v8 = vld [vmem:[#allocation8 + $0x34] ss:$24 sps:$4 sm:$0xff]   ;;  %1222 = vmatprep.subr.bf16.mxu1 %v5946_v6  ;;  %v5951_v9 = vld [vmem:[#allocation8 + $0x30] ss:$24 sps:$4 sm:$0xff]  }
  0xe1   : > { %550 = vadd.xlane.f32.xlu0 %v549_v3  ;;  %1223 = vmatpush1.bf16.msra.mxu1 %v5948_v7  ;;  %v5952_v10 = vld [vmem:[#allocation8 + $0x64] ss:$24 sps:$4 sm:$0xff]   ;;  %v5954_v11 = vld [vmem:[#allocation8 + $0x60] ss:$24 sps:$4 sm:$0xff]   ;;  %v5955_v12 = vld [vmem:[#allocation8 + $0x94] ss:$24 sps:$4 sm:$0xff]  }
  0xe2   : > { %1224 = vmatprep.subr.bf16.mxu1 %v5949_v8  ;;  %v5957_v13 = vld [vmem:[#allocation8 + $0x90] ss:$24 sps:$4 sm:$0xff]   ;;  %v5958_v14 = vld [vmem:[#allocation8 + $0xc4] ss:$24 sps:$4 sm:$0xff]   ;;  %v5960_v15 = vld [vmem:[#allocation8 + $0xc0] ss:$24 sps:$4 sm:$0xff]  }
  0xe3   : > { %v5961_v16 = vld [vmem:[#allocation8 + $0xf4] ss:$24 sps:$4 sm:$0xff]   ;;  %v5963_v17 = vld [vmem:[#allocation8 + $0xf0] ss:$24 sps:$4 sm:$0xff]   ;;  %v5964_v18 = vld [vmem:[#allocation8 + $0x124] ss:$24 sps:$4 sm:$0xff]  }
  0xe4   : > { %v5966_v19 = vld [vmem:[#allocation8 + $0x120] ss:$24 sps:$4 sm:$0xff]   ;;  %v5967_v20 = vld [vmem:[#allocation8 + $0x154] ss:$24 sps:$4 sm:$0xff]   ;;  %v5969_v21 = vld [vmem:[#allocation8 + $0x150] ss:$24 sps:$4 sm:$0xff]  }
  0xe5   : > { %553 = vadd.xlane.f32.xlu0 %v552_v5  ;;  %1225 = vmatpush1.bf16.msra.mxu1 %v5951_v9  ;;  %v5970_v22 = vld [vmem:[#allocation8 + $0x184] ss:$24 sps:$4 sm:$0xff]   ;;  %v5972_v23 = vld [vmem:[#allocation8 + $0x180] ss:$24 sps:$4 sm:$0xff]   ;;  %v5973_v24 = vld [vmem:[#allocation8 + $0x1b4] ss:$24 sps:$4 sm:$0xff]  }
  0xe6   : > { %1226 = vmatprep.subr.bf16.mxu1 %v5952_v10  ;;  %v5975_v39 = vld [vmem:[#allocation8 + $0x1b0] ss:$24 sps:$4 sm:$0xff]   ;;  %v5976_v40 = vld [vmem:[#allocation8 + $0x1e4] ss:$24 sps:$4 sm:$0xff]   ;;  %v5978_v41 = vld [vmem:[#allocation8 + $0x1e0] ss:$24 sps:$4 sm:$0xff]  }
  0xe7   : > { %v5979_v42 = vld [vmem:[#allocation8 + $0x214] ss:$24 sps:$4 sm:$0xff]   ;;  %v5981_v43 = vld [vmem:[#allocation8 + $0x210] ss:$24 sps:$4 sm:$0xff]   ;;  %v5982_v44 = vld [vmem:[#allocation8 + $0x244] ss:$24 sps:$4 sm:$0xff]  }
  0xe8   : > { %v5984_v45 = vld [vmem:[#allocation8 + $0x240] ss:$24 sps:$4 sm:$0xff]   ;;  %v5985_v46 = vld [vmem:[#allocation8 + $0x274] ss:$24 sps:$4 sm:$0xff]   ;;  %v5987_v47 = vld [vmem:[#allocation8 + $0x270] ss:$24 sps:$4 sm:$0xff]  }
  0xe9   : > { %1227 = vmatpush1.bf16.msra.mxu1 %v5954_v11  ;;  %v5988_v48 = vld [vmem:[#allocation8 + $0x2a4] ss:$24 sps:$4 sm:$0xff]   ;;  %v5990_v49 = vld [vmem:[#allocation8 + $0x2a0] ss:$24 sps:$4 sm:$0xff]   ;;  %v5991_v50 = vld [vmem:[#allocation8 + $0x2d4] ss:$24 sps:$4 sm:$0xff]  }
  0xea   : > { %1228 = vmatprep.subr.bf16.mxu1 %v5955_v12  ;;  %v5993_v51 = vld [vmem:[#allocation8 + $0x2d0] ss:$24 sps:$4 sm:$0xff]   ;;  %v5996_v52 = vld [vmem:[#allocation8 + $0xc] ss:$24 sps:$4 sm:$0xff]   ;;  %v7070_v60 = vshrl.u32 %v583_v57, 7  ;;  %s7857_s24 = sld [smem:[#allocation25_spill]] }
  0xeb   : > { %v547_v63 = vld [vmem:[#allocation5] sm:$0x3]  ;;  %s541_s23 = scalar_lea.vmem [#allocation14], %s5359_s1  ;;  %s5775_s16 = sshll.u32 %s6814_s14, 9 }
  0xec   : > { %v7073_v61 = vsub.s32 1, %v7070_v60  ;;  %v7076_v62 = vsub.s32 0, %v7070_v60  ;;  %s5216_s19 = sshll.u32 %s541_s23, 4  ;;  %s7858_s29 = sld [smem:[#allocation26_spill]]  ;;  %s7759_s19 = int_to_ptr.vmem [resolvable:$true] %s5216_s19 }
  0xed   : > { %1229 = vmatpush1.bf16.msra.mxu1 %v5957_v13  ;;  %s5203_s17 = scalar_lea.sflag [#allocation4], %s7041_s12  ;;  %p7859_p12 = scmp.ne.s32.totalorder %s7844_s3, 0 }
  0xee   : > { %1230 = vmatprep.subr.bf16.mxu1 %v5958_v14  ;;  %v590_v3 = vrot.slane %v547_v63, %v7073_v61  ;;  %v586_v5 = vrot.slane %v547_v63, %v7076_v62  ;;  %v6051_v63 = vld [vmem:[#allocation8 + $0xa0] ss:$24 sps:$4 sm:$0xff]   ;;  %s6720_s8 = smov [#allocation14]  }
  0xef   : > { %s6624_s10 = sshll.u32 %s6720_s8, 4  ;;  %s6625_s10 = int_to_ptr.vmem [resolvable:$false] %s6624_s10 }
  0xf0   : > { %p6627_p4 = scmp.lt.s32.totalorder %s7759_s19, %s6625_s10 }
  0xf1   : > { %1231 = vmatpush1.bf16.msra.mxu1 %v5960_v15 }
  0xf2   : > { %1232 = vmatprep.subr.bf16.mxu1 %v5961_v16  ;;  %s7766_s14 = scalar_lea.hbm %s7858_s29, %s5775_s16 }
  0xf5   : > { %1233 = vmatpush1.bf16.msra.mxu1 %v5963_v17 }
  0xf6   : > { %1234 = vmatprep.subr.bf16.mxu1 %v5964_v18 }
  0xf9   : > { %1235 = vmatpush1.bf16.msra.mxu1 %v5966_v19 }
  0xfa   : > { %1236 = vmatprep.subr.bf16.mxu1 %v5967_v20  ;;  %v5994_v20 = vld [vmem:[#allocation8 + $0x8] ss:$24 sps:$4 sm:$0xff]  }
  0xfd   : > { %1237 = vmatpush1.bf16.msra.mxu1 %v5969_v21 }
  0xfe   : > { %1238 = vmatprep.subr.bf16.mxu1 %v5970_v22  ;;  %v5999_v22 = vld [vmem:[#allocation8 + $0x3c] ss:$24 sps:$4 sm:$0xff]  }
 0x101   : > { %1239 = vmatpush1.bf16.msra.mxu1 %v5972_v23  ;;  %v5997_v23 = vld [vmem:[#allocation8 + $0x38] ss:$24 sps:$4 sm:$0xff]  }
 0x102   : > { %1240 = vmatprep.subr.bf16.mxu1 %v5973_v24  ;;  %v6002_v24 = vld [vmem:[#allocation8 + $0x6c] ss:$24 sps:$4 sm:$0xff]  }
 0x105   : > { %1241 = vmatpush1.bf16.msra.mxu1 %v5975_v39  ;;  %v6021_v39 = vld [vmem:[#allocation8 + $0x1b8] ss:$24 sps:$4 sm:$0xff]  }
 0x106   : > { %1242 = vmatprep.subr.bf16.mxu1 %v5976_v40  ;;  %v6026_v40 = vld [vmem:[#allocation8 + $0x1ec] ss:$24 sps:$4 sm:$0xff]  }
 0x109   : > { %1243 = vmatpush1.bf16.msra.mxu1 %v5978_v41  ;;  %v6024_v41 = vld [vmem:[#allocation8 + $0x1e8] ss:$24 sps:$4 sm:$0xff]  }
 0x10a   : > { %1244 = vmatprep.subr.bf16.mxu1 %v5979_v42  ;;  %v6029_v42 = vld [vmem:[#allocation8 + $0x21c] ss:$24 sps:$4 sm:$0xff]  }
 0x10d   : > { %1245 = vmatpush1.bf16.msra.mxu1 %v5981_v43  ;;  %v6027_v43 = vld [vmem:[#allocation8 + $0x218] ss:$24 sps:$4 sm:$0xff]  }
 0x10e   : > { %1246 = vmatprep.subr.bf16.mxu1 %v5982_v44  ;;  %v6032_v44 = vld [vmem:[#allocation8 + $0x24c] ss:$24 sps:$4 sm:$0xff]  }
 0x111   : > { %1247 = vmatpush1.bf16.msra.mxu1 %v5984_v45  ;;  %v6030_v45 = vld [vmem:[#allocation8 + $0x248] ss:$24 sps:$4 sm:$0xff]  }
 0x112   : > { %1248 = vmatprep.subr.bf16.mxu1 %v5985_v46  ;;  %v6035_v46 = vld [vmem:[#allocation8 + $0x27c] ss:$24 sps:$4 sm:$0xff]  }
 0x115   : > { %1249 = vmatpush1.bf16.msra.mxu1 %v5987_v47  ;;  %v6033_v47 = vld [vmem:[#allocation8 + $0x278] ss:$24 sps:$4 sm:$0xff]  }
 0x116   : > { %1250 = vmatprep.subr.bf16.mxu1 %v5988_v48  ;;  %v6038_v48 = vld [vmem:[#allocation8 + $0x2ac] ss:$24 sps:$4 sm:$0xff]  }
 0x119   : > { %1251 = vmatpush1.bf16.msra.mxu1 %v5990_v49  ;;  %v6036_v49 = vld [vmem:[#allocation8 + $0x2a8] ss:$24 sps:$4 sm:$0xff]  }
 0x11a   : > { %1252 = vmatprep.subr.bf16.mxu1 %v5991_v50  ;;  %v6041_v50 = vld [vmem:[#allocation8 + $0x2dc] ss:$24 sps:$4 sm:$0xff]  }
 0x11d   : > { %1253 = vmatpush1.bf16.msra.mxu1 %v5993_v51  ;;  %v6039_v51 = vld [vmem:[#allocation8 + $0x2d8] ss:$24 sps:$4 sm:$0xff]  }
 0x11e   : > { %1265 = vmatprep.subr.bf16.mxu1 %v5996_v52  ;;  %v6044_v52 = vld [vmem:[#allocation8 + $0x14] ss:$24 sps:$4 sm:$0xff]  }
 0x16e   : > { %v551_v25 = vpop.xlane.xlu0 %550 }
 0x16f   : > { %v556_v26 = vmul.f32 0.00390625, %v551_v25  ;;  %v6000_v25 = vld [vmem:[#allocation8 + $0x68] ss:$24 sps:$4 sm:$0xff]  }
 0x171   : > { %v558_v27 = vsub.f32 %v543_v0, %v556_v26  ;;  %v559_v28 = vsub.f32 %v544_v1, %v556_v26  ;;  %v548_v1 = vld [vmem:[#allocation7] sm:$0x3] }
 0x172   : > { %v554_v29 = vpop.xlane.xlu0 %553  ;;  %v605_v7 = vrot.slane %v548_v1, %v7073_v61  ;;  %v601_v8 = vrot.slane %v548_v1, %v7076_v62  ;;  %v6005_v26 = vld [vmem:[#allocation8 + $0x9c] ss:$24 sps:$4 sm:$0xff]   ;;  %v6054_v1 = vld [vmem:[#allocation8 + $0xd0] ss:$24 sps:$4 sm:$0xff]  }
 0x173   : > { %v557_v30 = vmul.f32 0.00390625, %v554_v29  ;;  %v562_v31 = vmul.f32 %v558_v27, %v558_v27  ;;  %v563_v32 = vmul.f32 %v559_v28, %v559_v28  ;;  %v6006_v29 = vld [vmem:[#allocation8 + $0xc8] ss:$24 sps:$4 sm:$0xff]  }
 0x175   : > { %v560_v33 = vsub.f32 %v545_v2, %v557_v30  ;;  %v561_v34 = vsub.f32 %v546_v4, %v557_v30  ;;  %v566_v35 = vadd.f32 %v563_v32, %v562_v31  ;;  %v6011_v30 = vld [vmem:[#allocation8 + $0xfc] ss:$24 sps:$4 sm:$0xff]   ;;  %v6009_v31 = vld [vmem:[#allocation8 + $0xf8] ss:$24 sps:$4 sm:$0xff]   ;;  %v6014_v32 = vld [vmem:[#allocation8 + $0x12c] ss:$24 sps:$4 sm:$0xff]  }
 0x177   : > { %567 = vadd.xlane.f32.xlu1 %v566_v35  ;;  %v564_v36 = vmul.f32 %v560_v33, %v560_v33  ;;  %v565_v37 = vmul.f32 %v561_v34, %v561_v34  ;;  %v6015_v35 = vld [vmem:[#allocation8 + $0x158] ss:$24 sps:$4 sm:$0xff]  }
 0x179   : > { %v569_v38 = vadd.f32 %v565_v37, %v564_v36  ;;  %v6020_v36 = vld [vmem:[#allocation8 + $0x18c] ss:$24 sps:$4 sm:$0xff]   ;;  %v6018_v37 = vld [vmem:[#allocation8 + $0x188] ss:$24 sps:$4 sm:$0xff]  }
 0x17b   : > { %570 = vadd.xlane.f32.xlu1 %v569_v38  ;;  %v6023_v38 = vld [vmem:[#allocation8 + $0x1bc] ss:$24 sps:$4 sm:$0xff]  }
 0x204   : > { %v568_v53 = vpop.xlane.xlu1 %567 }
 0x205   : > { %v572_v54 = vmul.f32 0.00390625, %v568_v53  ;;  %v6042_v53 = vld [vmem:[#allocation8 + $0x10] ss:$24 sps:$4 sm:$0xff]  }
 0x207   : > { %v574_v55 = vadd.f32 1e-05, %v572_v54  ;;  %v6047_v54 = vld [vmem:[#allocation8 + $0x44] ss:$24 sps:$4 sm:$0xff]  }
 0x208   : > { %v571_v56 = vpop.xlane.xlu1 %570 }
 0x209   : > { %6330 = vrsqrt.f32 %v574_v55  ;;  %v573_v58 = vmul.f32 0.00390625, %v571_v56  ;;  %v6045_v55 = vld [vmem:[#allocation8 + $0x40] ss:$24 sps:$4 sm:$0xff]   ;;  %v6050_v56 = vld [vmem:[#allocation8 + $0x74] ss:$24 sps:$4 sm:$0xff]  }
 0x20b   : > { %v575_v59 = vadd.f32 1e-05, %v573_v58  ;;  %v6048_v58 = vld [vmem:[#allocation8 + $0x70] ss:$24 sps:$4 sm:$0xff]  }
 0x20d   : > { %6332 = vrsqrt.f32 %v575_v59  ;;  %v6053_v59 = vld [vmem:[#allocation8 + $0xa4] ss:$24 sps:$4 sm:$0xff]  }
 0x213   : > { %v6331_v0 = vpop.eup %6330 }
 0x214   : > { %v579_v2 = vmul.f32 %v6331_v0, %v559_v28  ;;  %v578_v4 = vmul.f32 %v6331_v0, %v558_v27  ;;  %v6003_v27 = vld [vmem:[#allocation8 + $0x98] ss:$24 sps:$4 sm:$0xff]   ;;  %v6008_v28 = vld [vmem:[#allocation8 + $0xcc] ss:$24 sps:$4 sm:$0xff]  }
 0x215   : > { %v6056_v0 = vld [vmem:[#allocation8 + $0xd4] ss:$24 sps:$4 sm:$0xff]  }
 0x216   : > { %v594_v10 = vmul.f32 %v590_v3, %v579_v2  ;;  %v593_v12 = vmul.f32 %v586_v5, %v578_v4  ;;  %v6059_v2 = vld [vmem:[#allocation8 + $0x104] ss:$24 sps:$4 sm:$0xff]   ;;  %v6062_v4 = vld [vmem:[#allocation8 + $0x134] ss:$24 sps:$4 sm:$0xff]  }
 0x217   : > { %v6333_v6 = vpop.eup %6332 }
 0x218   : > { %v581_v9 = vmul.f32 %v6333_v6, %v561_v34  ;;  %v580_v11 = vmul.f32 %v6333_v6, %v560_v33  ;;  %v609_v15 = vadd.f32 %v605_v7, %v594_v10  ;;  %v608_v17 = vadd.f32 %v601_v8, %v593_v12  ;;  %v6012_v33 = vld [vmem:[#allocation8 + $0x128] ss:$24 sps:$4 sm:$0xff]   ;;  %v6017_v34 = vld [vmem:[#allocation8 + $0x15c] ss:$24 sps:$4 sm:$0xff]  }
 0x219   : > { %v6715_v6 = vmov 0.0   ;;  %v6066_v10 = vld [vmem:[#allocation8 + $0x190] ss:$24 sps:$4 sm:$0xff]   ;;  %v6069_v12 = vld [vmem:[#allocation8 + $0x1c0] ss:$24 sps:$4 sm:$0xff]  }
 0x21a   : > { %v596_v13 = vmul.f32 %v590_v3, %v581_v9  ;;  %v595_v14 = vmul.f32 %v586_v5, %v580_v11  ;;  %v6057_v3 = vld [vmem:[#allocation8 + $0x100] ss:$24 sps:$4 sm:$0xff]   ;;  %v6060_v5 = vld [vmem:[#allocation8 + $0x130] ss:$24 sps:$4 sm:$0xff]   ;;  %5784 = vmatprep.subr.bf16.mxu0 %v6715_v6  ;;  %v6068_v9 = vld [vmem:[#allocation8 + $0x194] ss:$24 sps:$4 sm:$0xff]   ;;  %5786 = vmatprep.mubr.msk.bf16.mxu0 %vm6716_vm0, %v6715_v6 }
 0x21b   : > { %v6071_v11 = vld [vmem:[#allocation8 + $0x1c4] ss:$24 sps:$4 sm:$0xff]  }
 0x21c   : > { %v611_v16 = vadd.f32 %v605_v7, %v596_v13  ;;  %v610_v18 = vadd.f32 %v601_v8, %v595_v14  ;;  %v6065_v7 = vld [vmem:[#allocation8 + $0x164] ss:$24 sps:$4 sm:$0xff]   ;;  %v6063_v8 = vld [vmem:[#allocation8 + $0x160] ss:$24 sps:$4 sm:$0xff]   ;;  %v6074_v13 = vld [vmem:[#allocation8 + $0x1f4] ss:$24 sps:$4 sm:$0xff]  }
 0x21d   : > { %v6072_v14 = vld [vmem:[#allocation8 + $0x1f0] ss:$24 sps:$4 sm:$0xff]  }
 0x21e   : > { %v7082_v19 = vpack.c.bf16 %v611_v16, %v609_v15  ;;  %v7084_v21 = vpack.c.bf16 %v610_v18, %v608_v17  ;;  %v6077_v15 = vld [vmem:[#allocation8 + $0x224] ss:$24 sps:$4 sm:$0xff]   ;;  %v6075_v16 = vld [vmem:[#allocation8 + $0x220] ss:$24 sps:$4 sm:$0xff]   ;;  %v6080_v17 = vld [vmem:[#allocation8 + $0x254] ss:$24 sps:$4 sm:$0xff]  }
 0x21f   : > { %v6078_v18 = vld [vmem:[#allocation8 + $0x250] ss:$24 sps:$4 sm:$0xff]  }
 0x220   : > { %1254 = vmatprep.mubr.bf16.mxu1 %v7082_v19 }
 0x221   : > { %1255 = vmatmul.mubr.bf16.vlgmr.msra.gmra.mrb[0].mxu1 %v7084_v21 }
 0x222   : > { %1266 = vmatpush1.bf16.msra.mxu1 %v5994_v20  ;;  %1297 = vmatprep.mubr.bf16.mxu1 %v7082_v19  ;;  %v6081_v20 = vld [vmem:[#allocation8 + $0x280] ss:$24 sps:$4 sm:$0xff]  }
 0x223   : > { %1267 = vmatprep.subr.bf16.mxu1 %v5999_v22  ;;  %v6086_v22 = vld [vmem:[#allocation8 + $0x2b4] ss:$24 sps:$4 sm:$0xff]  }
 0x226   : > { %1268 = vmatpush1.bf16.msra.mxu1 %v5997_v23  ;;  %v6084_v23 = vld [vmem:[#allocation8 + $0x2b0] ss:$24 sps:$4 sm:$0xff]  }
 0x227   : > { %1269 = vmatprep.subr.bf16.mxu1 %v6002_v24  ;;  %v6089_v24 = vld [vmem:[#allocation8 + $0x2e4] ss:$24 sps:$4 sm:$0xff]  }
 0x22a   : > { %1270 = vmatpush1.bf16.msra.mxu1 %v6000_v25  ;;  %v6087_v25 = vld [vmem:[#allocation8 + $0x2e0] ss:$24 sps:$4 sm:$0xff]  }
 0x22b   : > { %1271 = vmatprep.subr.bf16.mxu1 %v6005_v26  ;;  %v6717_v26 = vmov 1983009808  }
 0x22e   : > { %1272 = vmatpush1.bf16.msra.mxu1 %v6003_v27  ;;  %v1353_v27 = vunpack.c.l.s4 %v6717_v26 }
 0x22f   : > { %1273 = vmatprep.subr.bf16.mxu1 %v6008_v28  ;;  %v7101_v28 = vld [vmem:[%s7815_s4] sm:$0x3f] }
 0x232   : > { %1274 = vmatpush1.bf16.msra.mxu1 %v6006_v29  ;;  %v1354_v29 = vunpack.c.0.s8 %v1353_v27 }
 0x233   : > { %1275 = vmatprep.subr.bf16.mxu1 %v6011_v30  ;;  %v6718_v30 = vmov 1934713408  }
 0x236   : > { %1276 = vmatpush1.bf16.msra.mxu1 %v6009_v31  ;;  %v1384_v31 = vunpack.c.l.s4 %v6718_v30 }
 0x237   : > { %1277 = vmatprep.subr.bf16.mxu1 %v6014_v32  ;;  %v719_v32 = vrot.slane %v7101_v28, %v7073_v61 }
 0x23a   : > { %1278 = vmatpush1.bf16.msra.mxu1 %v6012_v33  ;;  %v7108_v33 = vsub.s32 %v1354_v29, %v7070_v60 }
 0x23b   : > { %1279 = vmatprep.subr.bf16.mxu1 %v6017_v34  ;;  %v1385_v34 = vunpack.c.0.s8 %v1384_v31 }
 0x23e   : > { %1280 = vmatpush1.bf16.msra.mxu1 %v6015_v35 }
 0x23f   : > { %1281 = vmatprep.subr.bf16.mxu1 %v6020_v36 }
 0x242   : > { %1282 = vmatpush1.bf16.msra.mxu1 %v6018_v37 }
 0x243   : > { %1283 = vmatprep.subr.bf16.mxu1 %v6023_v38 }
 0x246   : > { %1284 = vmatpush1.bf16.msra.mxu1 %v6021_v39 }
 0x247   : > { %1285 = vmatprep.subr.bf16.mxu1 %v6026_v40 }
 0x24a   : > { %1286 = vmatpush1.bf16.msra.mxu1 %v6024_v41 }
 0x24b   : > { %1287 = vmatprep.subr.bf16.mxu1 %v6029_v42 }
 0x24e   : > { %1288 = vmatpush1.bf16.msra.mxu1 %v6027_v43 }
 0x24f   : > { %1289 = vmatprep.subr.bf16.mxu1 %v6032_v44  ;;  %v7113_v44 = vsub.s32 %v1385_v34, %v7070_v60 }
 0x252   : > { %1290 = vmatpush1.bf16.msra.mxu1 %v6030_v45 }
 0x253   : > { %1291 = vmatprep.subr.bf16.mxu1 %v6035_v46 }
 0x256   : > { %1292 = vmatpush1.bf16.msra.mxu1 %v6033_v47 }
 0x257   : > { %1293 = vmatprep.subr.bf16.mxu1 %v6038_v48 }
 0x25a   : > { %1294 = vmatpush1.bf16.msra.mxu1 %v6036_v49 }
 0x25b   : > { %1295 = vmatprep.subr.bf16.mxu1 %v6041_v50 }
 0x25e   : > { %1296 = vmatpush1.bf16.msra.mxu1 %v6039_v51 }
 0x25f   : > { %1308 = vmatprep.subr.bf16.mxu1 %v6044_v52 }
 0x261   : > { %1298 = vmatmul.mubr.bf16.vlgmr.msra.gmra.mrb[4].mxu1 %v7084_v21 }
 0x262   : > { %1309 = vmatpush1.bf16.msra.mxu1 %v6042_v53  ;;  %1340 = vmatprep.mubr.bf16.mxu1 %v7082_v19  ;;  %v6083_v19 = vld [vmem:[#allocation8 + $0x284] ss:$24 sps:$4 sm:$0xff]  }
 0x263   : > { %1310 = vmatprep.subr.bf16.mxu1 %v6047_v54 }
 0x266   : > { %1311 = vmatpush1.bf16.msra.mxu1 %v6045_v55 }
 0x267   : > { %1312 = vmatprep.subr.bf16.mxu1 %v6050_v56 }
 0x26a   : > { %1313 = vmatpush1.bf16.msra.mxu1 %v6048_v58 }
 0x26b   : > { %1314 = vmatprep.subr.bf16.mxu1 %v6053_v59 }
 0x26e   : > { %1315 = vmatpush1.bf16.msra.mxu1 %v6051_v63 }
 0x26f   : > { %1316 = vmatprep.subr.bf16.mxu1 %v6056_v0 }
 0x272   : > { %1317 = vmatpush1.bf16.msra.mxu1 %v6054_v1 }
 0x273   : > { %1318 = vmatprep.subr.bf16.mxu1 %v6059_v2 }
 0x276   : > { %1319 = vmatpush1.bf16.msra.mxu1 %v6057_v3 }
 0x277   : > { %1320 = vmatprep.subr.bf16.mxu1 %v6062_v4 }
 0x27a   : > { %1321 = vmatpush1.bf16.msra.mxu1 %v6060_v5 }
 0x27b   : > { %1322 = vmatprep.subr.bf16.mxu1 %v6065_v7 }
 0x27e   : > { %1323 = vmatpush1.bf16.msra.mxu1 %v6063_v8 }
 0x27f   : > { %1324 = vmatprep.subr.bf16.mxu1 %v6068_v9 }
 0x282   : > { %1325 = vmatpush1.bf16.msra.mxu1 %v6066_v10 }
 0x283   : > { %1326 = vmatprep.subr.bf16.mxu1 %v6071_v11 }
 0x286   : > { %1327 = vmatpush1.bf16.msra.mxu1 %v6069_v12 }
 0x287   : > { %1328 = vmatprep.subr.bf16.mxu1 %v6074_v13 }
 0x28a   : > { %1329 = vmatpush1.bf16.msra.mxu1 %v6072_v14 }
 0x28b   : > { %1330 = vmatprep.subr.bf16.mxu1 %v6077_v15 }
 0x28e   : > { %1331 = vmatpush1.bf16.msra.mxu1 %v6075_v16 }
 0x28f   : > { %1332 = vmatprep.subr.bf16.mxu1 %v6080_v17 }
 0x292   : > { %1333 = vmatpush1.bf16.msra.mxu1 %v6078_v18 }
 0x293   : > { %1334 = vmatprep.subr.bf16.mxu1 %v6083_v19 }
 0x296   : > { %1335 = vmatpush1.bf16.msra.mxu1 %v6081_v20 }
 0x297   : > { %1336 = vmatprep.subr.bf16.mxu1 %v6086_v22 }
 0x29a   : > { %1337 = vmatpush1.bf16.msra.mxu1 %v6084_v23 }
 0x29b   : > { %1338 = vmatprep.subr.bf16.mxu1 %v6089_v24 }
 0x29e   : > { %1339 = vmatpush1.bf16.msra.mxu1 %v6087_v25 }
 0x29f   : > { %5796 = vmatprep.subr.bf16.mxu1 %v6715_v6 }
 0x2a1   : > { %1341 = vmatmul.mubr.bf16.vlgmr.msra.gmra.mrb[8].mxu1 %v7084_v21  ;;  %v715_v21 = vrot.slane %v7101_v28, %v7076_v62 }
 0x2a2   : > { %5798 = vmatprep.mubr.msk.bf16.mxu1 %vm6716_vm0, %v6715_v6 }
 0x2f4   : > { %v1256_v35 = vpop.f32.mrb[0].mxu1 }
 0x2f5   : > { %v1257_v36 = vadd.f32 %v1256_v35, %v715_v21  ;;  %v1258_v37 = vpop.f32.mrb[1].mxu1 }
 0x2f6   : > { %v1259_v38 = vadd.f32 %v1258_v37, %v719_v32  ;;  %v1260_v39 = vpop.f32.mrb[2].mxu1 }
 0x2f7   : > { %v1351_v40 = vcombine.high %v1257_v36, %v6715_v6  ;;  %v1358_v41 = vrot.slane %v1257_v36, %v7108_v33  ;;  %v1261_v42 = vadd.f32 %v1260_v39, %v715_v21  ;;  %v1262_v43 = vpop.f32.mrb[3].mxu1 }
 0x2f8   : > { %v1366_v45 = vcombine.high %v1259_v38, %v6715_v6  ;;  %v1373_v46 = vrot.slane %v1259_v38, %v7108_v33  ;;  %v1263_v47 = vadd.f32 %v1262_v43, %v719_v32 }
 0x2f9   : > { %v1365_v48 = vrot.slane %v1351_v40, %v7108_v33  ;;  %v1417_v49 = vcombine.high %v1261_v42, %v6715_v6  ;;  %v1424_v50 = vrot.slane %v1261_v42, %v7108_v33 }
 0x2fa   : > { %v1380_v51 = vrot.slane %v1366_v45, %v7108_v33  ;;  %v1381_v52 = vcombine.low %v1358_v41, %v1373_v46  ;;  %v1382_v53 = vcombine.high %v1358_v41, %v1373_v46  ;;  %v1432_v54 = vcombine.high %v1263_v47, %v6715_v6 }
 0x2fb   : > { %v1431_v55 = vrot.slane %v1417_v49, %v7108_v33  ;;  %v1439_v56 = vrot.slane %v1263_v47, %v7108_v33  ;;  %v722_v46 = vsub.s32 2, %v7070_v60  ;;  %v726_v47 = vsub.s32 3, %v7070_v60 }
 0x2fc   : > { %v1389_v58 = vrot.slane %v1381_v52, %v7113_v44  ;;  %v1396_v59 = vrot.slane %v1382_v53, %v7113_v44  ;;  %v1397_v63 = vcombine.low %v1365_v48, %v1380_v51  ;;  %v1398_v0 = vcombine.high %v1365_v48, %v1380_v51 }
 0x2fd   : > { %v1446_v1 = vrot.slane %v1432_v54, %v7108_v33  ;;  %v1447_v2 = vcombine.low %v1424_v50, %v1439_v56  ;;  %v1448_v3 = vcombine.high %v1424_v50, %v1439_v56  ;;  %v723_v48 = vrot.slane %v7101_v28, %v722_v46 }
 0x2fe   : > { %v1405_v4 = vrot.slane %v1397_v63, %v7113_v44  ;;  %v1412_v5 = vrot.slane %v1398_v0, %v7113_v44  ;;  %v1483_v7 = vcombine.low %v1389_v58, %v1396_v59  ;;  %v5463_v8 = vcombine.high %v1389_v58, %v1396_v59 }
 0x2ff   : > { %v1455_v9 = vrot.slane %v1447_v2, %v7113_v44  ;;  %v1462_v10 = vrot.slane %v1448_v3, %v7113_v44  ;;  %v1463_v11 = vcombine.low %v1431_v55, %v1446_v1  ;;  %v1464_v12 = vcombine.high %v1431_v55, %v1446_v1 }
 0x300   : > { %v1490_v13 = vrot.slane %v1483_v7, %v7108_v33  ;;  %v1498_v14 = vrot.slane %v5463_v8, %v7108_v33  ;;  %v1499_v15 = vcombine.low %v1405_v4, %v1412_v5  ;;  %v5464_v16 = vcombine.high %v1405_v4, %v1412_v5 }
 0x301   : > { %v1471_v17 = vrot.slane %v1463_v11, %v7113_v44  ;;  %v1478_v18 = vrot.slane %v1464_v12, %v7113_v44  ;;  %v1533_v19 = vcombine.low %v1455_v9, %v1462_v10  ;;  %v5465_v20 = vcombine.high %v1455_v9, %v1462_v10 }
 0x302   : > { %v1506_v22 = vrot.slane %v1499_v15, %v7108_v33  ;;  %v1514_v23 = vrot.slane %v5464_v16, %v7108_v33  ;;  %v1515_v24 = vcombine.low %v1490_v13, %v1498_v14  ;;  %v727_v49 = vrot.slane %v7101_v28, %v726_v47 }
 0x303   : > { %v1540_v25 = vrot.slane %v1533_v19, %v7108_v33  ;;  %v1548_v26 = vrot.slane %v5465_v20, %v7108_v33  ;;  %v1549_v27 = vcombine.low %v1471_v17, %v1478_v18  ;;  %v5466_v29 = vcombine.high %v1471_v17, %v1478_v18 }
 0x304   : > { %v1523_v30 = vcombine.low %v1506_v22, %v1514_v23  ;;  %v1522_v34 = vrot.slane %v1515_v24, %v7113_v44 }
 0x305   : > { %v1556_v31 = vrot.slane %v1549_v27, %v7108_v33  ;;  %v1564_v21 = vrot.slane %v5466_v29, %v7108_v33  ;;  %v1565_v32 = vcombine.low %v1540_v25, %v1548_v26 }
 0x306   : > { %v1530_v35 = vrot.slane %v1523_v30, %v7113_v44 }
 0x307   : > { %v1573_v36 = vcombine.low %v1556_v31, %v1564_v21  ;;  %v1572_v39 = vrot.slane %v1565_v32, %v7113_v44 }
 0x308   : > { %v1531_v37 = vcombine.low %v1522_v34, %v1530_v35  ;;  %v1532_v38 = vcombine.high %v1522_v34, %v1530_v35 }
 0x309   : > { %v1580_v40 = vrot.slane %v1573_v36, %v7113_v44 }
 0x30b   : > { %v1581_v41 = vcombine.low %v1572_v39, %v1580_v40  ;;  %v1582_v42 = vcombine.high %v1572_v39, %v1580_v40 }
 0x30d   : > { %v7145_v43 = vpack.c.bf16 %v1581_v41, %v1531_v37  ;;  %v7147_v45 = vpack.c.bf16 %v1582_v42, %v1532_v38 }
 0x334   : > { %v1299_v50 = vpop.f32.mrb[4].mxu1 }
 0x335   : > { %v1300_v51 = vadd.f32 %v1299_v50, %v723_v48  ;;  %v1301_v52 = vpop.f32.mrb[5].mxu1 }
 0x336   : > { %v1302_v53 = vadd.f32 %v1301_v52, %v727_v49  ;;  %v1303_v54 = vpop.f32.mrb[6].mxu1 }
 0x337   : > { %v1585_v55 = vcombine.high %v1300_v51, %v6715_v6  ;;  %v1592_v56 = vrot.slane %v1300_v51, %v7108_v33  ;;  %v1304_v58 = vadd.f32 %v1303_v54, %v723_v48  ;;  %v1305_v59 = vpop.f32.mrb[7].mxu1 }
 0x338   : > { %v1600_v63 = vcombine.high %v1302_v53, %v6715_v6  ;;  %v1607_v0 = vrot.slane %v1302_v53, %v7108_v33  ;;  %v1306_v1 = vadd.f32 %v1305_v59, %v727_v49 }
 0x339   : > { %v1599_v2 = vrot.slane %v1585_v55, %v7108_v33  ;;  %v1651_v3 = vcombine.high %v1304_v58, %v6715_v6  ;;  %v1658_v4 = vrot.slane %v1304_v58, %v7108_v33 }
 0x33a   : > { %v1614_v5 = vrot.slane %v1600_v63, %v7108_v33  ;;  %v1615_v7 = vcombine.low %v1592_v56, %v1607_v0  ;;  %v1616_v8 = vcombine.high %v1592_v56, %v1607_v0  ;;  %v1666_v9 = vcombine.high %v1306_v1, %v6715_v6 }
 0x33b   : > { %v1665_v10 = vrot.slane %v1651_v3, %v7108_v33  ;;  %v1673_v11 = vrot.slane %v1306_v1, %v7108_v33 }
 0x33c   : > { %v1623_v12 = vrot.slane %v1615_v7, %v7113_v44  ;;  %v1630_v13 = vrot.slane %v1616_v8, %v7113_v44  ;;  %v1631_v14 = vcombine.low %v1599_v2, %v1614_v5  ;;  %v1632_v15 = vcombine.high %v1599_v2, %v1614_v5 }
 0x33d   : > { %v1680_v16 = vrot.slane %v1666_v9, %v7108_v33  ;;  %v1681_v17 = vcombine.low %v1658_v4, %v1673_v11  ;;  %v1682_v18 = vcombine.high %v1658_v4, %v1673_v11  ;;  %v730_v4 = vsub.s32 4, %v7070_v60 }
 0x33e   : > { %v1639_v19 = vrot.slane %v1631_v14, %v7113_v44  ;;  %v1646_v20 = vrot.slane %v1632_v15, %v7113_v44  ;;  %v1717_v22 = vcombine.low %v1623_v12, %v1630_v13  ;;  %v5467_v23 = vcombine.high %v1623_v12, %v1630_v13 }
 0x33f   : > { %v1689_v24 = vrot.slane %v1681_v17, %v7113_v44  ;;  %v1696_v25 = vrot.slane %v1682_v18, %v7113_v44  ;;  %v1697_v26 = vcombine.low %v1665_v10, %v1680_v16  ;;  %v1698_v27 = vcombine.high %v1665_v10, %v1680_v16 }
 0x340   : > { %v1733_v29 = vcombine.low %v1639_v19, %v1646_v20  ;;  %v5468_v30 = vcombine.high %v1639_v19, %v1646_v20  ;;  %v1724_v31 = vrot.slane %v1717_v22, %v7108_v33  ;;  %v1732_v21 = vrot.slane %v5467_v23, %v7108_v33 }
 0x341   : > { %v1705_v32 = vrot.slane %v1697_v26, %v7113_v44  ;;  %v1712_v34 = vrot.slane %v1698_v27, %v7113_v44  ;;  %v1767_v35 = vcombine.low %v1689_v24, %v1696_v25  ;;  %v5469_v36 = vcombine.high %v1689_v24, %v1696_v25 }
 0x342   : > { %v1740_v37 = vrot.slane %v1733_v29, %v7108_v33  ;;  %v1748_v38 = vrot.slane %v5468_v30, %v7108_v33  ;;  %v1749_v39 = vcombine.low %v1724_v31, %v1732_v21  ;;  %v734_v5 = vsub.s32 5, %v7070_v60 }
 0x343   : > { %v1783_v40 = vcombine.low %v1705_v32, %v1712_v34  ;;  %v5470_v41 = vcombine.high %v1705_v32, %v1712_v34  ;;  %v1774_v42 = vrot.slane %v1767_v35, %v7108_v33  ;;  %v1782_v48 = vrot.slane %v5469_v36, %v7108_v33 }
 0x344   : > { %v1757_v49 = vcombine.low %v1740_v37, %v1748_v38  ;;  %v1756_v53 = vrot.slane %v1749_v39, %v7113_v44  ;;  %v731_v7 = vrot.slane %v7101_v28, %v730_v4  ;;  %v735_v8 = vrot.slane %v7101_v28, %v734_v5 }
 0x345   : > { %v1790_v50 = vrot.slane %v1783_v40, %v7108_v33  ;;  %v1798_v51 = vrot.slane %v5470_v41, %v7108_v33  ;;  %v1799_v52 = vcombine.low %v1774_v42, %v1782_v48 }
 0x346   : > { %v1764_v54 = vrot.slane %v1757_v49, %v7113_v44 }
 0x347   : > { %v1807_v55 = vcombine.low %v1790_v50, %v1798_v51  ;;  %v1806_v59 = vrot.slane %v1799_v52, %v7113_v44 }
 0x348   : > { %v1765_v56 = vcombine.low %v1756_v53, %v1764_v54  ;;  %v1766_v58 = vcombine.high %v1756_v53, %v1764_v54 }
 0x349   : > { %v1814_v63 = vrot.slane %v1807_v55, %v7113_v44 }
 0x34b   : > { %v1815_v0 = vcombine.low %v1806_v59, %v1814_v63  ;;  %v1816_v1 = vcombine.high %v1806_v59, %v1814_v63 }
 0x34d   : > { %v1817_v2 = vpack.c.bf16 %v1815_v0, %v1765_v56  ;;  %v1818_v3 = vpack.c.bf16 %v1816_v1, %v1766_v58 }
 0x34f   : > { %5785 = vmatpush3.bf16.xpose.msra.mxu0 %v1817_v2 }
 0x350   : > { %5790 = vmatprep.subr.bf16.mxu0 %v6715_v6 }
 0x356   : > { %5787 = vmatmul.mubr.bf16.vlgmr.msra.gmra.mrb[0].mxu0 %v7145_v43 }
 0x357   : > { %5791 = vmatpush3.bf16.xpose.msra.mxu0 %v1818_v3  ;;  %5792 = vmatprep.mubr.msk.bf16.mxu0 %vm6716_vm0, %v6715_v6 }
 0x35e   : > { %5793 = vmatmul.mubr.bf16.vlgmr.msra.gmra.mrb[4].mxu0 %v7147_v45 }
 0x374   : > { %v1342_v9 = vpop.f32.mrb[8].mxu1 }
 0x375   : > { %v1343_v43 = vadd.f32 %v1342_v9, %v731_v7  ;;  %v1344_v10 = vpop.f32.mrb[9].mxu1 }
 0x376   : > { %v1345_v11 = vadd.f32 %v1344_v10, %v735_v8  ;;  %v1346_v12 = vpop.f32.mrb[10].mxu1 }
 0x377   : > { %v1819_v13 = vcombine.high %v1343_v43, %v6715_v6  ;;  %v1826_v45 = vrot.slane %v1343_v43, %v7108_v33  ;;  %v1347_v14 = vadd.f32 %v1346_v12, %v731_v7  ;;  %v1348_v15 = vpop.f32.mrb[11].mxu1 }
 0x378   : > { %v1834_v16 = vcombine.high %v1345_v11, %v6715_v6  ;;  %v1841_v17 = vrot.slane %v1345_v11, %v7108_v33  ;;  %v1349_v18 = vadd.f32 %v1348_v15, %v735_v8 }
 0x379   : > { %v1833_v19 = vrot.slane %v1819_v13, %v7108_v33  ;;  %v1885_v28 = vcombine.high %v1347_v14, %v6715_v6  ;;  %v1892_v20 = vrot.slane %v1347_v14, %v7108_v33 }
 0x37a   : > { %v1848_v22 = vrot.slane %v1834_v16, %v7108_v33  ;;  %v1849_v23 = vcombine.low %v1826_v45, %v1841_v17  ;;  %v1850_v24 = vcombine.high %v1826_v45, %v1841_v17  ;;  %v1900_v25 = vcombine.high %v1349_v18, %v6715_v6 }
 0x37b   : > { %v1899_v26 = vrot.slane %v1885_v28, %v7108_v33  ;;  %v1907_v27 = vrot.slane %v1349_v18, %v7108_v33  ;;  %v2139_v28 = vand.u32 127, %v583_v57 }
 0x37c   : > { %v1857_v29 = vrot.slane %v1849_v23, %v7113_v44  ;;  %v1864_v30 = vrot.slane %v1850_v24, %v7113_v44  ;;  %v1865_v31 = vcombine.low %v1833_v19, %v1848_v22  ;;  %v1866_v21 = vcombine.high %v1833_v19, %v1848_v22 }
 0x37d   : > { %v1914_v32 = vrot.slane %v1900_v25, %v7108_v33  ;;  %v1915_v34 = vcombine.low %v1892_v20, %v1907_v27  ;;  %v1916_v35 = vcombine.high %v1892_v20, %v1907_v27  ;;  %v2137_v20 = vadd.s32 8, %v7070_v60 }
 0x37e   : > { %v1873_v36 = vrot.slane %v1865_v31, %v7113_v44  ;;  %v1880_v37 = vrot.slane %v1866_v21, %v7113_v44  ;;  %v1951_v38 = vcombine.low %v1857_v29, %v1864_v30  ;;  %v5471_v39 = vcombine.high %v1857_v29, %v1864_v30 }
 0x37f   : > { %v1923_v40 = vrot.slane %v1915_v34, %v7113_v44  ;;  %v1930_v41 = vrot.slane %v1916_v35, %v7113_v44  ;;  %v1931_v42 = vcombine.low %v1899_v26, %v1914_v32  ;;  %v1932_v48 = vcombine.high %v1899_v26, %v1914_v32 }
 0x380   : > { %v1958_v49 = vrot.slane %v1951_v38, %v7108_v33  ;;  %v1966_v50 = vrot.slane %v5471_v39, %v7108_v33  ;;  %v1967_v51 = vcombine.low %v1873_v36, %v1880_v37  ;;  %v5472_v52 = vcombine.high %v1873_v36, %v1880_v37 }
 0x381   : > { %v1939_v53 = vrot.slane %v1931_v42, %v7113_v44  ;;  %v1946_v54 = vrot.slane %v1932_v48, %v7113_v44  ;;  %v2001_v55 = vcombine.low %v1923_v40, %v1930_v41  ;;  %v5473_v56 = vcombine.high %v1923_v40, %v1930_v41 }
 0x382   : > { %v1974_v58 = vrot.slane %v1967_v51, %v7108_v33  ;;  %v1982_v59 = vrot.slane %v5472_v52, %v7108_v33  ;;  %v1983_v63 = vcombine.low %v1958_v49, %v1966_v50  ;;  %vm2140_vm1 = vcmp.ge.s32.totalorder %v7070_v60, %v2139_v28 }
 0x383   : > { %v2008_v0 = vrot.slane %v2001_v55, %v7108_v33  ;;  %v2016_v1 = vrot.slane %v5473_v56, %v7108_v33  ;;  %v2017_v2 = vcombine.low %v1939_v53, %v1946_v54  ;;  %v5474_v3 = vcombine.high %v1939_v53, %v1946_v54 }
 0x384   : > { %v1991_v7 = vcombine.low %v1974_v58, %v1982_v59  ;;  %v1990_v10 = vrot.slane %v1983_v63, %v7113_v44  ;;  %vm2141_vm3 = vcmp.ge.s32.totalorder %v2137_v20, %v2139_v28  ;;  %v6113_v28 = vld [vmem:[#allocation10 + $0x74] ss:$8 sps:$4 sm:$0xff]   ;;  %v6111_v20 = vld [vmem:[#allocation10 + $0x70] ss:$8 sps:$4 sm:$0xff]  }
 0x385   : > { %v2024_v8 = vrot.slane %v2017_v2, %v7108_v33  ;;  %v2032_v9 = vrot.slane %v5474_v3, %v7108_v33  ;;  %v2033_v43 = vcombine.low %v2008_v0, %v2016_v1 }
 0x386   : > { %v1998_v11 = vrot.slane %v1991_v7, %v7113_v44 }
 0x387   : > { %v2041_v12 = vcombine.low %v2024_v8, %v2032_v9  ;;  %v2040_v14 = vrot.slane %v2033_v43, %v7113_v44  ;;  %v6090_v8 = vld [vmem:[#allocation10] ss:$8 sps:$4 sm:$0xff]   ;;  %v6092_v9 = vld [vmem:[#allocation10 + $0x4] ss:$8 sps:$4 sm:$0xff]   ;;  %v6095_v43 = vld [vmem:[#allocation10 + $0x14] ss:$8 sps:$4 sm:$0xff]  }
 0x388   : > { %v1999_v13 = vcombine.low %v1990_v10, %v1998_v11  ;;  %v2000_v45 = vcombine.high %v1990_v10, %v1998_v11  ;;  %v6093_v10 = vld [vmem:[#allocation10 + $0x10] ss:$8 sps:$4 sm:$0xff]   ;;  %v6098_v11 = vld [vmem:[#allocation10 + $0x24] ss:$8 sps:$4 sm:$0xff]  }
 0x389   : > { %v2048_v15 = vrot.slane %v2041_v12, %v7113_v44  ;;  %v6096_v12 = vld [vmem:[#allocation10 + $0x20] ss:$8 sps:$4 sm:$0xff]  }
 0x38b   : > { %v2049_v16 = vcombine.low %v2040_v14, %v2048_v15  ;;  %v2050_v17 = vcombine.high %v2040_v14, %v2048_v15  ;;  %v6104_v14 = vld [vmem:[#allocation10 + $0x44] ss:$8 sps:$4 sm:$0xff]   ;;  %v6102_v15 = vld [vmem:[#allocation10 + $0x40] ss:$8 sps:$4 sm:$0xff]  }
 0x38d   : > { %v2051_v18 = vpack.c.bf16 %v2049_v16, %v1999_v13  ;;  %v2052_v19 = vpack.c.bf16 %v2050_v17, %v2000_v45  ;;  %v6101_v13 = vld [vmem:[#allocation10 + $0x34] ss:$8 sps:$4 sm:$0xff]   ;;  %v6099_v45 = vld [vmem:[#allocation10 + $0x30] ss:$8 sps:$4 sm:$0xff]  }
 0x38e   : > { %v6107_v16 = vld [vmem:[#allocation10 + $0x54] ss:$8 sps:$4 sm:$0xff]   ;;  %v6105_v17 = vld [vmem:[#allocation10 + $0x50] ss:$8 sps:$4 sm:$0xff]  }
 0x38f   : > { %5797 = vmatpush3.bf16.msra.mxu1 %v2051_v18  ;;  %v6110_v18 = vld [vmem:[#allocation10 + $0x64] ss:$8 sps:$4 sm:$0xff]  }
 0x390   : > { %5802 = vmatprep.subr.bf16.mxu1 %v6715_v6 }
 0x429   : > { %v2087_v22 = vpop.f32.mrb[0].mxu0 }
 0x42a   : > { %v2146_v23 = vsel %vm2140_vm1, %v2087_v22, -1e+30  ;;  %v5788_v24 = vpop.f32.mrb[1].mxu0  ;;  %v6116_v22 = vld [vmem:[#allocation10 + $0x84] ss:$8 sps:$4 sm:$0xff]  }
 0x42b   : > { %v2090_v25 = vpop.f32.mrb[2].mxu0  ;;  %v2151_v26 = vsel %vm2150_vm2, %v2146_v23, -inf  ;;  %v6119_v24 = vld [vmem:[#allocation10 + $0x94] ss:$8 sps:$4 sm:$0xff]  }
 0x42c   : > { %v2147_v27 = vsel %vm2141_vm3, %v2090_v25, -1e+30  ;;  %2152 = vmax.xlane.f32.xlu0 %v2151_v26  ;;  %v5789_v29 = vpop.f32.mrb[3].mxu0  ;;  %v6117_v25 = vld [vmem:[#allocation10 + $0x90] ss:$8 sps:$4 sm:$0xff]  }
 0x42d   : > { %v2154_v30 = vsel %vm2150_vm2, %v2147_v27, -inf  ;;  %v6122_v26 = vld [vmem:[#allocation10 + $0xa4] ss:$8 sps:$4 sm:$0xff]   ;;  %v6125_v29 = vld [vmem:[#allocation10 + $0xb4] ss:$8 sps:$4 sm:$0xff]  }
 0x42e   : > { %2155 = vmax.xlane.f32.xlu1 %v2154_v30  ;;  %v6123_v30 = vld [vmem:[#allocation10 + $0xb0] ss:$8 sps:$4 sm:$0xff]  }
 0x431   : > { %v2128_v31 = vpop.f32.mrb[4].mxu0 }
 0x432   : > { %v2148_v57 = vsel %vm2140_vm1, %v2128_v31, -1e+30  ;;  %v5794_v21 = vpop.f32.mrb[5].mxu0  ;;  %v6128_v31 = vld [vmem:[#allocation10 + $0xc4] ss:$8 sps:$4 sm:$0xff]  }
 0x433   : > { %v2131_v32 = vpop.f32.mrb[6].mxu0  ;;  %v2157_v34 = vsel %vm2150_vm2, %v2148_v57, -inf  ;;  %v6131_v21 = vld [vmem:[#allocation10 + $0xd4] ss:$8 sps:$4 sm:$0xff]  }
 0x434   : > { %v2149_v35 = vsel %vm2141_vm3, %v2131_v32, -1e+30  ;;  %2158 = vmax.xlane.f32.xlu0 %v2157_v34  ;;  %v5795_v36 = vpop.f32.mrb[7].mxu0  ;;  %v6129_v32 = vld [vmem:[#allocation10 + $0xd0] ss:$8 sps:$4 sm:$0xff]  }
 0x435   : > { %v2160_v37 = vsel %vm2150_vm2, %v2149_v35, -inf  ;;  %v6134_v34 = vld [vmem:[#allocation10 + $0xe4] ss:$8 sps:$4 sm:$0xff]   ;;  %v6137_v36 = vld [vmem:[#allocation10 + $0xf4] ss:$8 sps:$4 sm:$0xff]  }
 0x436   : > { %2161 = vmax.xlane.f32.xlu1 %v2160_v37  ;;  %v6135_v37 = vld [vmem:[#allocation10 + $0xf0] ss:$8 sps:$4 sm:$0xff]  }
 0x4b9   : > { %v2153_v38 = vpop.xlane.xlu0 %2152 }
 0x4ba   : > { %v2163_v39 = vsub.f32 %v2146_v23, %v2153_v38  ;;  %v6114_v23 = vld [vmem:[#allocation10 + $0x80] ss:$8 sps:$4 sm:$0xff]  }
 0x4bb   : > { %v2156_v40 = vpop.xlane.xlu1 %2155 }
 0x4bc   : > { %v2167_v41 = vmul.f32 1.442695, %v2163_v39  ;;  %v2164_v42 = vsub.f32 %v2147_v27, %v2156_v40  ;;  %v6120_v27 = vld [vmem:[#allocation10 + $0xa0] ss:$8 sps:$4 sm:$0xff]  }
 0x4be   : > { %6334 = vpow2.f32 %v2167_v41  ;;  %v2169_v48 = vmul.f32 1.442695, %v2164_v42 }
 0x4c0   : > { %6336 = vpow2.f32 %v2169_v48 }
 0x4c1   : > { %v2159_v49 = vpop.xlane.xlu0 %2158 }
 0x4c2   : > { %v2165_v50 = vsub.f32 %v2148_v57, %v2159_v49  ;;  %v6126_v57 = vld [vmem:[#allocation10 + $0xc0] ss:$8 sps:$4 sm:$0xff]  }
 0x4c3   : > { %v2162_v51 = vpop.xlane.xlu1 %2161 }
 0x4c4   : > { %v2171_v52 = vmul.f32 1.442695, %v2165_v50  ;;  %v2166_v53 = vsub.f32 %v2149_v35, %v2162_v51  ;;  %v6132_v35 = vld [vmem:[#allocation10 + $0xe0] ss:$8 sps:$4 sm:$0xff]  }
 0x4c6   : > { %6338 = vpow2.f32 %v2171_v52  ;;  %v2173_v54 = vmul.f32 1.442695, %v2166_v53 }
 0x4c8   : > { %v6335_v55 = vpop.eup %6334  ;;  %6340 = vpow2.f32 %v2173_v54 }
 0x4c9   : > { %v2175_v56 = vsel %vm2150_vm2, %v6335_v55, 0.0 }
 0x4ca   : > { %v6337_v58 = vpop.eup %6336  ;;  %2176 = vadd.xlane.f32.xlu0 %v2175_v56 }
 0x4cb   : > { %v2178_v59 = vsel %vm2150_vm2, %v6337_v58, 0.0  ;;  %v2191_v63 = vpack.c.bf16 %v6337_v58, %v6335_v55 }
 0x4cc   : > { %2179 = vadd.xlane.f32.xlu1 %v2178_v59 }
 0x4cd   : > { %5799 = vmatmul.mubr.msk.bf16.vlgmr.msra.gmra.mrb[12].mxu1 %vm2150_vm2, %v2191_v63 }
 0x4ce   : > { %5803 = vmatpush3.bf16.msra.mxu1 %v2052_v19  ;;  %5804 = vmatprep.mubr.msk.bf16.mxu1 %vm6716_vm0, %v6715_v6  ;;  %v6108_v19 = vld [vmem:[#allocation10 + $0x60] ss:$8 sps:$4 sm:$0xff]  }
 0x4cf   : > { %2723 = vmatprep.subr.bf16.mxu1 %v6092_v9 }
 0x4d0   : > { %v6339_v0 = vpop.eup %6338 }
 0x4d1   : > { %v2181_v1 = vsel %vm2150_vm2, %v6339_v0, 0.0 }
 0x4d2   : > { %v6341_v2 = vpop.eup %6340  ;;  %2182 = vadd.xlane.f32.xlu0 %v2181_v1 }
 0x4d3   : > { %v2184_v3 = vsel %vm2150_vm2, %v6341_v2, 0.0  ;;  %v2192_v7 = vpack.c.bf16 %v6341_v2, %v6339_v0 }
 0x4d4   : > { %2185 = vadd.xlane.f32.xlu1 %v2184_v3 }
 0x4d5   : > { %5805 = vmatmul.mubr.msk.bf16.vlgmr.msra.gmra.mrb[16].mxu1 %vm2150_vm2, %v2192_v7 }
 0x4d6   : > { %2724 = vmatpush1.bf16.msra.mxu1 %v6090_v8 }
 0x4d7   : > { %2725 = vmatprep.subr.bf16.mxu1 %v6095_v43 }
 0x4da   : > { %2726 = vmatpush1.bf16.msra.mxu1 %v6093_v10 }
 0x4db   : > { %2727 = vmatprep.subr.bf16.mxu1 %v6098_v11 }
 0x4de   : > { %2728 = vmatpush1.bf16.msra.mxu1 %v6096_v12 }
 0x4df   : > { %2729 = vmatprep.subr.bf16.mxu1 %v6101_v13 }
 0x4e2   : > { %2730 = vmatpush1.bf16.msra.mxu1 %v6099_v45 }
 0x4e3   : > { %2731 = vmatprep.subr.bf16.mxu1 %v6104_v14 }
 0x4e6   : > { %2732 = vmatpush1.bf16.msra.mxu1 %v6102_v15 }
 0x4e7   : > { %2733 = vmatprep.subr.bf16.mxu1 %v6107_v16 }
 0x4ea   : > { %2734 = vmatpush1.bf16.msra.mxu1 %v6105_v17 }
 0x4eb   : > { %2735 = vmatprep.subr.bf16.mxu1 %v6110_v18 }
 0x4ee   : > { %2736 = vmatpush1.bf16.msra.mxu1 %v6108_v19 }
 0x4ef   : > { %2737 = vmatprep.subr.bf16.mxu1 %v6113_v28 }
 0x4f2   : > { %2738 = vmatpush1.bf16.msra.mxu1 %v6111_v20 }
 0x4f3   : > { %2739 = vmatprep.subr.bf16.mxu1 %v6116_v22 }
 0x4f6   : > { %2740 = vmatpush1.bf16.msra.mxu1 %v6114_v23 }
 0x4f7   : > { %2741 = vmatprep.subr.bf16.mxu1 %v6119_v24 }
 0x4fa   : > { %2742 = vmatpush1.bf16.msra.mxu1 %v6117_v25 }
 0x4fb   : > { %2743 = vmatprep.subr.bf16.mxu1 %v6122_v26 }
 0x4fe   : > { %2744 = vmatpush1.bf16.msra.mxu1 %v6120_v27 }
 0x4ff   : > { %2745 = vmatprep.subr.bf16.mxu1 %v6125_v29 }
 0x502   : > { %2746 = vmatpush1.bf16.msra.mxu1 %v6123_v30 }
 0x503   : > { %2747 = vmatprep.subr.bf16.mxu1 %v6128_v31 }
 0x506   : > { %2748 = vmatpush1.bf16.msra.mxu1 %v6126_v57 }
 0x507   : > { %2749 = vmatprep.subr.bf16.mxu1 %v6131_v21 }
 0x50a   : > { %2750 = vmatpush1.bf16.msra.mxu1 %v6129_v32 }
 0x50b   : > { %2751 = vmatprep.subr.bf16.mxu1 %v6134_v34 }
 0x50e   : > { %2752 = vmatpush1.bf16.msra.mxu1 %v6132_v35 }
 0x50f   : > { %2753 = vmatprep.subr.bf16.mxu1 %v6137_v36 }
 0x512   : > { %2754 = vmatpush1.bf16.msra.mxu1 %v6135_v37 }
 0x557   : > { %v2177_v38 = vpop.xlane.xlu0 %2176 }
 0x558   : > { %6342 = vrcp.f32 %v2177_v38 }
 0x559   : > { %v2180_v39 = vpop.xlane.xlu1 %2179 }
 0x55a   : > { %6344 = vrcp.f32 %v2180_v39 }
 0x55f   : > { %v2183_v40 = vpop.xlane.xlu0 %2182 }
 0x560   : > { %6346 = vrcp.f32 %v2183_v40 }
 0x561   : > { %v2186_v41 = vpop.xlane.xlu1 %2185 }
 0x562   : > { %6348 = vrcp.f32 %v2186_v41  ;;  %v6343_v50 = vpop.eup %6342 }
 0x564   : > { %v6345_v53 = vpop.eup %6344 }
 0x56a   : > { %v6347_v54 = vpop.eup %6346 }
 0x56c   : > { %v6349_v0 = vpop.eup %6348 }
 0x5a0   : > { %v2230_v42 = vpop.f32.mrb[12].mxu1 }
 0x5a1   : > { %v5800_v48 = vpop.f32.mrb[13].mxu1  ;;  %v2281_v52 = vmul.f32 %v6343_v50, %v2230_v42 }
 0x5a2   : > { %v2233_v49 = vpop.f32.mrb[14].mxu1 }
 0x5a3   : > { %v5801_v51 = vpop.f32.mrb[15].mxu1  ;;  %v2285_v55 = vcombine.high %v2281_v52, %v6715_v6  ;;  %v2282_v56 = vmul.f32 %v6345_v53, %v2233_v49  ;;  %v2292_v2 = vrot.slane %v2281_v52, %v7108_v33 }
 0x5a5   : > { %v2299_v43 = vrot.slane %v2285_v55, %v7108_v33  ;;  %v2351_v10 = vcombine.high %v2282_v56, %v6715_v6  ;;  %v2358_v14 = vrot.slane %v2282_v56, %v7108_v33 }
 0x5a7   : > { %v2365_v28 = vrot.slane %v2351_v10, %v7108_v33 }
 0x5a8   : > { %v2274_v58 = vpop.f32.mrb[16].mxu1 }
 0x5a9   : > { %v2283_v59 = vmul.f32 %v6347_v54, %v2274_v58  ;;  %v5806_v63 = vpop.f32.mrb[17].mxu1 }
 0x5aa   : > { %v2277_v1 = vpop.f32.mrb[18].mxu1 }
 0x5ab   : > { %v2300_v3 = vcombine.high %v2283_v59, %v6715_v6  ;;  %v2307_v7 = vrot.slane %v2283_v59, %v7108_v33  ;;  %v2284_v8 = vmul.f32 %v6349_v0, %v2277_v1  ;;  %v5807_v9 = vpop.f32.mrb[19].mxu1 }
 0x5ad   : > { %v2314_v11 = vrot.slane %v2300_v3, %v7108_v33  ;;  %v2315_v12 = vcombine.low %v2292_v2, %v2307_v7  ;;  %v2316_v13 = vcombine.high %v2292_v2, %v2307_v7  ;;  %v2366_v45 = vcombine.high %v2284_v8, %v6715_v6 }
 0x5ae   : > { %v2373_v15 = vrot.slane %v2284_v8, %v7108_v33 }
 0x5af   : > { %v2323_v16 = vrot.slane %v2315_v12, %v7113_v44  ;;  %v2330_v17 = vrot.slane %v2316_v13, %v7113_v44  ;;  %v2331_v18 = vcombine.low %v2299_v43, %v2314_v11  ;;  %v2332_v19 = vcombine.high %v2299_v43, %v2314_v11 }
 0x5b0   : > { %v2380_v20 = vrot.slane %v2366_v45, %v7108_v33  ;;  %v2381_v22 = vcombine.low %v2358_v14, %v2373_v15  ;;  %v2382_v23 = vcombine.high %v2358_v14, %v2373_v15  ;;  %v6418_v45 = vld [vmem:[%s7047_s21] sm:$0xff] }
 0x5b1   : > { %v2339_v24 = vrot.slane %v2331_v18, %v7113_v44  ;;  %v2346_v6 = vrot.slane %v2332_v19, %v7113_v44  ;;  %v2417_v25 = vcombine.low %v2323_v16, %v2330_v17  ;;  %v5477_v26 = vcombine.high %v2323_v16, %v2330_v17  ;;  %v6419_v17 = vld [vmem:[%s7047_s21 + $0x8] sm:$0xff] }
 0x5b2   : > { %v2389_v27 = vrot.slane %v2381_v22, %v7113_v44  ;;  %v2396_v29 = vrot.slane %v2382_v23, %v7113_v44  ;;  %v2397_v30 = vcombine.low %v2365_v28, %v2380_v20  ;;  %v2398_v31 = vcombine.high %v2365_v28, %v2380_v20  ;;  %v6420_v28 = vld [vmem:[%s7047_s21 + $0x10] sm:$0xff]  ;;  %v6421_v22 = vld [vmem:[%s7047_s21 + $0x18] sm:$0xff]  ;;  %s7856_s21 = sld [smem:[#allocation24_spill]] }
 0x5b3   : > { %v2424_v57 = vrot.slane %v2417_v25, %v7108_v33  ;;  %v2432_v21 = vrot.slane %v5477_v26, %v7108_v33  ;;  %v2433_v32 = vcombine.low %v2339_v24, %v2346_v6  ;;  %v5478_v34 = vcombine.high %v2339_v24, %v2346_v6  ;;  %v2836_v25 = vld [vmem:[#allocation11] sm:$0xff] }
 0x5b4   : > { %v2405_v35 = vrot.slane %v2397_v30, %v7113_v44  ;;  %v2412_v36 = vrot.slane %v2398_v31, %v7113_v44  ;;  %v2467_v37 = vcombine.low %v2389_v27, %v2396_v29  ;;  %v5479_v38 = vcombine.high %v2389_v27, %v2396_v29  ;;  %v2840_v26 = vld [vmem:[#allocation11 + $0x20] sm:$0xff]  ;;  %v2837_v27 = vld [vmem:[#allocation11 + $0x8] sm:$0xff] }
 0x5b5   : > { %v2440_v39 = vrot.slane %v2433_v32, %v7108_v33  ;;  %v2448_v40 = vrot.slane %v5478_v34, %v7108_v33  ;;  %v2449_v41 = vcombine.low %v2424_v57, %v2432_v21  ;;  %v5513_v29 = vcombine.low %v2836_v25, %v2840_v26  ;;  %v2841_v31 = vld [vmem:[#allocation11 + $0x28] sm:$0xff]  ;;  %v2844_v57 = vld [vmem:[#allocation11 + $0x40] sm:$0xff] }
 0x5b6   : > { %v2474_v42 = vrot.slane %v2467_v37, %v7108_v33  ;;  %v2482_v48 = vrot.slane %v5479_v38, %v7108_v33  ;;  %v2483_v49 = vcombine.low %v2405_v35, %v2412_v36  ;;  %v5480_v50 = vcombine.high %v2405_v35, %v2412_v36  ;;  %v2848_v21 = vld [vmem:[#allocation11 + $0x60] sm:$0xff]  ;;  %v2845_v36 = vld [vmem:[#allocation11 + $0x48] sm:$0xff] }
 0x5b7   : > { %v2457_v51 = vcombine.low %v2440_v39, %v2448_v40  ;;  %v2456_v55 = vrot.slane %v2449_v41, %v7113_v44  ;;  %v5514_v30 = vcombine.high %v2836_v25, %v2840_v26  ;;  %v5515_v32 = vcombine.low %v2837_v27, %v2841_v31  ;;  %v2849_v37 = vld [vmem:[#allocation11 + $0x68] sm:$0xff]  ;;  %v2852_v38 = vld [vmem:[#allocation11 + $0x80] sm:$0xff] }
 0x5b8   : > { %v2490_v52 = vrot.slane %v2483_v49, %v7108_v33  ;;  %v2498_v53 = vrot.slane %v5480_v50, %v7108_v33  ;;  %v2499_v54 = vcombine.low %v2474_v42, %v2482_v48  ;;  %v2551_v33 = vld [vmem:[%s7817_s6] sm:$0x3]  ;;  %v5516_v34 = vcombine.high %v2837_v27, %v2841_v31  ;;  %v2856_v40 = vld [vmem:[#allocation11 + $0xa0] sm:$0xff]  ;;  %v2853_v41 = vld [vmem:[#allocation11 + $0x88] sm:$0xff] }
 0x5b9   : > { %v2464_v56 = vrot.slane %v2457_v51, %v7113_v44  ;;  %v2556_v9 = vrot.slane %v2551_v33, %v7076_v62  ;;  %v2560_v43 = vrot.slane %v2551_v33, %v7073_v61  ;;  %v5522_v35 = vcombine.high %v2844_v57, %v2848_v21  ;;  %3646 = vmatprep.subr.bf16.mxu0 %v5514_v30  ;;  %v2857_v42 = vld [vmem:[#allocation11 + $0xa8] sm:$0xff]  ;;  %v2892_v26 = vld [vmem:[#allocation11 + $0x1c0] sm:$0xff] }
 0x5ba   : > { %v2507_v58 = vcombine.low %v2490_v52, %v2498_v53  ;;  %v2506_v0 = vrot.slane %v2499_v54, %v7113_v44  ;;  %v5524_v39 = vcombine.high %v2845_v36, %v2849_v37  ;;  %3689 = vmatprep.subr.bf16.mxu1 %v5516_v34  ;;  %3647 = vmatpush1.bf16.msra.mxu0 %v5513_v29  ;;  %v2860_v52 = vld [vmem:[#allocation11 + $0xc0] sm:$0xff]  ;;  %v2861_v54 = vld [vmem:[#allocation11 + $0xc8] sm:$0xff] }
 0x5bb   : > { %v2466_v59 = vcombine.high %v2456_v55, %v2464_v56  ;;  %v2465_v63 = vcombine.low %v2456_v55, %v2464_v56  ;;  %v5521_v48 = vcombine.low %v2844_v57, %v2848_v21  ;;  %3648 = vmatprep.subr.bf16.mxu0 %v5522_v35  ;;  %v5523_v49 = vcombine.low %v2845_v36, %v2849_v37  ;;  %v2864_v53 = vld [vmem:[#allocation11 + $0xe0] sm:$0xff]  ;;  %v2865_v55 = vld [vmem:[#allocation11 + $0xe8] sm:$0xff] }
 0x5bc   : > { %v2514_v1 = vrot.slane %v2507_v58, %v7113_v44  ;;  %v5530_v50 = vcombine.high %v2852_v38, %v2856_v40  ;;  %v5532_v51 = vcombine.high %v2853_v41, %v2857_v42  ;;  %v5529_v56 = vcombine.low %v2852_v38, %v2856_v40  ;;  %v2896_v27 = vld [vmem:[#allocation11 + $0x1e0] sm:$0xff]  ;;  %v2893_v29 = vld [vmem:[#allocation11 + $0x1c8] sm:$0xff] }
 0x5bd   : > { %v5531_v58 = vcombine.low %v2853_v41, %v2857_v42  ;;  %v2897_v30 = vld [vmem:[#allocation11 + $0x1e8] sm:$0xff]  ;;  %v5570_v21 = vcombine.high %v2892_v26, %v2896_v27  ;;  %v2900_v34 = vld [vmem:[#allocation11 + $0x200] sm:$0xff]  ;;  %v5569_v38 = vcombine.low %v2892_v26, %v2896_v27 }
 0x5be   : > { %v2516_v2 = vcombine.high %v2506_v0, %v2514_v1  ;;  %v2515_v3 = vcombine.low %v2506_v0, %v2514_v1  ;;  %3649 = vmatpush1.bf16.msra.mxu0 %v5521_v48  ;;  %v2868_v0 = vld [vmem:[#allocation11 + $0x100] sm:$0xff]  ;;  %v2901_v36 = vld [vmem:[#allocation11 + $0x208] sm:$0xff] }
 0x5bf   : > { %3650 = vmatprep.subr.bf16.mxu0 %v5530_v50  ;;  %v2872_v1 = vld [vmem:[#allocation11 + $0x120] sm:$0xff]  ;;  %v2905_v37 = vld [vmem:[#allocation11 + $0x228] sm:$0xff] }
 0x5c0   : > { %v2518_v7 = vpack.c.bf16 %v2516_v2, %v2466_v59  ;;  %v2517_v8 = vpack.c.bf16 %v2515_v3, %v2465_v63  ;;  %v5538_v59 = vcombine.high %v2860_v52, %v2864_v53  ;;  %v5540_v63 = vcombine.high %v2861_v54, %v2865_v55  ;;  %v2869_v2 = vld [vmem:[#allocation11 + $0x108] sm:$0xff]  ;;  %v2904_v35 = vld [vmem:[#allocation11 + $0x220] sm:$0xff] }
 0x5c1   : > { %v2873_v3 = vld [vmem:[#allocation11 + $0x128] sm:$0xff]  ;;  %v5546_v33 = vcombine.high %v2868_v0, %v2872_v1  ;;  %v5578_v40 = vcombine.high %v2900_v34, %v2904_v35  ;;  %v5580_v41 = vcombine.high %v2901_v36, %v2905_v37  ;;  %v2908_v42 = vld [vmem:[#allocation11 + $0x240] sm:$0xff] }
 0x5c2   : > { %2755 = vmatprep.mubr.bf16.mxu1 %v2518_v7  ;;  %3651 = vmatpush1.bf16.msra.mxu0 %v5529_v56  ;;  %v5537_v7 = vcombine.low %v2860_v52, %v2864_v53  ;;  %v2912_v48 = vld [vmem:[#allocation11 + $0x260] sm:$0xff]  ;;  %v2913_v50 = vld [vmem:[#allocation11 + $0x268] sm:$0xff]  ;;  %v5579_v52 = vcombine.low %v2901_v36, %v2905_v37 }
 0x5c3   : > { %2756 = vmatmul.mubr.bf16.vlgmr.msra.gmra.mrb[20].mxu1 %v2517_v8  ;;  %3652 = vmatprep.subr.bf16.mxu0 %v5538_v59  ;;  %v5539_v8 = vcombine.low %v2861_v54, %v2865_v55  ;;  %v5586_v53 = vcombine.high %v2908_v42, %v2912_v48  ;;  %v5585_v55 = vcombine.low %v2908_v42, %v2912_v48  ;;  %v2940_v37 = vld [vmem:[#allocation11 + $0x340] sm:$0xff] }
 0x5c4   : > { %3690 = vmatpush1.bf16.msra.mxu1 %v5515_v32  ;;  %v5572_v32 = vcombine.high %v2893_v29, %v2897_v30 }
 0x5c5   : > { %3691 = vmatprep.subr.bf16.mxu1 %v5524_v39  ;;  %v5571_v39 = vcombine.low %v2893_v29, %v2897_v30  ;;  %v2932_v30 = vld [vmem:[#allocation11 + $0x300] sm:$0xff] }
 0x5c6   : > { %3653 = vmatpush1.bf16.msra.mxu0 %v5537_v7 }
 0x5c7   : > { %3654 = vmatprep.subr.bf16.mxu0 %v5546_v33 }
 0x5c8   : > { %3692 = vmatpush1.bf16.msra.mxu1 %v5523_v49  ;;  %v2909_v49 = vld [vmem:[#allocation11 + $0x248] sm:$0xff] }
 0x5c9   : > { %3693 = vmatprep.subr.bf16.mxu1 %v5532_v51  ;;  %v5577_v51 = vcombine.low %v2900_v34, %v2904_v35  ;;  %v5588_v54 = vcombine.high %v2909_v49, %v2913_v50  ;;  %v5587_v56 = vcombine.low %v2909_v49, %v2913_v50  ;;  %v2948_v50 = vld [vmem:[#allocation11 + $0x380] sm:$0xff] }
 0x5cc   : > { %3694 = vmatpush1.bf16.msra.mxu1 %v5531_v58 }
 0x5cd   : > { %3695 = vmatprep.subr.bf16.mxu1 %v5540_v63 }
 0x5d0   : > { %3696 = vmatpush1.bf16.msra.mxu1 %v5539_v8 }
 0x696   : > { %v2757_v10 = vpop.f32.mrb[20].mxu1 }
 0x697   : > { %v2758_v11 = vadd.f32 %v2757_v10, %v2556_v9  ;;  %v2759_v44 = vpop.f32.mrb[21].mxu1  ;;  %v2880_v10 = vld [vmem:[#allocation11 + $0x160] sm:$0xff] }
 0x698   : > { %v2760_v12 = vadd.f32 %v2759_v44, %v2560_v43  ;;  %v2761_v13 = vpop.f32.mrb[22].mxu1  ;;  %v2881_v44 = vld [vmem:[#allocation11 + $0x168] sm:$0xff] }
 0x699   : > { %v7288_v14 = vadd.f32 %v6418_v45, %v2758_v11  ;;  %v2762_v15 = vadd.f32 %v2761_v13, %v2556_v9  ;;  %v2763_v16 = vpop.f32.mrb[23].mxu1  ;;  %v5548_v9 = vcombine.high %v2869_v2, %v2873_v3  ;;  %v2877_v11 = vld [vmem:[#allocation11 + $0x148] sm:$0xff]  ;;  %v5547_v13 = vcombine.low %v2869_v2, %v2873_v3 }
 0x69a   : > { %v7291_v18 = vadd.f32 %v6419_v17, %v2760_v12  ;;  %v2764_v19 = vadd.f32 %v2763_v16, %v2560_v43  ;;  %v2876_v43 = vld [vmem:[#allocation11 + $0x140] sm:$0xff]  ;;  %v5545_v12 = vcombine.low %v2868_v0, %v2872_v1 }
 0x69b   : > { %v7294_v20 = vadd.f32 %v6420_v28, %v2762_v15  ;;  %v5554_v45 = vcombine.high %v2876_v43, %v2880_v10  ;;  %3697 = vmatprep.subr.bf16.mxu1 %v5548_v9  ;;  %v5556_v15 = vcombine.high %v2877_v11, %v2881_v44  ;;  %v2884_v16 = vld [vmem:[#allocation11 + $0x180] sm:$0xff]  ;;  %v2889_v28 = vld [vmem:[#allocation11 + $0x1a8] sm:$0xff] }
 0x69c   : > { %v7297_v23 = vadd.f32 %v6421_v22, %v2764_v19  ;;  %v2772_v24 = vadd.f32 %v7291_v18, %v7288_v14  ;;  %v2888_v17 = vld [vmem:[#allocation11 + $0x1a0] sm:$0xff]  ;;  %v2885_v19 = vld [vmem:[#allocation11 + $0x188] sm:$0xff]  ;;  %3655 = vmatpush1.bf16.msra.mxu0 %v5545_v12  ;;  %v5553_v22 = vcombine.low %v2876_v43, %v2880_v10  ;;  %3698 = vmatpush1.bf16.msra.mxu1 %v5547_v13 }
 0x69d   : > { %3656 = vmatprep.subr.bf16.mxu0 %v5554_v45  ;;  %3699 = vmatprep.subr.bf16.mxu1 %v5556_v15  ;;  %v5564_v25 = vcombine.high %v2885_v19, %v2889_v28  ;;  %v5561_v31 = vcombine.low %v2884_v16, %v2888_v17  ;;  %v5563_v57 = vcombine.low %v2885_v19, %v2889_v28  ;;  %v2920_v12 = vld [vmem:[#allocation11 + $0x2a0] sm:$0xff]  ;;  %v2917_v13 = vld [vmem:[#allocation11 + $0x288] sm:$0xff] }
 0x69e   : > { %2773 = vadd.xlane.f32.xlu0 %v2772_v24  ;;  %v2775_v6 = vadd.f32 %v7297_v23, %v7294_v20  ;;  %v5555_v24 = vcombine.low %v2877_v11, %v2881_v44  ;;  %v2916_v44 = vld [vmem:[#allocation11 + $0x280] sm:$0xff]  ;;  %v2921_v15 = vld [vmem:[#allocation11 + $0x2a8] sm:$0xff] }
 0x69f   : > { %v5594_v45 = vcombine.high %v2916_v44, %v2920_v12  ;;  %v5596_v19 = vcombine.high %v2917_v13, %v2921_v15  ;;  %v2924_v28 = vld [vmem:[#allocation11 + $0x2c0] sm:$0xff] }
 0x6a0   : > { %2776 = vadd.xlane.f32.xlu1 %v2775_v6  ;;  %v5562_v6 = vcombine.high %v2884_v16, %v2888_v17  ;;  %3657 = vmatpush1.bf16.msra.mxu0 %v5553_v22  ;;  %v5593_v16 = vcombine.low %v2916_v44, %v2920_v12  ;;  %v5595_v17 = vcombine.low %v2917_v13, %v2921_v15  ;;  %v2928_v22 = vld [vmem:[#allocation11 + $0x2e0] sm:$0xff]  ;;  %v2842_v44 = vld [vmem:[#allocation11 + $0x30] sm:$0xff]  ;;  %v2839_v12 = vld [vmem:[#allocation11 + $0x18] sm:$0xff] }
 0x6a1   : > { %3700 = vmatpush1.bf16.msra.mxu1 %v5555_v24  ;;  %v2925_v24 = vld [vmem:[#allocation11 + $0x2c8] sm:$0xff]  ;;  %v5601_v26 = vcombine.low %v2924_v28, %v2928_v22 }
 0x6a2   : > { %3658 = vmatprep.subr.bf16.mxu0 %v5562_v6  ;;  %3701 = vmatprep.subr.bf16.mxu1 %v5564_v25  ;;  %v5602_v6 = vcombine.high %v2924_v28, %v2928_v22  ;;  %v2929_v25 = vld [vmem:[#allocation11 + $0x2e8] sm:$0xff] }
 0x6a3   : > { %v5603_v27 = vcombine.low %v2925_v24, %v2929_v25  ;;  %v5604_v29 = vcombine.high %v2925_v24, %v2929_v25 }
 0x6a4   : > { %3659 = vmatpush1.bf16.msra.mxu0 %v5561_v31  ;;  %v2936_v31 = vld [vmem:[#allocation11 + $0x320] sm:$0xff] }
 0x6a5   : > { %3702 = vmatpush1.bf16.msra.mxu1 %v5563_v57  ;;  %3660 = vmatprep.subr.bf16.mxu0 %v5570_v21  ;;  %v2933_v57 = vld [vmem:[#allocation11 + $0x308] sm:$0xff]  ;;  %v5610_v21 = vcombine.high %v2932_v30, %v2936_v31  ;;  %v5609_v34 = vcombine.low %v2932_v30, %v2936_v31 }
 0x6a6   : > { %3703 = vmatprep.subr.bf16.mxu1 %v5572_v32  ;;  %v2937_v32 = vld [vmem:[#allocation11 + $0x328] sm:$0xff] }
 0x6a7   : > { %v5611_v35 = vcombine.low %v2933_v57, %v2937_v32  ;;  %v5612_v36 = vcombine.high %v2933_v57, %v2937_v32 }
 0x6a8   : > { %3661 = vmatpush1.bf16.msra.mxu0 %v5569_v38  ;;  %v2944_v38 = vld [vmem:[#allocation11 + $0x360] sm:$0xff] }
 0x6a9   : > { %3704 = vmatpush1.bf16.msra.mxu1 %v5571_v39  ;;  %3662 = vmatprep.subr.bf16.mxu0 %v5578_v40  ;;  %v2941_v39 = vld [vmem:[#allocation11 + $0x348] sm:$0xff]  ;;  %v5618_v40 = vcombine.high %v2940_v37, %v2944_v38  ;;  %v5617_v42 = vcombine.low %v2940_v37, %v2944_v38 }
 0x6aa   : > { %3705 = vmatprep.subr.bf16.mxu1 %v5580_v41  ;;  %v2945_v41 = vld [vmem:[#allocation11 + $0x368] sm:$0xff] }
 0x6ab   : > { %v5619_v48 = vcombine.low %v2941_v39, %v2945_v41  ;;  %v5620_v49 = vcombine.high %v2941_v39, %v2945_v41 }
 0x6ac   : > { %3663 = vmatpush1.bf16.msra.mxu0 %v5577_v51  ;;  %v2952_v51 = vld [vmem:[#allocation11 + $0x3a0] sm:$0xff] }
 0x6ad   : > { %3706 = vmatpush1.bf16.msra.mxu1 %v5579_v52  ;;  %3664 = vmatprep.subr.bf16.mxu0 %v5586_v53  ;;  %v2949_v52 = vld [vmem:[#allocation11 + $0x388] sm:$0xff]  ;;  %v5626_v53 = vcombine.high %v2948_v50, %v2952_v51 }
 0x6ae   : > { %3707 = vmatprep.subr.bf16.mxu1 %v5588_v54  ;;  %v2953_v54 = vld [vmem:[#allocation11 + $0x3a8] sm:$0xff] }
 0x6b0   : > { %3665 = vmatpush1.bf16.msra.mxu0 %v5585_v55  ;;  %v5625_v55 = vcombine.low %v2948_v50, %v2952_v51  ;;  %v2850_v51 = vld [vmem:[#allocation11 + $0x70] sm:$0xff] }
 0x6b1   : > { %3708 = vmatpush1.bf16.msra.mxu1 %v5587_v56  ;;  %3666 = vmatprep.subr.bf16.mxu0 %v5594_v45  ;;  %v5627_v56 = vcombine.low %v2949_v52, %v2953_v54  ;;  %v2843_v45 = vld [vmem:[#allocation11 + $0x38] sm:$0xff] }
 0x6b2   : > { %3709 = vmatprep.subr.bf16.mxu1 %v5596_v19 }
 0x6b4   : > { %3667 = vmatpush1.bf16.msra.mxu0 %v5593_v16  ;;  %v5519_v16 = vcombine.low %v2839_v12, %v2843_v45 }
 0x6b5   : > { %3710 = vmatpush1.bf16.msra.mxu1 %v5595_v17  ;;  %3668 = vmatprep.subr.bf16.mxu0 %v5602_v6  ;;  %v5520_v17 = vcombine.high %v2839_v12, %v2843_v45 }
 0x6b6   : > { %3711 = vmatprep.subr.bf16.mxu1 %v5604_v29 }
 0x6b8   : > { %3669 = vmatpush1.bf16.msra.mxu0 %v5601_v26  ;;  %v2770_v26 = vld [vmem:[%s7854_s22] sm:$0x3] }
 0x6b9   : > { %3712 = vmatpush1.bf16.msra.mxu1 %v5603_v27  ;;  %3670 = vmatprep.subr.bf16.mxu0 %v5610_v21  ;;  %v2771_v27 = vld [vmem:[%s7855_s30] sm:$0x3]  ;;  %v2812_v29 = vrot.slane %v2770_v26, %v7073_v61  ;;  %v2808_v30 = vrot.slane %v2770_v26, %v7076_v62  ;;  %v2882_v26 = vld [vmem:[#allocation11 + $0x170] sm:$0xff]  ;;  %s6620_s30 = scalar_lea.vmem %s7759_s19, 512 }
 0x6ba   : > { %3713 = vmatprep.subr.bf16.mxu1 %v5612_v36  ;;  %p6621_p6 = scmp.ne.s32.totalorder %s7759_s19, %s6620_s30 }
 0x6bc   : > { %3671 = vmatpush1.bf16.msra.mxu0 %v5609_v34  ;;  %v2827_v34 = vrot.slane %v2771_v27, %v7073_v61  ;;  %p6622_p5 = pnand %p6621_p6, %p7859_p12 }
 0x6bd   : > { %3714 = vmatpush1.bf16.msra.mxu1 %v5611_v35  ;;  %3672 = vmatprep.subr.bf16.mxu0 %v5618_v40  ;;  %v2823_v35 = vrot.slane %v2771_v27, %v7076_v62  ;;  %v2879_v27 = vld [vmem:[#allocation11 + $0x158] sm:$0xff] }
 0x6be   : > { %3715 = vmatprep.subr.bf16.mxu1 %v5620_v49  ;;  %p6623_p7 = pneg %p6622_p5 }
 0x6c0   : > { %3673 = vmatpush1.bf16.msra.mxu0 %v5617_v42 }
 0x6c1   : > { %3716 = vmatpush1.bf16.msra.mxu1 %v5619_v48  ;;  %3674 = vmatprep.subr.bf16.mxu0 %v5626_v53 }
 0x6c4   : > { %3675 = vmatpush1.bf16.msra.mxu0 %v5625_v55  ;;  %v2854_v55 = vld [vmem:[#allocation11 + $0x90] sm:$0xff] }
 0x72b   : > { %v2774_v58 = vpop.xlane.xlu0 %2773 }
 0x72c   : > { %v2778_v59 = vmul.f32 0.00390625, %v2774_v58  ;;  %v5628_v58 = vcombine.high %v2949_v52, %v2953_v54  ;;  %v2851_v52 = vld [vmem:[#allocation11 + $0x78] sm:$0xff] }
 0x72d   : > { %v2777_v63 = vpop.xlane.xlu1 %2776 }
 0x72e   : > { %v7304_v0 = vsub.f32 %v7288_v14, %v2778_v59  ;;  %v7307_v1 = vsub.f32 %v7291_v18, %v2778_v59  ;;  %v2779_v2 = vmul.f32 0.00390625, %v2777_v63  ;;  %v2956_v59 = vld [vmem:[#allocation11 + $0x3c0] sm:$0xff]  ;;  %3717 = vmatprep.subr.bf16.mxu1 %v5628_v58  ;;  %v2855_v58 = vld [vmem:[#allocation11 + $0x98] sm:$0xff] }
 0x72f   : > { %v2960_v63 = vld [vmem:[#allocation11 + $0x3e0] sm:$0xff]  ;;  %3718 = vmatpush1.bf16.msra.mxu1 %v5627_v56  ;;  %v2858_v56 = vld [vmem:[#allocation11 + $0xb0] sm:$0xff] }
 0x730   : > { %v7310_v3 = vsub.f32 %v7294_v20, %v2779_v2  ;;  %v7313_v7 = vsub.f32 %v7297_v23, %v2779_v2  ;;  %v2784_v8 = vmul.f32 %v7304_v0, %v7304_v0  ;;  %v2785_v33 = vmul.f32 %v7307_v1, %v7307_v1  ;;  %v2957_v2 = vld [vmem:[#allocation11 + $0x3c8] sm:$0xff] }
 0x732   : > { %v2788_v9 = vadd.f32 %v2785_v33, %v2784_v8  ;;  %v2786_v43 = vmul.f32 %v7310_v3, %v7310_v3  ;;  %v2787_v10 = vmul.f32 %v7313_v7, %v7313_v7  ;;  %v5633_v8 = vcombine.low %v2956_v59, %v2960_v63 }
 0x733   : > { %v5634_v33 = vcombine.high %v2956_v59, %v2960_v63  ;;  %v2859_v59 = vld [vmem:[#allocation11 + $0xb8] sm:$0xff] }
 0x734   : > { %2789 = vadd.xlane.f32.xlu0 %v2788_v9  ;;  %v2791_v11 = vadd.f32 %v2787_v10, %v2786_v43  ;;  %v2961_v9 = vld [vmem:[#allocation11 + $0x3e8] sm:$0xff]  ;;  %v5535_v12 = vcombine.low %v2855_v58, %v2859_v59 }
 0x735   : > { %v5635_v43 = vcombine.low %v2957_v2, %v2961_v9  ;;  %v5636_v10 = vcombine.high %v2957_v2, %v2961_v9  ;;  %3676 = vmatprep.subr.bf16.mxu0 %v5634_v33  ;;  %v5536_v33 = vcombine.high %v2855_v58, %v2859_v59  ;;  %v2862_v9 = vld [vmem:[#allocation11 + $0xd0] sm:$0xff] }
 0x736   : > { %2792 = vadd.xlane.f32.xlu1 %v2791_v11  ;;  %3677 = vmatpush1.bf16.msra.mxu0 %v5633_v8  ;;  %v2838_v11 = vld [vmem:[#allocation11 + $0x10] sm:$0xff]  ;;  %v5534_v8 = vcombine.high %v2854_v55, %v2858_v56 }
 0x737   : > { %3719 = vmatprep.subr.bf16.mxu1 %v5636_v10  ;;  %v5518_v13 = vcombine.high %v2838_v11, %v2842_v44  ;;  %v5517_v15 = vcombine.low %v2838_v11, %v2842_v44  ;;  %v2863_v10 = vld [vmem:[#allocation11 + $0xd8] sm:$0xff]  ;;  %v5533_v44 = vcombine.low %v2854_v55, %v2858_v56 }
 0x738   : > { %3720 = vmatpush1.bf16.msra.mxu1 %v5635_v43  ;;  %v2866_v43 = vld [vmem:[#allocation11 + $0xf0] sm:$0xff]  ;;  %v2867_v11 = vld [vmem:[#allocation11 + $0xf8] sm:$0xff] }
 0x739   : > { %3732 = vmatprep.subr.bf16.mxu0 %v5518_v13  ;;  %3775 = vmatprep.subr.bf16.mxu1 %v5520_v17  ;;  %v5542_v13 = vcombine.high %v2862_v9, %v2866_v43  ;;  %v5544_v45 = vcombine.high %v2863_v10, %v2867_v11  ;;  %v2871_v17 = vld [vmem:[#allocation11 + $0x118] sm:$0xff] }
 0x73a   : > { %v2903_v55 = vld [vmem:[#allocation11 + $0x218] sm:$0xff] }
 0x7c1   : > { %v2790_v19 = vpop.xlane.xlu0 %2789 }
 0x7c2   : > { %v2794_v28 = vmul.f32 0.00390625, %v2790_v19  ;;  %v2875_v19 = vld [vmem:[#allocation11 + $0x138] sm:$0xff] }
 0x7c3   : > { %v2793_v22 = vpop.xlane.xlu1 %2792 }
 0x7c4   : > { %v2796_v24 = vadd.f32 1e-05, %v2794_v28  ;;  %v2795_v6 = vmul.f32 0.00390625, %v2793_v22  ;;  %v5541_v28 = vcombine.low %v2862_v9, %v2866_v43  ;;  %v5543_v22 = vcombine.low %v2863_v10, %v2867_v11 }
 0x7c6   : > { %6350 = vrsqrt.f32 %v2796_v24  ;;  %v2797_v25 = vadd.f32 1e-05, %v2795_v6  ;;  %v5552_v6 = vcombine.high %v2871_v17, %v2875_v19 }
 0x7c8   : > { %6352 = vrsqrt.f32 %v2797_v25  ;;  %v2878_v25 = vld [vmem:[#allocation11 + $0x150] sm:$0xff] }
 0x7d0   : > { %v6351_v31 = vpop.eup %6350 }
 0x7d1   : > { %v2800_v57 = vmul.f32 %v6351_v31, %v7304_v0  ;;  %v2801_v21 = vmul.f32 %v6351_v31, %v7307_v1  ;;  %v2846_v0 = vld [vmem:[#allocation11 + $0x50] sm:$0xff]  ;;  %v2847_v1 = vld [vmem:[#allocation11 + $0x58] sm:$0xff]  ;;  %v5551_v31 = vcombine.low %v2871_v17, %v2875_v19 }
 0x7d2   : > { %v6353_v32 = vpop.eup %6352  ;;  %v5525_v63 = vcombine.low %v2846_v0, %v2850_v51  ;;  %v5527_v2 = vcombine.low %v2847_v1, %v2851_v52 }
 0x7d3   : > { %v2802_v36 = vmul.f32 %v6353_v32, %v7310_v3  ;;  %v2803_v37 = vmul.f32 %v6353_v32, %v7313_v7  ;;  %v2816_v38 = vmul.f32 %v2812_v29, %v2801_v21  ;;  %v2815_v39 = vmul.f32 %v2808_v30, %v2800_v57  ;;  %v2886_v32 = vld [vmem:[#allocation11 + $0x190] sm:$0xff] }
 0x7d4   : > { %v5526_v3 = vcombine.high %v2846_v0, %v2850_v51  ;;  %v5528_v7 = vcombine.high %v2847_v1, %v2851_v52  ;;  %v5558_v57 = vcombine.high %v2878_v25, %v2882_v26  ;;  %v2902_v52 = vld [vmem:[#allocation11 + $0x210] sm:$0xff] }
 0x7d5   : > { %v2818_v40 = vmul.f32 %v2812_v29, %v2803_v37  ;;  %v2817_v41 = vmul.f32 %v2808_v30, %v2802_v36  ;;  %v2831_v42 = vadd.f32 %v2827_v34, %v2816_v38  ;;  %v2830_v49 = vadd.f32 %v2823_v35, %v2815_v39  ;;  %v2883_v29 = vld [vmem:[#allocation11 + $0x178] sm:$0xff] }
 0x7d6   : > { %v5560_v21 = vcombine.high %v2879_v27, %v2883_v29  ;;  %v2891_v36 = vld [vmem:[#allocation11 + $0x1b8] sm:$0xff]  ;;  %v5557_v37 = vcombine.low %v2878_v25, %v2882_v26  ;;  %v5559_v38 = vcombine.low %v2879_v27, %v2883_v29 }
 0x7d7   : > { %v2833_v48 = vadd.f32 %v2827_v34, %v2818_v40  ;;  %v2832_v50 = vadd.f32 %v2823_v35, %v2817_v41  ;;  %v2890_v34 = vld [vmem:[#allocation11 + $0x1b0] sm:$0xff]  ;;  %v2887_v35 = vld [vmem:[#allocation11 + $0x198] sm:$0xff] }
 0x7d8   : > { %v5566_v39 = vcombine.high %v2886_v32, %v2890_v34  ;;  %v5568_v40 = vcombine.high %v2887_v35, %v2891_v36  ;;  %v2894_v41 = vld [vmem:[#allocation11 + $0x1d0] sm:$0xff]  ;;  %v5567_v0 = vcombine.low %v2887_v35, %v2891_v36 }
 0x7d9   : > { %v2835_v53 = vpack.c.bf16 %v2833_v48, %v2831_v42  ;;  %v7337_v54 = vpack.c.bf16 %v2832_v50, %v2830_v49  ;;  %v2898_v42 = vld [vmem:[#allocation11 + $0x1f0] sm:$0xff]  ;;  %v2895_v48 = vld [vmem:[#allocation11 + $0x1d8] sm:$0xff]  ;;  %v5565_v50 = vcombine.low %v2886_v32, %v2890_v34 }
 0x7da   : > { %v2899_v49 = vld [vmem:[#allocation11 + $0x1f8] sm:$0xff]  ;;  %v5574_v51 = vcombine.high %v2894_v41, %v2898_v42 }
 0x7db   : > { %3678 = vmatprep.mubr.bf16.mxu0 %v2835_v53  ;;  %3721 = vmatprep.mubr.bf16.mxu1 %v2835_v53  ;;  %v5576_v1 = vcombine.high %v2895_v48, %v2899_v49  ;;  %v5575_v56 = vcombine.low %v2895_v48, %v2899_v49 }
 0x7dc   : > { %3679 = vmatmul.mubr.bf16.vlgmr.msra.gmra.mrb[8].mxu0 %v7337_v54  ;;  %3722 = vmatmul.mubr.bf16.vlgmr.msra.gmra.mrb[24].mxu1 %v7337_v54 }
 0x7dd   : > { %3733 = vmatpush1.bf16.msra.mxu0 %v5517_v15  ;;  %3776 = vmatpush1.bf16.msra.mxu1 %v5519_v16  ;;  %v2870_v15 = vld [vmem:[#allocation11 + $0x110] sm:$0xff] }
 0x7de   : > { %3764 = vmatprep.mubr.bf16.mxu0 %v2835_v53  ;;  %3807 = vmatprep.mubr.bf16.mxu1 %v2835_v53  ;;  %v2874_v16 = vld [vmem:[#allocation11 + $0x130] sm:$0xff] }
 0x7df   : > { %3734 = vmatprep.subr.bf16.mxu0 %v5526_v3  ;;  %3777 = vmatprep.subr.bf16.mxu1 %v5528_v7  ;;  %v5550_v24 = vcombine.high %v2870_v15, %v2874_v16  ;;  %v5549_v30 = vcombine.low %v2870_v15, %v2874_v16  ;;  %v2906_v53 = vld [vmem:[#allocation11 + $0x230] sm:$0xff]  ;;  %v2907_v3 = vld [vmem:[#allocation11 + $0x238] sm:$0xff]  ;;  %v5573_v7 = vcombine.low %v2894_v41, %v2898_v42 }
 0x7e0   : > { %v5582_v58 = vcombine.high %v2902_v52, %v2906_v53  ;;  %v5584_v59 = vcombine.high %v2903_v55, %v2907_v3  ;;  %v5581_v9 = vcombine.low %v2902_v52, %v2906_v53  ;;  %v5583_v43 = vcombine.low %v2903_v55, %v2907_v3 }
 0x7e1   : > { %3735 = vmatpush1.bf16.msra.mxu0 %v5525_v63  ;;  %3778 = vmatpush1.bf16.msra.mxu1 %v5527_v2  ;;  %v2910_v63 = vld [vmem:[#allocation11 + $0x250] sm:$0xff] }
 0x7e2   : > { %3736 = vmatprep.subr.bf16.mxu0 %v5534_v8  ;;  %3779 = vmatprep.subr.bf16.mxu1 %v5536_v33  ;;  %v2914_v2 = vld [vmem:[#allocation11 + $0x270] sm:$0xff]  ;;  %v2911_v8 = vld [vmem:[#allocation11 + $0x258] sm:$0xff] }
 0x7e3   : > { %v2915_v33 = vld [vmem:[#allocation11 + $0x278] sm:$0xff]  ;;  %v5590_v10 = vcombine.high %v2910_v63, %v2914_v2  ;;  %v5589_v15 = vcombine.low %v2910_v63, %v2914_v2 }
 0x7e4   : > { %v5592_v11 = vcombine.high %v2911_v8, %v2915_v33  ;;  %v5591_v16 = vcombine.low %v2911_v8, %v2915_v33 }
 0x7e5   : > { %3737 = vmatpush1.bf16.msra.mxu0 %v5533_v44  ;;  %3780 = vmatpush1.bf16.msra.mxu1 %v5535_v12  ;;  %v2918_v44 = vld [vmem:[#allocation11 + $0x290] sm:$0xff] }
 0x7e6   : > { %3738 = vmatprep.subr.bf16.mxu0 %v5542_v13  ;;  %3781 = vmatprep.subr.bf16.mxu1 %v5544_v45  ;;  %v2922_v12 = vld [vmem:[#allocation11 + $0x2b0] sm:$0xff]  ;;  %v2919_v13 = vld [vmem:[#allocation11 + $0x298] sm:$0xff] }
 0x7e7   : > { %v2923_v45 = vld [vmem:[#allocation11 + $0x2b8] sm:$0xff]  ;;  %v5598_v17 = vcombine.high %v2918_v44, %v2922_v12  ;;  %v5597_v25 = vcombine.low %v2918_v44, %v2922_v12 }
 0x7e8   : > { %v5600_v19 = vcombine.high %v2919_v13, %v2923_v45  ;;  %v5599_v26 = vcombine.low %v2919_v13, %v2923_v45  ;;  %v6143_v44 = vld [vmem:[#allocation13 + $0x14] ss:$8 sps:$4 sm:$0xff]   ;;  %v6141_v12 = vld [vmem:[#allocation13 + $0x10] ss:$8 sps:$4 sm:$0xff]   ;;  %v6146_v13 = vld [vmem:[#allocation13 + $0x24] ss:$8 sps:$4 sm:$0xff]  }
 0x7e9   : > { %3739 = vmatpush1.bf16.msra.mxu0 %v5541_v28  ;;  %3782 = vmatpush1.bf16.msra.mxu1 %v5543_v22  ;;  %v2926_v28 = vld [vmem:[#allocation11 + $0x2d0] sm:$0xff]  ;;  %v6144_v45 = vld [vmem:[#allocation13 + $0x20] ss:$8 sps:$4 sm:$0xff]  }
 0x7ea   : > { %3740 = vmatprep.subr.bf16.mxu0 %v5550_v24  ;;  %3783 = vmatprep.subr.bf16.mxu1 %v5552_v6  ;;  %v2930_v22 = vld [vmem:[#allocation11 + $0x2f0] sm:$0xff]  ;;  %v2927_v24 = vld [vmem:[#allocation11 + $0x2d8] sm:$0xff] }
 0x7eb   : > { %v2931_v6 = vld [vmem:[#allocation11 + $0x2f8] sm:$0xff]  ;;  %v5606_v27 = vcombine.high %v2926_v28, %v2930_v22  ;;  %v5605_v32 = vcombine.low %v2926_v28, %v2930_v22 }
 0x7ec   : > { %v5608_v29 = vcombine.high %v2927_v24, %v2931_v6  ;;  %v5607_v34 = vcombine.low %v2927_v24, %v2931_v6  ;;  %v6155_v28 = vld [vmem:[#allocation13 + $0x54] ss:$8 sps:$4 sm:$0xff]   ;;  %v6153_v22 = vld [vmem:[#allocation13 + $0x50] ss:$8 sps:$4 sm:$0xff]   ;;  %v6156_v24 = vld [vmem:[#allocation13 + $0x60] ss:$8 sps:$4 sm:$0xff]  }
 0x7ed   : > { %3741 = vmatpush1.bf16.msra.mxu0 %v5549_v30  ;;  %3784 = vmatpush1.bf16.msra.mxu1 %v5551_v31  ;;  %v2934_v30 = vld [vmem:[#allocation11 + $0x310] sm:$0xff] }
 0x7ee   : > { %3742 = vmatprep.subr.bf16.mxu0 %v5558_v57  ;;  %3785 = vmatprep.subr.bf16.mxu1 %v5560_v21  ;;  %v2938_v31 = vld [vmem:[#allocation11 + $0x330] sm:$0xff]  ;;  %v2935_v57 = vld [vmem:[#allocation11 + $0x318] sm:$0xff] }
 0x7ef   : > { %v2939_v21 = vld [vmem:[#allocation11 + $0x338] sm:$0xff]  ;;  %v5614_v35 = vcombine.high %v2934_v30, %v2938_v31  ;;  %v5613_v41 = vcombine.low %v2934_v30, %v2938_v31  ;;  %v6170_v31 = vld [vmem:[#allocation13 + $0xa4] ss:$8 sps:$4 sm:$0xff]  }
 0x7f0   : > { %v5616_v36 = vcombine.high %v2935_v57, %v2939_v21  ;;  %v5615_v42 = vcombine.low %v2935_v57, %v2939_v21  ;;  %v6161_v6 = vld [vmem:[#allocation13 + $0x74] ss:$8 sps:$4 sm:$0xff]   ;;  %v6165_v30 = vld [vmem:[#allocation13 + $0x90] ss:$8 sps:$4 sm:$0xff]   ;;  %v6168_v57 = vld [vmem:[#allocation13 + $0xa0] ss:$8 sps:$4 sm:$0xff]  }
 0x7f1   : > { %3743 = vmatpush1.bf16.msra.mxu0 %v5557_v37  ;;  %3786 = vmatpush1.bf16.msra.mxu1 %v5559_v38  ;;  %v2942_v37 = vld [vmem:[#allocation11 + $0x350] sm:$0xff] }
 0x7f2   : > { %3744 = vmatprep.subr.bf16.mxu0 %v5566_v39  ;;  %3787 = vmatprep.subr.bf16.mxu1 %v5568_v40  ;;  %v2946_v38 = vld [vmem:[#allocation11 + $0x370] sm:$0xff]  ;;  %v2943_v39 = vld [vmem:[#allocation11 + $0x358] sm:$0xff] }
 0x7f3   : > { %v2947_v40 = vld [vmem:[#allocation11 + $0x378] sm:$0xff]  ;;  %v5622_v48 = vcombine.high %v2942_v37, %v2946_v38  ;;  %v5621_v52 = vcombine.low %v2942_v37, %v2946_v38  ;;  %v6182_v38 = vld [vmem:[#allocation13 + $0xe4] ss:$8 sps:$4 sm:$0xff]  }
 0x7f4   : > { %v5624_v49 = vcombine.high %v2943_v39, %v2947_v40  ;;  %v5623_v53 = vcombine.low %v2943_v39, %v2947_v40  ;;  %v6173_v21 = vld [vmem:[#allocation13 + $0xb4] ss:$8 sps:$4 sm:$0xff]   ;;  %v6177_v37 = vld [vmem:[#allocation13 + $0xd0] ss:$8 sps:$4 sm:$0xff]   ;;  %v6180_v39 = vld [vmem:[#allocation13 + $0xe0] ss:$8 sps:$4 sm:$0xff]  }
 0x7f5   : > { %3745 = vmatpush1.bf16.msra.mxu0 %v5565_v50  ;;  %3788 = vmatpush1.bf16.msra.mxu1 %v5567_v0  ;;  %v2950_v50 = vld [vmem:[#allocation11 + $0x390] sm:$0xff] }
 0x7f6   : > { %3746 = vmatprep.subr.bf16.mxu0 %v5574_v51  ;;  %3789 = vmatprep.subr.bf16.mxu1 %v5576_v1  ;;  %v2954_v0 = vld [vmem:[#allocation11 + $0x3b0] sm:$0xff]  ;;  %v2951_v51 = vld [vmem:[#allocation11 + $0x398] sm:$0xff] }
 0x7f7   : > { %v2955_v1 = vld [vmem:[#allocation11 + $0x3b8] sm:$0xff]  ;;  %v5630_v55 = vcombine.high %v2950_v50, %v2954_v0  ;;  %v5629_v63 = vcombine.low %v2950_v50, %v2954_v0 }
 0x7f8   : > { %v5632_v3 = vcombine.high %v2951_v51, %v2955_v1  ;;  %v5631_v2 = vcombine.low %v2951_v51, %v2955_v1  ;;  %v6185_v40 = vld [vmem:[#allocation13 + $0xf4] ss:$8 sps:$4 sm:$0xff]  }
 0x7f9   : > { %3747 = vmatpush1.bf16.msra.mxu0 %v5573_v7  ;;  %3790 = vmatpush1.bf16.msra.mxu1 %v5575_v56  ;;  %v2958_v7 = vld [vmem:[#allocation11 + $0x3d0] sm:$0xff] }
 0x7fa   : > { %3748 = vmatprep.subr.bf16.mxu0 %v5582_v58  ;;  %3791 = vmatprep.subr.bf16.mxu1 %v5584_v59  ;;  %v2962_v56 = vld [vmem:[#allocation11 + $0x3f0] sm:$0xff]  ;;  %v2959_v58 = vld [vmem:[#allocation11 + $0x3d8] sm:$0xff] }
 0x7fb   : > { %v2963_v59 = vld [vmem:[#allocation11 + $0x3f8] sm:$0xff]  ;;  %v5638_v8 = vcombine.high %v2958_v7, %v2962_v56 }
 0x7fc   : > { %v5640_v33 = vcombine.high %v2959_v58, %v2963_v59 }
 0x7fd   : > { %3749 = vmatpush1.bf16.msra.mxu0 %v5581_v9  ;;  %3792 = vmatpush1.bf16.msra.mxu1 %v5583_v43  ;;  %v5637_v9 = vcombine.low %v2958_v7, %v2962_v56  ;;  %v5639_v43 = vcombine.low %v2959_v58, %v2963_v59 }
 0x7fe   : > { %3750 = vmatprep.subr.bf16.mxu0 %v5590_v10  ;;  %3793 = vmatprep.subr.bf16.mxu1 %v5592_v11  ;;  %v6140_v10 = vld [vmem:[#allocation13 + $0x4] ss:$8 sps:$4 sm:$0xff]   ;;  %v6138_v11 = vld [vmem:[#allocation13] ss:$8 sps:$4 sm:$0xff]  }
 0x801   : > { %3751 = vmatpush1.bf16.msra.mxu0 %v5589_v15  ;;  %3794 = vmatpush1.bf16.msra.mxu1 %v5591_v16  ;;  %v6149_v15 = vld [vmem:[#allocation13 + $0x34] ss:$8 sps:$4 sm:$0xff]   ;;  %v6147_v16 = vld [vmem:[#allocation13 + $0x30] ss:$8 sps:$4 sm:$0xff]  }
 0x802   : > { %3752 = vmatprep.subr.bf16.mxu0 %v5598_v17  ;;  %3795 = vmatprep.subr.bf16.mxu1 %v5600_v19  ;;  %v6152_v17 = vld [vmem:[#allocation13 + $0x44] ss:$8 sps:$4 sm:$0xff]   ;;  %v6150_v19 = vld [vmem:[#allocation13 + $0x40] ss:$8 sps:$4 sm:$0xff]  }
 0x805   : > { %3753 = vmatpush1.bf16.msra.mxu0 %v5597_v25  ;;  %3796 = vmatpush1.bf16.msra.mxu1 %v5599_v26  ;;  %v6159_v25 = vld [vmem:[#allocation13 + $0x70] ss:$8 sps:$4 sm:$0xff]   ;;  %v6164_v26 = vld [vmem:[#allocation13 + $0x84] ss:$8 sps:$4 sm:$0xff]  }
 0x806   : > { %3754 = vmatprep.subr.bf16.mxu0 %v5606_v27  ;;  %3797 = vmatprep.subr.bf16.mxu1 %v5608_v29  ;;  %v6162_v27 = vld [vmem:[#allocation13 + $0x80] ss:$8 sps:$4 sm:$0xff]   ;;  %v6167_v29 = vld [vmem:[#allocation13 + $0x94] ss:$8 sps:$4 sm:$0xff]  }
 0x809   : > { %3755 = vmatpush1.bf16.msra.mxu0 %v5605_v32  ;;  %3798 = vmatpush1.bf16.msra.mxu1 %v5607_v34  ;;  %v6171_v32 = vld [vmem:[#allocation13 + $0xb0] ss:$8 sps:$4 sm:$0xff]   ;;  %v6176_v34 = vld [vmem:[#allocation13 + $0xc4] ss:$8 sps:$4 sm:$0xff]  }
 0x80a   : > { %3756 = vmatprep.subr.bf16.mxu0 %v5614_v35  ;;  %3799 = vmatprep.subr.bf16.mxu1 %v5616_v36  ;;  %v6174_v35 = vld [vmem:[#allocation13 + $0xc0] ss:$8 sps:$4 sm:$0xff]   ;;  %v6179_v36 = vld [vmem:[#allocation13 + $0xd4] ss:$8 sps:$4 sm:$0xff]  }
 0x80d   : > { %3757 = vmatpush1.bf16.msra.mxu0 %v5613_v41  ;;  %3800 = vmatpush1.bf16.msra.mxu1 %v5615_v42  ;;  %v6183_v41 = vld [vmem:[#allocation13 + $0xf0] ss:$8 sps:$4 sm:$0xff]   ;;  %v6188_v42 = vld [vmem:[#allocation13 + $0x104] ss:$8 sps:$4 sm:$0xff]  }
 0x80e   : > { %3758 = vmatprep.subr.bf16.mxu0 %v5622_v48  ;;  %3801 = vmatprep.subr.bf16.mxu1 %v5624_v49  ;;  %v7346_v48 = vld [vmem:[%s7856_s21] sm:$0xff]  ;;  %s6626_s21 = scalar_lea.vmem %s6625_s10, 1024 }
 0x80f   : > { %v2969_v49 = vrot.slane %v7346_v48, %v7076_v62  ;;  %v2977_v50 = vrot.slane %v7346_v48, %v722_v46  ;;  %v2973_v0 = vrot.slane %v7346_v48, %v7073_v61  ;;  %v2981_v51 = vrot.slane %v7346_v48, %v726_v47  ;;  %p6628_p1 = scmp.lt.s32.totalorder %s6626_s21, %s6620_s30 }
 0x811   : > { %3759 = vmatpush1.bf16.msra.mxu0 %v5621_v52  ;;  %3802 = vmatpush1.bf16.msra.mxu1 %v5623_v53  ;;  %p6629_p3 = por %p6628_p1, %p6627_p4 }
 0x812   : > { %3760 = vmatprep.subr.bf16.mxu0 %v5630_v55  ;;  %3803 = vmatprep.subr.bf16.mxu1 %v5632_v3 }
 0x813   : > { %p6630_p8 = pnand %p6629_p3, %p6623_p7 }
 0x815   : > { %3761 = vmatpush1.bf16.msra.mxu0 %v5629_v63  ;;  %3804 = vmatpush1.bf16.msra.mxu1 %v5631_v2 }
 0x816   : > { %3762 = vmatprep.subr.bf16.mxu0 %v5638_v8  ;;  %3805 = vmatprep.subr.bf16.mxu1 %v5640_v33 }
 0x819   : > { %3763 = vmatpush1.bf16.msra.mxu0 %v5637_v9  ;;  %3806 = vmatpush1.bf16.msra.mxu1 %v5639_v43 }
 0x81a   : > { %5022 = vmatprep.subr.bf16.mxu0 %v6140_v10 }
 0x81c   : > { %3765 = vmatmul.mubr.bf16.vlgmr.msra.gmra.mrb[12].mxu0 %v7337_v54  ;;  %3808 = vmatmul.mubr.bf16.vlgmr.msra.gmra.mrb[28].mxu1 %v7337_v54  ;;  %v6158_v54 = vld [vmem:[#allocation13 + $0x64] ss:$8 sps:$4 sm:$0xff]  }
 0x81d   : > { %5023 = vmatpush1.bf16.msra.mxu0 %v6138_v11 }
 0x81e   : > { %5024 = vmatprep.subr.bf16.mxu0 %v6143_v44 }
 0x821   : > { %5025 = vmatpush1.bf16.msra.mxu0 %v6141_v12 }
 0x822   : > { %5026 = vmatprep.subr.bf16.mxu0 %v6146_v13 }
 0x825   : > { %5027 = vmatpush1.bf16.msra.mxu0 %v6144_v45 }
 0x826   : > { %5028 = vmatprep.subr.bf16.mxu0 %v6149_v15 }
 0x829   : > { %5029 = vmatpush1.bf16.msra.mxu0 %v6147_v16 }
 0x82a   : > { %5030 = vmatprep.subr.bf16.mxu0 %v6152_v17 }
 0x82d   : > { %5031 = vmatpush1.bf16.msra.mxu0 %v6150_v19 }
 0x82e   : > { %5032 = vmatprep.subr.bf16.mxu0 %v6155_v28 }
 0x831   : > { %5033 = vmatpush1.bf16.msra.mxu0 %v6153_v22 }
 0x832   : > { %5034 = vmatprep.subr.bf16.mxu0 %v6158_v54 }
 0x835   : > { %5035 = vmatpush1.bf16.msra.mxu0 %v6156_v24 }
 0x836   : > { %5036 = vmatprep.subr.bf16.mxu0 %v6161_v6 }
 0x839   : > { %5037 = vmatpush1.bf16.msra.mxu0 %v6159_v25 }
 0x83a   : > { %5038 = vmatprep.subr.bf16.mxu0 %v6164_v26 }
 0x83d   : > { %5039 = vmatpush1.bf16.msra.mxu0 %v6162_v27 }
 0x83e   : > { %5040 = vmatprep.subr.bf16.mxu0 %v6167_v29 }
 0x841   : > { %5041 = vmatpush1.bf16.msra.mxu0 %v6165_v30 }
 0x842   : > { %5042 = vmatprep.subr.bf16.mxu0 %v6170_v31 }
 0x845   : > { %5043 = vmatpush1.bf16.msra.mxu0 %v6168_v57 }
 0x846   : > { %5044 = vmatprep.subr.bf16.mxu0 %v6173_v21 }
 0x849   : > { %5045 = vmatpush1.bf16.msra.mxu0 %v6171_v32 }
 0x84a   : > { %5046 = vmatprep.subr.bf16.mxu0 %v6176_v34 }
 0x84d   : > { %5047 = vmatpush1.bf16.msra.mxu0 %v6174_v35 }
 0x84e   : > { %5048 = vmatprep.subr.bf16.mxu0 %v6179_v36 }
 0x851   : > { %5049 = vmatpush1.bf16.msra.mxu0 %v6177_v37 }
 0x852   : > { %5050 = vmatprep.subr.bf16.mxu0 %v6182_v38  ;;  %v2992_v38 = vsub.s32 6, %v7070_v60 }
 0x855   : > { %5051 = vmatpush1.bf16.msra.mxu0 %v6180_v39 }
 0x856   : > { %5052 = vmatprep.subr.bf16.mxu0 %v6185_v40 }
 0x859   : > { %5053 = vmatpush1.bf16.msra.mxu0 %v6183_v41 }
 0x85a   : > { %5065 = vmatprep.subr.bf16.mxu0 %v6188_v42  ;;  %v2996_v42 = vsub.s32 7, %v7070_v60 }
 0x8af   : > { %v3680_v1 = vpop.f32.mrb[8].mxu0  ;;  %v3723_v52 = vpop.f32.mrb[24].mxu1 }
 0x8b0   : > { %v3681_v53 = vadd.f32 %v3680_v1, %v2969_v49  ;;  %v3724_v55 = vadd.f32 %v3723_v52, %v2977_v50  ;;  %v3682_v3 = vpop.f32.mrb[9].mxu0  ;;  %v3725_v7 = vpop.f32.mrb[25].mxu1 }
 0x8b1   : > { %v7358_v56 = vadd.f32 %v3682_v3, %v2973_v0  ;;  %v7360_v58 = vadd.f32 %v3725_v7, %v2981_v51  ;;  %v3684_v59 = vpop.f32.mrb[10].mxu0  ;;  %v3727_v63 = vpop.f32.mrb[26].mxu1 }
 0x8b2   : > { %v7362_v46 = vmul.f32 0.70710677, %v3681_v53  ;;  %v7364_v2 = vmul.f32 0.70710677, %v3724_v55  ;;  %v3686_v10 = vpop.f32.mrb[11].mxu0  ;;  %v3729_v13 = vpop.f32.mrb[27].mxu1  ;;  %v7376_v19 = vadd.f32 %v3684_v59, %v2969_v49  ;;  %v7381_v54 = vadd.f32 %v3727_v63, %v2977_v50 }
 0x8b3   : > { %v7367_v8 = vmul.f32 0.70710677, %v7358_v56  ;;  %v7373_v43 = vmul.f32 0.70710677, %v7360_v58  ;;  %v7383_v6 = vadd.f32 %v3686_v10, %v2973_v0  ;;  %v7393_v34 = vadd.f32 %v3729_v13, %v2981_v51 }
 0x8b4   : > { %v3882_v47 = vand.u32 2147483647, %v7362_v46  ;;  %v3884_v33 = vand.u32 2147483647, %v7364_v2  ;;  %v7379_v22 = vmul.f32 0.70710677, %v7376_v19 }
 0x8b5   : > { %v3883_v9 = vand.u32 2147483647, %v7367_v8  ;;  %v3885_v16 = vand.u32 2147483647, %v7373_v43  ;;  %v7387_v27 = vmul.f32 0.70710677, %v7381_v54 }
 0x8b6   : > { %v3898_v11 = vmul.f32 0.3275911, %v3882_v47  ;;  %v3900_v44 = vmul.f32 0.3275911, %v3884_v33  ;;  %v3890_v25 = vand.u32 2147483647, %v7379_v22 }
 0x8b7   : > { %v3899_v12 = vmul.f32 0.3275911, %v3883_v9  ;;  %v3901_v28 = vmul.f32 0.3275911, %v3885_v16  ;;  %v4090_v26 = vsub.f32 0.0, %v3882_v47  ;;  %v4092_v29 = vsub.f32 0.0, %v3884_v33 }
 0x8b8   : > { %v3914_v45 = vadd.f32 1.0, %v3898_v11  ;;  %v3916_v15 = vadd.f32 1.0, %v3900_v44  ;;  %v3906_v30 = vmul.f32 0.3275911, %v3890_v25  ;;  %v4091_v31 = vsub.f32 0.0, %v3883_v9 }
 0x8b9   : > { %v3915_v17 = vadd.f32 1.0, %v3899_v12  ;;  %v3917_v24 = vadd.f32 1.0, %v3901_v28  ;;  %v3892_v57 = vand.u32 2147483647, %v7387_v27  ;;  %v7391_v21 = vmul.f32 0.70710677, %v7383_v6 }
 0x8ba   : > { %6354 = vrcp.f32 %v3914_v45  ;;  %v3922_v32 = vadd.f32 1.0, %v3906_v30  ;;  %v4106_v35 = vmul.f32 %v4090_v26, %v3882_v47  ;;  %v4108_v40 = vmul.f32 %v4092_v29, %v3884_v33 }
 0x8bb   : > { %6356 = vrcp.f32 %v3916_v15  ;;  %v3908_v36 = vmul.f32 0.3275911, %v3892_v57  ;;  %v7396_v37 = vand.u32 2147483647, %v7391_v21  ;;  %v4093_v41 = vsub.f32 0.0, %v3885_v16 }
 0x8bc   : > { %6358 = vrcp.f32 %v3915_v17  ;;  %v4107_v0 = vmul.f32 %v4091_v31, %v3883_v9  ;;  %v7406_v52 = vmul.f32 0.5, %v3681_v53  ;;  %v7408_v3 = vmul.f32 0.5, %v3724_v55 }
 0x8bd   : > { %6360 = vrcp.f32 %v3917_v24  ;;  %v3924_v51 = vadd.f32 1.0, %v3908_v36  ;;  %v3907_v1 = vmul.f32 0.3275911, %v7396_v37  ;;  %v7412_v59 = vmul.f32 0.70710677, %v7393_v34 }
 0x8be   : > { %6362 = vrcp.f32 %v3922_v32  ;;  %v4122_v47 = vmul.f32 1.442695, %v4106_v35  ;;  %v4126_v9 = vmul.f32 1.442695, %v4108_v40  ;;  %v4109_v44 = vmul.f32 %v4093_v41, %v3885_v16 }
 0x8bf   : > { %6364 = vrcp.f32 %v3924_v51  ;;  %v3923_v33 = vadd.f32 1.0, %v3907_v1  ;;  %v7417_v12 = vand.u32 2147483647, %v7412_v59  ;;  %v4124_v13 = vmul.f32 1.442695, %v4107_v0 }
 0x8c0   : > { %v4098_v45 = vsub.f32 0.0, %v3890_v25  ;;  %v4100_v28 = vsub.f32 0.0, %v3892_v57  ;;  %vm3850_vm4 = vcmp.ge.f32.partialorder %v7362_v46, 0.0  ;;  %v4128_v31 = vmul.f32 1.442695, %v4109_v44 }
 0x8c1   : > { %6366 = vrcp.f32 %v3923_v33  ;;  %v3909_v24 = vmul.f32 0.3275911, %v7417_v12  ;;  %vm3852_vm5 = vcmp.ge.f32.partialorder %v7364_v2, 0.0  ;;  %vm3851_vm6 = vcmp.ge.f32.partialorder %v7367_v8, 0.0 }
 0x8c2   : > { %6368 = vpow2.f32 %v4122_v47  ;;  %v4114_v0 = vmul.f32 %v4098_v45, %v3890_v25  ;;  %v4116_v51 = vmul.f32 %v4100_v28, %v3892_v57  ;;  %vm3858_vm7 = vcmp.ge.f32.partialorder %v7379_v22, 0.0 }
 0x8c3   : > { %6370 = vpow2.f32 %v4126_v9  ;;  %v3925_v32 = vadd.f32 1.0, %v3909_v24  ;;  %vm3860_vm8 = vcmp.ge.f32.partialorder %v7387_v27, 0.0  ;;  %vm3853_vm9 = vcmp.ge.f32.partialorder %v7373_v43, 0.0 }
 0x8c4   : > { %v7399_v39 = vpop.eup %6354  ;;  %6372 = vpow2.f32 %v4124_v13  ;;  %v4138_v13 = vmul.f32 1.442695, %v4114_v0  ;;  %v3826_v22 = vmul.f32 0.5, %v7376_v19  ;;  %vm3859_vm10 = vcmp.ge.f32.partialorder %v7391_v21, 0.0 }
 0x8c5   : > { %v7402_v49 = vpop.eup %6356  ;;  %v3946_v50 = vmul.f32 1.0614054, %v7399_v39  ;;  %6374 = vrcp.f32 %v3925_v32  ;;  %vm3861_vm11 = vcmp.ge.f32.partialorder %v7412_v59, 0.0 }
 0x8c6   : > { %v3948_v7 = vmul.f32 1.0614054, %v7402_v49  ;;  %v7414_v10 = vpop.eup %6358  ;;  %6376 = vpow2.f32 %v4128_v31 }
 0x8c7   : > { %v3962_v63 = vadd.f32 -1.4531521, %v3946_v50  ;;  %v3947_v55 = vmul.f32 1.0614054, %v7414_v10  ;;  %v7421_v15 = vpop.eup %6360  ;;  %6378 = vpow2.f32 %v4138_v13 }
 0x8c8   : > { %v3964_v11 = vadd.f32 -1.4531521, %v3948_v7  ;;  %v3949_v29 = vmul.f32 1.0614054, %v7421_v15  ;;  %v7429_v41 = vpop.eup %6362 }
 0x8c9   : > { %v3978_v53 = vmul.f32 %v7399_v39, %v3962_v63  ;;  %v3963_v26 = vadd.f32 -1.4531521, %v3947_v55  ;;  %v3954_v47 = vmul.f32 1.0614054, %v7429_v41  ;;  %v7436_v9 = vpop.eup %6364 }
 0x8ca   : > { %v3980_v17 = vmul.f32 %v7402_v49, %v3964_v11  ;;  %v3965_v40 = vadd.f32 -1.4531521, %v3949_v29  ;;  %v4099_v11 = vsub.f32 0.0, %v7396_v37  ;;  %v3956_v45 = vmul.f32 1.0614054, %v7436_v9 }
 0x8cb   : > { %v3994_v16 = vadd.f32 1.4214138, %v3978_v53  ;;  %v3979_v36 = vmul.f32 %v7414_v10, %v3963_v26  ;;  %v3970_v53 = vadd.f32 -1.4531521, %v3954_v47  ;;  %v7444_v29 = vpop.eup %6366 }
 0x8cc   : > { %v3996_v30 = vadd.f32 1.4214138, %v3980_v17  ;;  %v3981_v63 = vmul.f32 %v7421_v15, %v3965_v40  ;;  %v4142_v17 = vmul.f32 1.442695, %v4116_v51  ;;  %v3972_v31 = vadd.f32 -1.4531521, %v3956_v45 }
 0x8cd   : > { %v4010_v35 = vmul.f32 %v7399_v39, %v3994_v16  ;;  %v3995_v7 = vadd.f32 1.4214138, %v3979_v36  ;;  %v3986_v26 = vmul.f32 %v7429_v41, %v3970_v53  ;;  %v4115_v32 = vmul.f32 %v4099_v11, %v7396_v37  ;;  %v6369_v36 = vpop.eup %6368 }
 0x8ce   : > { %v4012_v50 = vmul.f32 %v7402_v49, %v3996_v30  ;;  %v3997_v57 = vadd.f32 1.4214138, %v3981_v63  ;;  %v3988_v47 = vmul.f32 %v7436_v9, %v3972_v31  ;;  %v3955_v37 = vmul.f32 1.0614054, %v7444_v29 }
 0x8cf   : > { %v4026_v1 = vadd.f32 -0.28449672, %v4010_v35  ;;  %v4011_v25 = vmul.f32 %v7414_v10, %v3995_v7  ;;  %v4101_v35 = vsub.f32 0.0, %v7417_v12  ;;  %v4002_v51 = vadd.f32 1.4214138, %v3986_v26 }
 0x8d0   : > { %v4028_v33 = vadd.f32 -0.28449672, %v4012_v50  ;;  %v4013_v16 = vmul.f32 %v7421_v15, %v3997_v57  ;;  %v6719_v7 = vmov -1.0   ;;  %v4004_v53 = vadd.f32 1.4214138, %v3988_v47 }
 0x8d1   : > { %v4042_v44 = vmul.f32 %v7399_v39, %v4026_v1  ;;  %v4027_v24 = vadd.f32 -0.28449672, %v4011_v25  ;;  %v6371_v1 = vpop.eup %6370  ;;  %v3866_v63 = vsel %vm3850_vm4, 1.0, %v6719_v7  ;;  %v4018_v25 = vmul.f32 %v7429_v41, %v4002_v51 }
 0x8d2   : > { %v4044_v55 = vmul.f32 %v7402_v49, %v4028_v33  ;;  %v4029_v0 = vadd.f32 -0.28449672, %v4013_v16  ;;  %v6373_v33 = vpop.eup %6372  ;;  %v3868_v46 = vsel %vm3852_vm5, 1.0, %v6719_v7  ;;  %6380 = vpow2.f32 %v4142_v17 }
 0x8d3   : > { %v4058_v28 = vadd.f32 0.2548296, %v4042_v44  ;;  %v4043_v50 = vmul.f32 %v7414_v10, %v4027_v24  ;;  %v7458_v57 = vpop.eup %6374  ;;  %v4034_v45 = vadd.f32 -0.28449672, %v4018_v25  ;;  %v4117_v24 = vmul.f32 %v4101_v35, %v7417_v12 }
 0x8d4   : > { %v4060_v30 = vadd.f32 0.2548296, %v4044_v55  ;;  %v3971_v55 = vadd.f32 -1.4531521, %v3955_v37  ;;  %v4020_v16 = vmul.f32 %v7436_v9, %v4004_v53  ;;  %v7473_v12 = vrot.slane %v7346_v48, %v730_v4 }
 0x8d5   : > { %v4074_v40 = vmul.f32 %v7399_v39, %v4058_v28  ;;  %v4059_v44 = vadd.f32 0.2548296, %v4043_v50  ;;  %v4045_v39 = vmul.f32 %v7421_v15, %v4029_v0  ;;  %v4140_v28 = vmul.f32 1.442695, %v4115_v32 }
 0x8d6   : > { %v4076_v11 = vmul.f32 %v7402_v49, %v4060_v30  ;;  %v6377_v49 = vpop.eup %6376  ;;  %v3987_v26 = vmul.f32 %v7444_v29, %v3971_v55  ;;  %v3957_v30 = vmul.f32 1.0614054, %v7458_v57  ;;  %v4050_v17 = vmul.f32 %v7429_v41, %v4034_v45 }
 0x8d7   : > { %v4154_v13 = vmul.f32 %v6369_v36, %v4074_v40  ;;  %v4075_v2 = vmul.f32 %v7414_v10, %v4059_v44  ;;  %v4061_v50 = vadd.f32 0.2548296, %v4045_v39  ;;  %v4036_v36 = vadd.f32 -0.28449672, %v4020_v16  ;;  %v6379_v4 = vpop.eup %6378 }
 0x8d8   : > { %v4156_v31 = vmul.f32 %v6371_v1, %v4076_v11  ;;  %v4003_v40 = vadd.f32 1.4214138, %v3987_v26  ;;  %v3973_v32 = vadd.f32 -1.4531521, %v3957_v30  ;;  %v4066_v0 = vadd.f32 0.2548296, %v4050_v17 }
 0x8d9   : > { %v4170_v35 = vsub.f32 1.0, %v4154_v13  ;;  %6382 = vpow2.f32 %v4140_v28  ;;  %v4144_v51 = vmul.f32 1.442695, %v4117_v24  ;;  %v4052_v1 = vmul.f32 %v7436_v9, %v4036_v36 }
 0x8da   : > { %v4019_v10 = vmul.f32 %v7444_v29, %v4003_v40  ;;  %v3989_v47 = vmul.f32 %v7458_v57, %v3973_v32  ;;  %v4172_v37 = vsub.f32 1.0, %v4156_v31  ;;  %v4155_v11 = vmul.f32 %v6373_v33, %v4075_v2 }
 0x8db   : > { %v4077_v44 = vmul.f32 %v7421_v15, %v4061_v50  ;;  %v4082_v39 = vmul.f32 %v7429_v41, %v4066_v0  ;;  %v4068_v25 = vadd.f32 0.2548296, %v4052_v1  ;;  %v7484_v13 = vrot.slane %v7346_v48, %v2992_v38 }
 0x8dc   : > { %v4035_v53 = vadd.f32 -0.28449672, %v4019_v10  ;;  %v4005_v55 = vadd.f32 1.4214138, %v3989_v47  ;;  %v4186_v45 = vmul.f32 %v4170_v35, %v3866_v63  ;;  %v3867_v28 = vsel %vm3851_vm6, 1.0, %v6719_v7  ;;  %v6381_v33 = vpop.eup %6380 }
 0x8dd   : > { %v4162_v24 = vmul.f32 %v6379_v4, %v4082_v39  ;;  %6384 = vpow2.f32 %v4144_v51  ;;  %v3874_v15 = vsel %vm3858_vm7, 1.0, %v6719_v7  ;;  %v4084_v41 = vmul.f32 %v7436_v9, %v4068_v25 }
 0x8de   : > { %v4051_v16 = vmul.f32 %v7444_v29, %v4035_v53  ;;  %v4021_v26 = vmul.f32 %v7458_v57, %v4005_v55  ;;  %v4171_v38 = vsub.f32 1.0, %v4155_v11  ;;  %v4157_v30 = vmul.f32 %v6377_v49, %v4077_v44 }
 0x8df   : > { %v4178_v63 = vsub.f32 1.0, %v4162_v24  ;;  %v4188_v8 = vmul.f32 %v4172_v37, %v3868_v46  ;;  %v4164_v31 = vmul.f32 %v6381_v33, %v4084_v41  ;;  %v4202_v17 = vadd.f32 1.0, %v4186_v45 }
 0x8e0   : > { %v4067_v2 = vadd.f32 0.2548296, %v4051_v16  ;;  %v4037_v50 = vadd.f32 -0.28449672, %v4021_v26  ;;  %v3876_v9 = vsel %vm3860_vm8, 1.0, %v6719_v7  ;;  %v4187_v0 = vmul.f32 %v4171_v38, %v3867_v28 }
 0x8e1   : > { %v4194_v36 = vmul.f32 %v4178_v63, %v3874_v15  ;;  %v4180_v40 = vsub.f32 1.0, %v4164_v31  ;;  %v4173_v27 = vsub.f32 1.0, %v4157_v30  ;;  %v4204_v51 = vadd.f32 1.0, %v4188_v8 }
 0x8e2   : > { %v4083_v32 = vmul.f32 %v7444_v29, %v4067_v2  ;;  %v4053_v49 = vmul.f32 %v7458_v57, %v4037_v50  ;;  %v4218_v19 = vmul.f32 %v4202_v17, %v7406_v52  ;;  %v3869_v37 = vsel %vm3853_vm9, 1.0, %v6719_v7  ;;  %v6186_v17 = vld [vmem:[#allocation13 + $0x100] ss:$8 sps:$4 sm:$0xff]  }
 0x8e3   : > { %v6383_v35 = vpop.eup %6382  ;;  %v4210_v46 = vadd.f32 1.0, %v4194_v36  ;;  %v4196_v1 = vmul.f32 %v4180_v40, %v3876_v9  ;;  %v3828_v29 = vmul.f32 0.5, %v7381_v54  ;;  %v3875_v39 = vsel %vm3859_vm10, 1.0, %v6719_v7 }
 0x8e4   : > { %v4163_v10 = vmul.f32 %v6383_v35, %v4083_v32  ;;  %v4069_v47 = vadd.f32 0.2548296, %v4053_v49  ;;  %v4203_v53 = vadd.f32 1.0, %v4187_v0  ;;  %v4189_v55 = vmul.f32 %v4173_v27, %v3869_v37  ;;  %v6191_v35 = vld [vmem:[#allocation13 + $0x114] ss:$8 sps:$4 sm:$0xff]  }
 0x8e5   : > { %v4226_v11 = vmul.f32 %v4210_v46, %v3826_v22  ;;  %v4212_v44 = vadd.f32 1.0, %v4196_v1  ;;  %v7511_v52 = vmul.f32 %v4204_v51, %v7408_v3  ;;  %v3819_v54 = vmul.f32 0.5, %v7358_v56 }
 0x8e6   : > { %v4179_v4 = vsub.f32 1.0, %v4163_v10  ;;  %v4085_v25 = vmul.f32 %v7458_v57, %v4069_v47  ;;  %v7519_v33 = vrot.slane %v7346_v48, %v734_v5  ;;  %v3827_v15 = vmul.f32 0.5, %v7383_v6  ;;  %v6189_v47 = vld [vmem:[#allocation13 + $0x110] ss:$8 sps:$4 sm:$0xff]  }
 0x8e7   : > { %v6385_v21 = vpop.eup %6384  ;;  %v4234_v45 = vpack.c.bf16 %v4226_v11, %v4218_v19  ;;  %v7513_v43 = vmul.f32 %v4212_v44, %v3828_v29  ;;  %v4219_v3 = vmul.f32 %v4203_v53, %v3819_v54  ;;  %v4205_v16 = vadd.f32 1.0, %v4189_v55  ;;  %v6194_v11 = vld [vmem:[#allocation13 + $0x124] ss:$8 sps:$4 sm:$0xff]   ;;  %v6192_v53 = vld [vmem:[#allocation13 + $0x120] ss:$8 sps:$4 sm:$0xff]  }
 0x8e8   : > { %v4195_v28 = vmul.f32 %v4179_v4, %v3875_v39  ;;  %v4165_v24 = vmul.f32 %v6385_v21, %v4085_v25  ;;  %v3877_v26 = vsel %vm3861_vm11, 1.0, %v6719_v7  ;;  %v7528_v56 = vrot.slane %v7346_v48, %v2996_v42 }
 0x8e9   : > { %v4236_v57 = vpack.c.bf16 %v7513_v43, %v7511_v52  ;;  %v3821_v50 = vmul.f32 0.5, %v7360_v58  ;;  %v3829_v48 = vmul.f32 0.5, %v7393_v34  ;;  %v6245_v52 = vld [vmem:[#allocation13 + $0x234] ss:$8 sps:$4 sm:$0xff]  }
 0x8ea   : > { %v4211_v59 = vadd.f32 1.0, %v4195_v28  ;;  %v4181_v41 = vsub.f32 1.0, %v4165_v24  ;;  %v6197_v28 = vld [vmem:[#allocation13 + $0x134] ss:$8 sps:$4 sm:$0xff]  }
 0x8eb   : > { %v4221_v27 = vmul.f32 %v4205_v16, %v3821_v50  ;;  %v6200_v16 = vld [vmem:[#allocation13 + $0x144] ss:$8 sps:$4 sm:$0xff]  }
 0x8ec   : > { %v4227_v5 = vmul.f32 %v4211_v59, %v3827_v15  ;;  %v4197_v63 = vmul.f32 %v4181_v41, %v3877_v26  ;;  %v6195_v59 = vld [vmem:[#allocation13 + $0x130] ss:$8 sps:$4 sm:$0xff]  }
 0x8ee   : > { %v4213_v42 = vadd.f32 1.0, %v4197_v63  ;;  %v4235_v9 = vpack.c.bf16 %v4227_v5, %v4219_v3 }
 0x8ef   : > { %v3766_v38 = vpop.f32.mrb[12].mxu0  ;;  %v3809_v30 = vpop.f32.mrb[28].mxu1 }
 0x8f0   : > { %v7531_v8 = vadd.f32 %v3766_v38, %v7473_v12  ;;  %v7534_v6 = vadd.f32 %v3809_v30, %v7484_v13  ;;  %v3768_v31 = vpop.f32.mrb[13].mxu0  ;;  %v3811_v2 = vpop.f32.mrb[29].mxu1  ;;  %v4229_v46 = vmul.f32 %v4213_v42, %v3829_v48  ;;  %5054 = vmatprep.mubr.bf16.mxu0 %v4235_v9 }
 0x8f1   : > { %v7538_v22 = vadd.f32 %v3768_v31, %v7519_v33  ;;  %v3770_v60 = vpop.f32.mrb[14].mxu0  ;;  %v3813_v36 = vpop.f32.mrb[30].mxu1  ;;  %v7554_v51 = vadd.f32 %v3811_v2, %v7528_v56  ;;  %5055 = vmatmul.mubr.bf16.vlgmr.msra.gmra.mrb[16].mxu0 %v4234_v45 }
 0x8f2   : > { %v7542_v40 = vmul.f32 0.70710677, %v7531_v8  ;;  %v3772_v32 = vpop.f32.mrb[15].mxu0  ;;  %v7544_v49 = vpop.f32.mrb[31].mxu1  ;;  %v7547_v0 = vmul.f32 0.70710677, %v7534_v6  ;;  %5066 = vmatpush1.bf16.msra.mxu0 %v6186_v17  ;;  %v4237_v10 = vpack.c.bf16 %v4229_v46, %v4221_v27  ;;  %v7568_v21 = vadd.f32 %v3770_v60, %v7473_v12 }
 0x8f3   : > { %v7550_v58 = vmul.f32 0.70710677, %v7538_v22  ;;  %5067 = vmatprep.subr.bf16.mxu0 %v6191_v35  ;;  %v7564_v39 = vmul.f32 0.70710677, %v7554_v51  ;;  %v7578_v12 = vadd.f32 %v3813_v36, %v7484_v13  ;;  %v7584_v3 = vadd.f32 %v3772_v32, %v7519_v33  ;;  %v6198_v13 = vld [vmem:[#allocation13 + $0x140] ss:$8 sps:$4 sm:$0xff]  }
 0x8f4   : > { %v3886_v34 = vand.u32 2147483647, %v7542_v40  ;;  %v7557_v1 = vand.u32 2147483647, %v7547_v0  ;;  %5097 = vmatprep.mubr.bf16.mxu0 %v4237_v10  ;;  %v7575_v54 = vmul.f32 0.70710677, %v7568_v21  ;;  %v7608_v9 = vadd.f32 %v7544_v49, %v7528_v56 }
 0x8f5   : > { %v7561_v29 = vand.u32 2147483647, %v7550_v58  ;;  %v7571_v55 = vand.u32 2147483647, %v7564_v39  ;;  %v7588_v30 = vmul.f32 0.70710677, %v7578_v12 }
 0x8f6   : > { %v3902_v19 = vmul.f32 0.3275911, %v3886_v34  ;;  %v3904_v37 = vmul.f32 0.3275911, %v7557_v1  ;;  %5068 = vmatpush1.bf16.msra.mxu0 %v6189_v47  ;;  %v7581_v41 = vand.u32 2147483647, %v7575_v54 }
 0x8f7   : > { %v3903_v25 = vmul.f32 0.3275911, %v7561_v29  ;;  %5069 = vmatprep.subr.bf16.mxu0 %v6194_v11  ;;  %v3905_v24 = vmul.f32 0.3275911, %v7571_v55  ;;  %v4094_v26 = vsub.f32 0.0, %v3886_v34  ;;  %v4096_v17 = vsub.f32 0.0, %v7557_v1 }
 0x8f8   : > { %v3918_v44 = vadd.f32 1.0, %v3902_v19  ;;  %v3920_v4 = vadd.f32 1.0, %v3904_v37  ;;  %v3910_v38 = vmul.f32 0.3275911, %v7581_v41  ;;  %v7591_v5 = vmul.f32 0.70710677, %v7584_v3 }
 0x8f9   : > { %v3919_v45 = vadd.f32 1.0, %v3903_v25  ;;  %v3921_v15 = vadd.f32 1.0, %v3905_v24  ;;  %v7594_v31 = vand.u32 2147483647, %v7588_v30  ;;  %v6203_v33 = vld [vmem:[#allocation13 + $0x154] ss:$8 sps:$4 sm:$0xff]   ;;  %v4110_v50 = vmul.f32 %v4094_v26, %v3886_v34 }
 0x8fa   : > { %6386 = vrcp.f32 %v3918_v44  ;;  %5070 = vmatpush1.bf16.msra.mxu0 %v6192_v53  ;;  %v3926_v63 = vadd.f32 1.0, %v3910_v38  ;;  %v7600_v60 = vand.u32 2147483647, %v7591_v5  ;;  %v6201_v32 = vld [vmem:[#allocation13 + $0x150] ss:$8 sps:$4 sm:$0xff]   ;;  %v4095_v27 = vsub.f32 0.0, %v7561_v29 }
 0x8fb   : > { %6388 = vrcp.f32 %v3920_v4  ;;  %5071 = vmatprep.subr.bf16.mxu0 %v6197_v28  ;;  %v3912_v42 = vmul.f32 0.3275911, %v7594_v31  ;;  %v6206_v47 = vld [vmem:[#allocation13 + $0x164] ss:$8 sps:$4 sm:$0xff]   ;;  %v4130_v37 = vmul.f32 1.442695, %v4110_v50  ;;  %v4112_v44 = vmul.f32 %v4096_v17, %v7557_v1 }
 0x8fc   : > { %6390 = vrcp.f32 %v3919_v45  ;;  %v3911_v46 = vmul.f32 0.3275911, %v7600_v60  ;;  %v7619_v25 = vmul.f32 0.70710677, %v7608_v9  ;;  %v4111_v28 = vmul.f32 %v4095_v27, %v7561_v29  ;;  %v6204_v1 = vld [vmem:[#allocation13 + $0x160] ss:$8 sps:$4 sm:$0xff]  }
 0x8fd   : > { %6392 = vrcp.f32 %v3921_v15  ;;  %v3928_v10 = vadd.f32 1.0, %v3912_v42  ;;  %v4102_v24 = vsub.f32 0.0, %v7581_v41  ;;  %v6209_v15 = vld [vmem:[#allocation13 + $0x174] ss:$8 sps:$4 sm:$0xff]   ;;  %v6207_v17 = vld [vmem:[#allocation13 + $0x170] ss:$8 sps:$4 sm:$0xff]  }
 0x8fe   : > { %5072 = vmatpush1.bf16.msra.mxu0 %v6195_v59  ;;  %6394 = vrcp.f32 %v3926_v63  ;;  %v3927_v56 = vadd.f32 1.0, %v3911_v46  ;;  %v7630_v29 = vand.u32 2147483647, %v7619_v25  ;;  %vm3854_vm12 = vcmp.ge.f32.partialorder %v7542_v40, 0.0  ;;  %v6212_v27 = vld [vmem:[#allocation13 + $0x184] ss:$8 sps:$4 sm:$0xff]  }
 0x8ff   : > { %5073 = vmatprep.subr.bf16.mxu0 %v6200_v16  ;;  %6396 = vrcp.f32 %v3928_v10  ;;  %v4132_v42 = vmul.f32 1.442695, %v4111_v28  ;;  %v6221_v40 = vld [vmem:[#allocation13 + $0x1b4] ss:$8 sps:$4 sm:$0xff]   ;;  %vm3856_vm13 = vcmp.ge.f32.partialorder %v7547_v0, 0.0  ;;  %vm3855_vm14 = vcmp.ge.f32.partialorder %v7550_v58, 0.0 }
 0x900   : > { %6398 = vrcp.f32 %v3927_v56  ;;  %vm3862_vm15 = vcmp.ge.f32.partialorder %v7575_v54, 0.0  ;;  %v3871_v0 = vsel %vm3855_vm14, 1.0, %v6719_v7  ;;  %vm3864_vm0 = vcmp.ge.f32.partialorder %v7588_v30, 0.0  ;;  %v6228_v30 = vld [vmem:[#allocation13 + $0x1e0] ss:$8 sps:$4 sm:$0xff]  }
 0x901   : > { %6400 = vpow2.f32 %v4130_v37  ;;  %v3913_v37 = vmul.f32 0.3275911, %v7630_v29  ;;  %vm3863_vm1 = vcmp.ge.f32.partialorder %v7591_v5, 0.0  ;;  %vm3857_vm2 = vcmp.ge.f32.partialorder %v7564_v39, 0.0  ;;  %v6237_v39 = vld [vmem:[#allocation13 + $0x210] ss:$8 sps:$4 sm:$0xff]  }
 0x902   : > { %5074 = vmatpush1.bf16.msra.mxu0 %v6198_v13  ;;  %v4134_v13 = vmul.f32 1.442695, %v4112_v44  ;;  %v4097_v44 = vsub.f32 0.0, %v7571_v55  ;;  %vm3865_vm3 = vcmp.ge.f32.partialorder %v7619_v25, 0.0  ;;  %v3825_v25 = vmul.f32 0.5, %v7554_v51 }
 0x903   : > { %5075 = vmatprep.subr.bf16.mxu0 %v6203_v33  ;;  %v3929_v28 = vadd.f32 1.0, %v3913_v37  ;;  %v6246_v51 = vld [vmem:[#allocation13 + $0x240] ss:$8 sps:$4 sm:$0xff]  }
 0x904   : > { %v7596_v2 = vpop.eup %6386  ;;  %6402 = vpow2.f32 %v4134_v13  ;;  %v4113_v37 = vmul.f32 %v4097_v44, %v7571_v55  ;;  %v3870_v55 = vsel %vm3854_vm12, 1.0, %v6719_v7 }
 0x905   : > { %v7602_v36 = vpop.eup %6388  ;;  %v3950_v48 = vmul.f32 1.0614054, %v7596_v2  ;;  %6404 = vrcp.f32 %v3929_v28 }
 0x906   : > { %v3952_v35 = vmul.f32 1.0614054, %v7602_v36  ;;  %v7613_v19 = vpop.eup %6390  ;;  %5076 = vmatpush1.bf16.msra.mxu0 %v6201_v32  ;;  %v4118_v32 = vmul.f32 %v4102_v24, %v7581_v41  ;;  %v4103_v41 = vsub.f32 0.0, %v7600_v60  ;;  %6406 = vpow2.f32 %v4132_v42 }
 0x907   : > { %v3966_v34 = vadd.f32 -1.4531521, %v3950_v48  ;;  %v3951_v4 = vmul.f32 1.0614054, %v7613_v19  ;;  %v7621_v53 = vpop.eup %6392  ;;  %5077 = vmatprep.subr.bf16.mxu0 %v6206_v47 }
 0x908   : > { %v3968_v11 = vadd.f32 -1.4531521, %v3952_v35  ;;  %v3953_v26 = vmul.f32 1.0614054, %v7621_v53  ;;  %v4104_v35 = vsub.f32 0.0, %v7594_v31  ;;  %v7636_v46 = vpop.eup %6394 }
 0x909   : > { %v3982_v49 = vmul.f32 %v7596_v2, %v3966_v34  ;;  %v3967_v16 = vadd.f32 -1.4531521, %v3951_v4  ;;  %v3958_v56 = vmul.f32 1.0614054, %v7636_v46 }
 0x90a   : > { %v3984_v45 = vmul.f32 %v7602_v36, %v3968_v11  ;;  %v3969_v50 = vadd.f32 -1.4531521, %v3953_v26  ;;  %5078 = vmatpush1.bf16.msra.mxu0 %v6204_v1 }
 0x90b   : > { %v3998_v59 = vadd.f32 1.4214138, %v3982_v49  ;;  %v3983_v33 = vmul.f32 %v7613_v19, %v3967_v16  ;;  %5079 = vmatprep.subr.bf16.mxu0 %v6209_v15  ;;  %v3974_v1 = vadd.f32 -1.4531521, %v3958_v56  ;;  %v6210_v15 = vld [vmem:[#allocation13 + $0x180] ss:$8 sps:$4 sm:$0xff]   ;;  %v7646_v16 = vpop.eup %6396 }
 0x90c   : > { %v4000_v38 = vadd.f32 1.4214138, %v3984_v45  ;;  %v3985_v47 = vmul.f32 %v7621_v53, %v3969_v50  ;;  %v7649_v50 = vpop.eup %6398  ;;  %v3960_v13 = vmul.f32 1.0614054, %v7646_v16  ;;  %v6218_v56 = vld [vmem:[#allocation13 + $0x1a4] ss:$8 sps:$4 sm:$0xff]  }
 0x90d   : > { %v4014_v63 = vmul.f32 %v7596_v2, %v3998_v59  ;;  %v3999_v10 = vadd.f32 1.4214138, %v3983_v33  ;;  %v4146_v59 = vmul.f32 1.442695, %v4118_v32  ;;  %v6215_v33 = vld [vmem:[#allocation13 + $0x194] ss:$8 sps:$4 sm:$0xff]   ;;  %v4119_v32 = vmul.f32 %v4103_v41, %v7600_v60 }
 0x90e   : > { %v4016_v48 = vmul.f32 %v7602_v36, %v4000_v38  ;;  %v4001_v45 = vadd.f32 1.4214138, %v3985_v47  ;;  %5080 = vmatpush1.bf16.msra.mxu0 %v6207_v17  ;;  %v3959_v47 = vmul.f32 1.0614054, %v7649_v50 }
 0x90f   : > { %v4030_v34 = vadd.f32 -0.28449672, %v4014_v63  ;;  %v4015_v4 = vmul.f32 %v7613_v19, %v3999_v10  ;;  %v4120_v63 = vmul.f32 %v4104_v35, %v7594_v31  ;;  %5081 = vmatprep.subr.bf16.mxu0 %v6212_v27  ;;  %v6213_v31 = vld [vmem:[#allocation13 + $0x190] ss:$8 sps:$4 sm:$0xff]   ;;  %v6401_v35 = vpop.eup %6400  ;;  %6408 = vpow2.f32 %v4146_v59  ;;  %v6216_v59 = vld [vmem:[#allocation13 + $0x1a0] ss:$8 sps:$4 sm:$0xff]  }
 0x910   : > { %v4032_v11 = vadd.f32 -0.28449672, %v4016_v48  ;;  %v3990_v48 = vmul.f32 %v7636_v46, %v3974_v1  ;;  %v4017_v10 = vmul.f32 %v7621_v53, %v4001_v45  ;;  %v3975_v41 = vadd.f32 -1.4531521, %v3959_v47  ;;  %v6219_v47 = vld [vmem:[#allocation13 + $0x1b0] ss:$8 sps:$4 sm:$0xff]  }
 0x911   : > { %v4046_v49 = vmul.f32 %v7596_v2, %v4030_v34  ;;  %v4031_v38 = vadd.f32 -0.28449672, %v4015_v4  ;;  %v4150_v60 = vmul.f32 1.442695, %v4120_v63  ;;  %v7660_v4 = vmul.f32 0.5, %v7531_v8 }
 0x912   : > { %v4048_v24 = vmul.f32 %v7602_v36, %v4032_v11  ;;  %v4006_v42 = vadd.f32 1.4214138, %v3990_v48  ;;  %v3976_v11 = vadd.f32 -1.4531521, %v3960_v13  ;;  %5082 = vmatpush1.bf16.msra.mxu0 %v6210_v15  ;;  %v4033_v44 = vadd.f32 -0.28449672, %v4017_v10  ;;  %v6403_v13 = vpop.eup %6402 }
 0x913   : > { %v4062_v26 = vadd.f32 0.2548296, %v4046_v49  ;;  %v4047_v34 = vmul.f32 %v7613_v19, %v4031_v38  ;;  %5083 = vmatprep.subr.bf16.mxu0 %v6215_v33  ;;  %v3991_v1 = vmul.f32 %v7649_v50, %v3975_v41  ;;  %6410 = vpow2.f32 %v4150_v60  ;;  %v6224_v60 = vld [vmem:[#allocation13 + $0x1c4] ss:$8 sps:$4 sm:$0xff]  }
 0x914   : > { %v4064_v17 = vadd.f32 0.2548296, %v4048_v24  ;;  %v4022_v45 = vmul.f32 %v7636_v46, %v4006_v42  ;;  %v3992_v28 = vmul.f32 %v7646_v16, %v3976_v11  ;;  %v4148_v24 = vmul.f32 1.442695, %v4119_v32 }
 0x915   : > { %v4078_v27 = vmul.f32 %v7596_v2, %v4062_v26  ;;  %v4063_v49 = vadd.f32 0.2548296, %v4047_v34  ;;  %v4136_v26 = vmul.f32 1.442695, %v4113_v37  ;;  %v4007_v33 = vadd.f32 1.4214138, %v3991_v1 }
 0x916   : > { %v4080_v2 = vmul.f32 %v7602_v36, %v4064_v17  ;;  %v4038_v38 = vadd.f32 -0.28449672, %v4022_v45  ;;  %v4008_v8 = vadd.f32 1.4214138, %v3992_v28  ;;  %5084 = vmatpush1.bf16.msra.mxu0 %v6213_v31  ;;  %v4105_v48 = vsub.f32 0.0, %v7630_v29  ;;  %v7674_v17 = vpop.eup %6404 }
 0x917   : > { %v4158_v15 = vmul.f32 %v6401_v35, %v4078_v27  ;;  %v4079_v63 = vmul.f32 %v7613_v19, %v4063_v49  ;;  %5085 = vmatprep.subr.bf16.mxu0 %v6218_v56  ;;  %6412 = vpow2.f32 %v4148_v24  ;;  %v4049_v19 = vmul.f32 %v7621_v53, %v4033_v44  ;;  %v6407_v31 = vpop.eup %6406 }
 0x918   : > { %v4054_v36 = vmul.f32 %v7636_v46, %v4038_v38  ;;  %v4024_v32 = vmul.f32 %v7646_v16, %v4008_v8  ;;  %v4160_v34 = vmul.f32 %v6403_v13, %v4080_v2  ;;  %v4023_v10 = vmul.f32 %v7649_v50, %v4007_v33 }
 0x919   : > { %v4174_v35 = vsub.f32 1.0, %v4158_v15  ;;  %6414 = vpow2.f32 %v4136_v26  ;;  %v3872_v42 = vsel %vm3856_vm13, 1.0, %v6719_v7  ;;  %v4159_v11 = vmul.f32 %v6407_v31, %v4079_v63  ;;  %v6409_v24 = vpop.eup %6408 }
 0x91a   : > { %v4070_v27 = vadd.f32 0.2548296, %v4054_v36  ;;  %v4040_v37 = vadd.f32 -0.28449672, %v4024_v32  ;;  %5086 = vmatpush1.bf16.msra.mxu0 %v6216_v59  ;;  %v4039_v56 = vadd.f32 -0.28449672, %v4023_v10  ;;  %v4121_v49 = vmul.f32 %v4105_v48, %v7630_v29 }
 0x91b   : > { %5087 = vmatprep.subr.bf16.mxu0 %v6221_v40  ;;  %v3961_v28 = vmul.f32 1.0614054, %v7674_v17  ;;  %v4176_v2 = vsub.f32 1.0, %v4160_v34  ;;  %v4065_v44 = vadd.f32 0.2548296, %v4049_v19  ;;  %v4190_v59 = vmul.f32 %v4174_v35, %v3870_v55 }
 0x91c   : > { %v4086_v41 = vmul.f32 %v7636_v46, %v4070_v27  ;;  %v4056_v45 = vmul.f32 %v7646_v16, %v4040_v37  ;;  %v4055_v1 = vmul.f32 %v7649_v50, %v4039_v56  ;;  %v6222_v29 = vld [vmem:[#allocation13 + $0x1c0] ss:$8 sps:$4 sm:$0xff]   ;;  %v6227_v46 = vld [vmem:[#allocation13 + $0x1d4] ss:$8 sps:$4 sm:$0xff]   ;;  %v4175_v8 = vsub.f32 1.0, %v4159_v11 }
 0x91d   : > { %v3977_v38 = vadd.f32 -1.4531521, %v3961_v28  ;;  %v3878_v63 = vsel %vm3862_vm15, 1.0, %v6719_v7  ;;  %v4152_v48 = vmul.f32 1.442695, %v4121_v49  ;;  %v6411_v13 = vpop.eup %6410  ;;  %v4192_v36 = vmul.f32 %v4176_v2, %v3872_v42 }
 0x91e   : > { %v4166_v15 = vmul.f32 %v6409_v24, %v4086_v41  ;;  %v4072_v26 = vadd.f32 0.2548296, %v4056_v45  ;;  %5088 = vmatpush1.bf16.msra.mxu0 %v6219_v47  ;;  %v4071_v33 = vadd.f32 0.2548296, %v4055_v1  ;;  %v4081_v32 = vmul.f32 %v7621_v53, %v4065_v44  ;;  %v6225_v35 = vld [vmem:[#allocation13 + $0x1d0] ss:$8 sps:$4 sm:$0xff]  }
 0x91f   : > { %5089 = vmatprep.subr.bf16.mxu0 %v6224_v60  ;;  %v3993_v55 = vmul.f32 %v7674_v17, %v3977_v38  ;;  %v4206_v19 = vadd.f32 1.0, %v4190_v59  ;;  %v4191_v27 = vmul.f32 %v4175_v8, %v3871_v0  ;;  %6416 = vpow2.f32 %v4152_v48  ;;  %v6230_v42 = vld [vmem:[#allocation13 + $0x1e4] ss:$8 sps:$4 sm:$0xff]   ;;  %v6233_v59 = vld [vmem:[#allocation13 + $0x1f4] ss:$8 sps:$4 sm:$0xff]  }
 0x920   : > { %v4182_v58 = vsub.f32 1.0, %v4166_v15  ;;  %v4088_v40 = vmul.f32 %v7646_v16, %v4072_v26  ;;  %v4087_v34 = vmul.f32 %v7649_v50, %v4071_v33  ;;  %v3830_v16 = vmul.f32 0.5, %v7568_v21 }
 0x921   : > { %v6413_v54 = vpop.eup %6412  ;;  %v4009_v31 = vadd.f32 1.4214138, %v3993_v55  ;;  %v3880_v50 = vsel %vm3864_vm0, 1.0, %v6719_v7  ;;  %v4208_v60 = vadd.f32 1.0, %v4192_v36  ;;  %v3879_v45 = vsel %vm3863_vm1, 1.0, %v6719_v7 }
 0x922   : > { %v4198_v10 = vmul.f32 %v4182_v58, %v3878_v63  ;;  %v4168_v47 = vmul.f32 %v6411_v13, %v4088_v40  ;;  %5090 = vmatpush1.bf16.msra.mxu0 %v6222_v29  ;;  %v4167_v37 = vmul.f32 %v6413_v54, %v4087_v34  ;;  %v7709_v28 = vmul.f32 %v4206_v19, %v7660_v4  ;;  %v6231_v58 = vld [vmem:[#allocation13 + $0x1f0] ss:$8 sps:$4 sm:$0xff]   ;;  %v6236_v55 = vld [vmem:[#allocation13 + $0x204] ss:$8 sps:$4 sm:$0xff]   ;;  %v6234_v19 = vld [vmem:[#allocation13 + $0x200] ss:$8 sps:$4 sm:$0xff]  }
 0x923   : > { %5091 = vmatprep.subr.bf16.mxu0 %v6227_v46  ;;  %v6415_v11 = vpop.eup %6414  ;;  %v4025_v49 = vmul.f32 %v7674_v17, %v4009_v31  ;;  %v3824_v44 = vmul.f32 0.5, %v7534_v6  ;;  %v4207_v1 = vadd.f32 1.0, %v4191_v27  ;;  %v3832_v15 = vmul.f32 0.5, %v7578_v12  ;;  %v6242_v27 = vld [vmem:[#allocation13 + $0x224] ss:$8 sps:$4 sm:$0xff]  }
 0x924   : > { %v4214_v53 = vadd.f32 1.0, %v4198_v10  ;;  %v4184_v56 = vsub.f32 1.0, %v4168_v47  ;;  %v4161_v41 = vmul.f32 %v6415_v11, %v4081_v32  ;;  %v4183_v21 = vsub.f32 1.0, %v4167_v37  ;;  %v6239_v10 = vld [vmem:[#allocation13 + $0x214] ss:$8 sps:$4 sm:$0xff]  }
 0x925   : > { %v4041_v0 = vadd.f32 -0.28449672, %v4025_v49  ;;  %v3823_v38 = vmul.f32 0.5, %v7538_v22  ;;  %v3831_v46 = vmul.f32 0.5, %v7584_v3  ;;  %v7721_v6 = vmul.f32 %v4208_v60, %v3824_v44  ;;  %v6252_v49 = vld [vmem:[#allocation13 + $0x260] ss:$8 sps:$4 sm:$0xff]  }
 0x926   : > { %v7711_v24 = vmul.f32 %v4214_v53, %v3830_v16  ;;  %v4200_v2 = vmul.f32 %v4184_v56, %v3880_v50  ;;  %5092 = vmatpush1.bf16.msra.mxu0 %v6225_v35  ;;  %v4199_v29 = vmul.f32 %v4183_v21, %v3879_v45  ;;  %v4177_v63 = vsub.f32 1.0, %v4161_v41  ;;  %v6248_v53 = vld [vmem:[#allocation13 + $0x244] ss:$8 sps:$4 sm:$0xff]   ;;  %v6249_v50 = vld [vmem:[#allocation13 + $0x250] ss:$8 sps:$4 sm:$0xff]  }
 0x927   : > { %5093 = vmatprep.subr.bf16.mxu0 %v6230_v42  ;;  %v4057_v4 = vmul.f32 %v7674_v17, %v4041_v0  ;;  %v4223_v40 = vmul.f32 %v4207_v1, %v3823_v38  ;;  %v3873_v3 = vsel %vm3857_vm2, 1.0, %v6719_v7  ;;  %v3881_v31 = vsel %vm3865_vm3, 1.0, %v6719_v7  ;;  %v6240_v7 = vld [vmem:[#allocation13 + $0x220] ss:$8 sps:$4 sm:$0xff]   ;;  %v6254_v56 = vld [vmem:[#allocation13 + $0x264] ss:$8 sps:$4 sm:$0xff]  }
 0x928   : > { %v4238_v5 = vpack.c.bf16 %v7711_v24, %v7709_v28  ;;  %v4216_v26 = vadd.f32 1.0, %v4200_v2  ;;  %v4215_v8 = vadd.f32 1.0, %v4199_v29  ;;  %v4193_v34 = vmul.f32 %v4177_v63, %v3873_v3  ;;  %v6257_v60 = vld [vmem:[#allocation13 + $0x274] ss:$8 sps:$4 sm:$0xff]   ;;  %v6255_v41 = vld [vmem:[#allocation13 + $0x270] ss:$8 sps:$4 sm:$0xff]  }
 0x929   : > { %v4073_v48 = vadd.f32 0.2548296, %v4057_v4  ;;  %v6417_v36 = vpop.eup %6416  ;;  %v3833_v16 = vmul.f32 0.5, %v7608_v9  ;;  %v6251_v9 = vld [vmem:[#allocation13 + $0x254] ss:$8 sps:$4 sm:$0xff]  }
 0x92a   : > { %v7723_v33 = vmul.f32 %v4216_v26, %v3832_v15  ;;  %5094 = vmatpush1.bf16.msra.mxu0 %v6228_v30  ;;  %v4231_v12 = vmul.f32 %v4215_v8, %v3831_v46  ;;  %v6260_v45 = vld [vmem:[#allocation13 + $0x284] ss:$8 sps:$4 sm:$0xff]   ;;  %v6258_v21 = vld [vmem:[#allocation13 + $0x280] ss:$8 sps:$4 sm:$0xff]   ;;  %v6263_v2 = vld [vmem:[#allocation13 + $0x294] ss:$8 sps:$4 sm:$0xff]  }
 0x92b   : > { %5095 = vmatprep.subr.bf16.mxu0 %v6233_v59  ;;  %v4089_v13 = vmul.f32 %v7674_v17, %v4073_v48  ;;  %v4209_v17 = vadd.f32 1.0, %v4193_v34  ;;  %v6261_v0 = vld [vmem:[#allocation13 + $0x290] ss:$8 sps:$4 sm:$0xff]   ;;  %v6266_v30 = vld [vmem:[#allocation13 + $0x2a4] ss:$8 sps:$4 sm:$0xff]  }
 0x92c   : > { %v4240_v22 = vpack.c.bf16 %v7723_v33, %v7721_v6  ;;  %v4239_v32 = vpack.c.bf16 %v4231_v12, %v4223_v40  ;;  %v6264_v44 = vld [vmem:[#allocation13 + $0x2a0] ss:$8 sps:$4 sm:$0xff]   ;;  %v6269_v1 = vld [vmem:[#allocation13 + $0x2b4] ss:$8 sps:$4 sm:$0xff]   ;;  %v6267_v29 = vld [vmem:[#allocation13 + $0x2b0] ss:$8 sps:$4 sm:$0xff]  }
 0x92d   : > { %v4169_v54 = vmul.f32 %v6417_v36, %v4089_v13  ;;  %v7738_v42 = vmul.f32 %v4209_v17, %v3825_v25  ;;  %v6272_v59 = vld [vmem:[#allocation13 + $0x2c4] ss:$8 sps:$4 sm:$0xff]   ;;  %v6270_v15 = vld [vmem:[#allocation13 + $0x2c0] ss:$8 sps:$4 sm:$0xff]   ;;  %v6275_v26 = vld [vmem:[#allocation13 + $0x2d4] ss:$8 sps:$4 sm:$0xff]  }
 0x92e   : > { %5096 = vmatpush1.bf16.msra.mxu0 %v6231_v58  ;;  %v6273_v4 = vld [vmem:[#allocation13 + $0x2d0] ss:$8 sps:$4 sm:$0xff]   ;;  %v6278_v38 = vld [vmem:[#allocation13 + $0x2e4] ss:$8 sps:$4 sm:$0xff]   ;;  %v6276_v46 = vld [vmem:[#allocation13 + $0x2e0] ss:$8 sps:$4 sm:$0xff]  }
 0x92f   : > { %5108 = vmatprep.subr.bf16.mxu0 %v6236_v55  ;;  %v4185_v47 = vsub.f32 1.0, %v4169_v54  ;;  %v6281_v8 = vld [vmem:[#allocation13 + $0x2f4] ss:$8 sps:$4 sm:$0xff]   ;;  %v6279_v63 = vld [vmem:[#allocation13 + $0x2f0] ss:$8 sps:$4 sm:$0xff]  }
 0x930   : > { %v6284_v48 = vld [vmem:[#allocation13 + $0x304] ss:$8 sps:$4 sm:$0xff]   ;;  %v6282_v58 = vld [vmem:[#allocation13 + $0x300] ss:$8 sps:$4 sm:$0xff]   ;;  %v6287_v40 = vld [vmem:[#allocation13 + $0x314] ss:$8 sps:$4 sm:$0xff]  }
 0x931   : > { %5098 = vmatmul.mubr.bf16.vlgmr.msra.gmra.mrb[16].mxu0 %v4236_v57  ;;  %v4201_v35 = vmul.f32 %v4185_v47, %v3881_v31  ;;  %v6243_v57 = vld [vmem:[#allocation13 + $0x230] ss:$8 sps:$4 sm:$0xff]   ;;  %v6290_v55 = vld [vmem:[#allocation13 + $0x324] ss:$8 sps:$4 sm:$0xff]   ;;  %v6288_v13 = vld [vmem:[#allocation13 + $0x320] ss:$8 sps:$4 sm:$0xff]  }
 0x932   : > { %5109 = vmatpush1.bf16.msra.mxu0 %v6234_v19  ;;  %5140 = vmatprep.mubr.bf16.mxu0 %v4239_v32  ;;  %v6285_v12 = vld [vmem:[#allocation13 + $0x310] ss:$8 sps:$4 sm:$0xff]   ;;  %v6293_v36 = vld [vmem:[#allocation13 + $0x334] ss:$8 sps:$4 sm:$0xff]   ;;  %v6296_v32 = vld [vmem:[#allocation13 + $0x344] ss:$8 sps:$4 sm:$0xff]  }
 0x933   : > { %5110 = vmatprep.subr.bf16.mxu0 %v6239_v10  ;;  %v4217_v37 = vadd.f32 1.0, %v4201_v35  ;;  %v6291_v3 = vld [vmem:[#allocation13 + $0x330] ss:$8 sps:$4 sm:$0xff]   ;;  %v6294_v34 = vld [vmem:[#allocation13 + $0x340] ss:$8 sps:$4 sm:$0xff]  }
 0x934   : > { %v6299_v54 = vld [vmem:[#allocation13 + $0x354] ss:$8 sps:$4 sm:$0xff]   ;;  %v6297_v28 = vld [vmem:[#allocation13 + $0x350] ss:$8 sps:$4 sm:$0xff]   ;;  %v6302_v24 = vld [vmem:[#allocation13 + $0x364] ss:$8 sps:$4 sm:$0xff]  }
 0x935   : > { %v7740_v11 = vmul.f32 %v4217_v37, %v3833_v16  ;;  %v6305_v19 = vld [vmem:[#allocation13 + $0x374] ss:$8 sps:$4 sm:$0xff]   ;;  %v6303_v10 = vld [vmem:[#allocation13 + $0x370] ss:$8 sps:$4 sm:$0xff]   ;;  %v6308_v47 = vld [vmem:[#allocation13 + $0x384] ss:$8 sps:$4 sm:$0xff]  }
 0x936   : > { %5111 = vmatpush1.bf16.msra.mxu0 %v6237_v39  ;;  %v6306_v31 = vld [vmem:[#allocation13 + $0x380] ss:$8 sps:$4 sm:$0xff]   ;;  %v6311_v17 = vld [vmem:[#allocation13 + $0x394] ss:$8 sps:$4 sm:$0xff]   ;;  %v6309_v35 = vld [vmem:[#allocation13 + $0x390] ss:$8 sps:$4 sm:$0xff]  }
 0x937   : > { %5112 = vmatprep.subr.bf16.mxu0 %v6242_v27  ;;  %v4241_v43 = vpack.c.bf16 %v7740_v11, %v7738_v42  ;;  %v6314_v39 = vld [vmem:[#allocation13 + $0x3a4] ss:$8 sps:$4 sm:$0xff]   ;;  %v6312_v27 = vld [vmem:[#allocation13 + $0x3a0] ss:$8 sps:$4 sm:$0xff]   ;;  %v6317_v25 = vld [vmem:[#allocation13 + $0x3b4] ss:$8 sps:$4 sm:$0xff]  }
 0x938   : > { %v6315_v16 = vld [vmem:[#allocation13 + $0x3b0] ss:$8 sps:$4 sm:$0xff]   ;;  %v6320_v37 = vld [vmem:[#allocation13 + $0x3c4] ss:$8 sps:$4 sm:$0xff]   ;;  %v6318_v42 = vld [vmem:[#allocation13 + $0x3c0] ss:$8 sps:$4 sm:$0xff]  }
 0x939   : > { %v6323_v11 = vld [vmem:[#allocation13 + $0x3d4] ss:$8 sps:$4 sm:$0xff]  }
 0x93a   : > { %5113 = vmatpush1.bf16.msra.mxu0 %v6240_v7  ;;  %v6321_v7 = vld [vmem:[#allocation13 + $0x3d0] ss:$8 sps:$4 sm:$0xff]  }
 0x93b   : > { %5114 = vmatprep.subr.bf16.mxu0 %v6245_v52  ;;  %v6326_v52 = vld [vmem:[#allocation13 + $0x3e4] ss:$8 sps:$4 sm:$0xff]  }
 0x93e   : > { %5115 = vmatpush1.bf16.msra.mxu0 %v6243_v57  ;;  %v6329_v57 = vld [vmem:[#allocation13 + $0x3f4] ss:$8 sps:$4 sm:$0xff]  }
 0x93f   : > { %5116 = vmatprep.subr.bf16.mxu0 %v6248_v53  ;;  %v6327_v53 = vld [vmem:[#allocation13 + $0x3f0] ss:$8 sps:$4 sm:$0xff]  }
 0x942   : > { %5117 = vmatpush1.bf16.msra.mxu0 %v6246_v51  ;;  %v4370_v51 = vld [vmem:[%s7857_s24] sm:$0x3] }
 0x943   : > { %5118 = vmatprep.subr.bf16.mxu0 %v6251_v9  ;;  %v4375_v9 = vrot.slane %v4370_v51, %v7076_v62 }
 0x946   : > { %5119 = vmatpush1.bf16.msra.mxu0 %v6249_v50  ;;  %v4379_v50 = vrot.slane %v4370_v51, %v7073_v61 }
 0x947   : > { %5120 = vmatprep.subr.bf16.mxu0 %v6254_v56 }
 0x94a   : > { %5121 = vmatpush1.bf16.msra.mxu0 %v6252_v49 }
 0x94b   : > { %5122 = vmatprep.subr.bf16.mxu0 %v6257_v60 }
 0x94e   : > { %5123 = vmatpush1.bf16.msra.mxu0 %v6255_v41 }
 0x94f   : > { %5124 = vmatprep.subr.bf16.mxu0 %v6260_v45 }
 0x952   : > { %5125 = vmatpush1.bf16.msra.mxu0 %v6258_v21 }
 0x953   : > { %5126 = vmatprep.subr.bf16.mxu0 %v6263_v2 }
 0x956   : > { %5127 = vmatpush1.bf16.msra.mxu0 %v6261_v0 }
 0x957   : > { %5128 = vmatprep.subr.bf16.mxu0 %v6266_v30 }
 0x95a   : > { %5129 = vmatpush1.bf16.msra.mxu0 %v6264_v44 }
 0x95b   : > { %5130 = vmatprep.subr.bf16.mxu0 %v6269_v1 }
 0x95e   : > { %5131 = vmatpush1.bf16.msra.mxu0 %v6267_v29 }
 0x95f   : > { %5132 = vmatprep.subr.bf16.mxu0 %v6272_v59 }
 0x962   : > { %5133 = vmatpush1.bf16.msra.mxu0 %v6270_v15 }
 0x963   : > { %5134 = vmatprep.subr.bf16.mxu0 %v6275_v26 }
 0x966   : > { %5135 = vmatpush1.bf16.msra.mxu0 %v6273_v4 }
 0x967   : > { %5136 = vmatprep.subr.bf16.mxu0 %v6278_v38 }
 0x96a   : > { %5137 = vmatpush1.bf16.msra.mxu0 %v6276_v46 }
 0x96b   : > { %5138 = vmatprep.subr.bf16.mxu0 %v6281_v8 }
 0x96e   : > { %5139 = vmatpush1.bf16.msra.mxu0 %v6279_v63 }
 0x96f   : > { %5151 = vmatprep.subr.bf16.mxu0 %v6284_v48 }
 0x971   : > { %5141 = vmatmul.mubr.bf16.vlgmr.msra.gmra.mrb[16].mxu0 %v4238_v5  ;;  %v6300_v5 = vld [vmem:[#allocation13 + $0x360] ss:$8 sps:$4 sm:$0xff]  }
 0x972   : > { %5152 = vmatpush1.bf16.msra.mxu0 %v6282_v58  ;;  %5183 = vmatprep.mubr.bf16.mxu0 %v4241_v43  ;;  %v6324_v43 = vld [vmem:[#allocation13 + $0x3e0] ss:$8 sps:$4 sm:$0xff]  }
 0x973   : > { %5153 = vmatprep.subr.bf16.mxu0 %v6287_v40 }
 0x976   : > { %5154 = vmatpush1.bf16.msra.mxu0 %v6285_v12 }
 0x977   : > { %5155 = vmatprep.subr.bf16.mxu0 %v6290_v55 }
 0x97a   : > { %5156 = vmatpush1.bf16.msra.mxu0 %v6288_v13 }
 0x97b   : > { %5157 = vmatprep.subr.bf16.mxu0 %v6293_v36 }
 0x97e   : > { %5158 = vmatpush1.bf16.msra.mxu0 %v6291_v3 }
 0x97f   : > { %5159 = vmatprep.subr.bf16.mxu0 %v6296_v32 }
 0x982   : > { %5160 = vmatpush1.bf16.msra.mxu0 %v6294_v34 }
 0x983   : > { %5161 = vmatprep.subr.bf16.mxu0 %v6299_v54 }
 0x986   : > { %5162 = vmatpush1.bf16.msra.mxu0 %v6297_v28 }
 0x987   : > { %5163 = vmatprep.subr.bf16.mxu0 %v6302_v24 }
 0x98a   : > { %5164 = vmatpush1.bf16.msra.mxu0 %v6300_v5 }
 0x98b   : > { %5165 = vmatprep.subr.bf16.mxu0 %v6305_v19 }
 0x98e   : > { %5166 = vmatpush1.bf16.msra.mxu0 %v6303_v10 }
 0x98f   : > { %5167 = vmatprep.subr.bf16.mxu0 %v6308_v47 }
 0x992   : > { %5168 = vmatpush1.bf16.msra.mxu0 %v6306_v31 }
 0x993   : > { %5169 = vmatprep.subr.bf16.mxu0 %v6311_v17 }
 0x996   : > { %5170 = vmatpush1.bf16.msra.mxu0 %v6309_v35 }
 0x997   : > { %5171 = vmatprep.subr.bf16.mxu0 %v6314_v39 }
 0x99a   : > { %5172 = vmatpush1.bf16.msra.mxu0 %v6312_v27 }
 0x99b   : > { %5173 = vmatprep.subr.bf16.mxu0 %v6317_v25 }
 0x99e   : > { %5174 = vmatpush1.bf16.msra.mxu0 %v6315_v16 }
 0x99f   : > { %5175 = vmatprep.subr.bf16.mxu0 %v6320_v37 }
 0x9a2   : > { %5176 = vmatpush1.bf16.msra.mxu0 %v6318_v42 }
 0x9a3   : > { %5177 = vmatprep.subr.bf16.mxu0 %v6323_v11 }
 0x9a6   : > { %5178 = vmatpush1.bf16.msra.mxu0 %v6321_v7 }
 0x9a7   : > { %5179 = vmatprep.subr.bf16.mxu0 %v6326_v52 }
 0x9aa   : > { %5180 = vmatpush1.bf16.msra.mxu0 %v6324_v43 }
 0x9ab   : > { %5181 = vmatprep.subr.bf16.mxu0 %v6329_v57 }
 0x9ae   : > { %5182 = vmatpush1.bf16.msra.mxu0 %v6327_v53 }
 0x9b1   : > { %5184 = vmatmul.mubr.bf16.vlgmr.msra.gmra.mrb[16].mxu0 %v4240_v22 }
 0xa84   : > { %v5185_v56 = vpop.f32.mrb[16].mxu0 }
 0xa85   : > { %v5808_v49 = vadd.f32 %v5185_v56, %v4375_v9  ;;  %v5187_v60 = vpop.f32.mrb[17].mxu0 }
 0xa86   : > { %v5809_v41 = vadd.f32 %v5187_v60, %v4379_v50  ;;  %v5189_v45 = vpop.f32.mrb[18].mxu0 }
 0xa87   : > { %v5194_v6 = vadd.f32 %v5808_v49, %v7288_v14  ;;  %v5810_v33 = vadd.f32 %v5189_v45, %v4375_v9  ;;  %v5191_v22 = vpop.f32.mrb[19].mxu0 }
 0xa88   : > { %v5195_v61 = vadd.f32 %v5809_v41, %v7291_v18  ;;  %v5811_v62 = vadd.f32 %v5191_v22, %v4379_v50 }
 0xa89   : > { %5198 = vst [vmem:[%s541_s23] sm:$0xff] %v5194_v6  ;;  %v5196_v21 = vadd.f32 %v5810_v33, %v7294_v20 }
 0xa8a   : > { %5199 = vst [vmem:[%s541_s23 + $0x8] sm:$0xff] %v5195_v61  ;;  %v5197_v14 = vadd.f32 %v5811_v62, %v7297_v23 }
 0xa8b   : > { %5200 = vst [vmem:[%s541_s23 + $0x10] sm:$0xff] %v5196_v21 }
 0xa8c   : > { %5201 = vst [vmem:[%s541_s23 + $0x18] sm:$0xff] %v5197_v14 }
 0xa8d   : > { %6633 = shalt.err (!%p6630_p8)
}
 0xa8e   : > { %s6634_s15 = scalar_lea.hbm %s7766_s14, 512  ;;  %s6638_s23 = scalar_lea.hbm %s7858_s29, 1024 }
 0xa8f   : > { %p6635_p13 = scmp.ne.s32.totalorder %s7766_s14, %s6634_s15  ;;  %p6639_p9 = scmp.lt.u32.totalorder %s7766_s14, %s7858_s29 }
 0xa90   : > { %p6640_p10 = scmp.lt.u32.totalorder %s6638_s23, %s6634_s15  ;;  %p6642_p6 = scmp.lt.u32.totalorder %s6634_s15, %s7766_s14 }
 0xa91   : > { %p6636_p0 = pnand %p6635_p13, %p7859_p12 }
 0xa92   : > { %p6641_p11 = por %p6640_p10, %p6639_p9 }
 0xa93   : > { %p6637_p2 = pneg %p6636_p0 }
 0xa94   : > { %p6643_p5 = por %p6642_p6, %p6641_p11 }
 0xa96   : > { %p6644_p7 = pnand %p6643_p5, %p6637_p2 }
 0xa98   : > { %6647 = shalt.err (!%p6644_p7)
}
 0xa99   : > { %s6721_s22 = smov 256   ;;  %s6722_s30 = smov 16  }
 0xa9a   : > { %5850 = dma.vmem_to_hbm [thread:$0]  (%p7859_p12), %s7759_s19, 512, %s7766_s14, %s5203_s17, %s6721_s22, %s6721_s22, %s6722_s30  }
 0xa9b PF: > { %s5231_s8 = sand.u32 1, %s6686_s25   ;;  %p7860_p4 = scmp.ne.s32.totalorder %s7845_s7, 0 }
 0xa9c   : > { %p7861_p1 = scmp.ge.s32.totalorder %s6698_s28, 2  ;;  %s5232_s10 = scalar_lea.sflag [#allocation4], %s5231_s8 }
 0xa9e   : > { %p5876_p3 = pnand %p7861_p1, %p7860_p4 }
 0xaa0   : > { %6681 = dma.done.wait (!%p5876_p3), %s5232_s10, 512  }
 0xaa1   : > { %6683 = vsyncadd (!%p5876_p3), %s5232_s10, 4294966784  ;;  %p29_p8 = scmp.ge.s32.totalorder %s6962_s18, 4   ;;  %s7862_s25 = smov %s6690_s26 }
 0xaa2   : > { %s7863_s26 = smov %s6694_s27  ;;  %s7864_s27 = smov %s6973_s20 }
 0xaa3   : > { %s7865_s28 = smov %s6962_s18  ;;  %31 = sbr.rel (!%p29_p8) target bundleno = 16 (0x10), region = 141 }
 0xaaa   :  { %5237 = vsyncpa [#allocation3], 1 }
 0xaab   :  { %5239 = vsyncpa [#allocation3 + $0x1], 1 }
 0xaac   :  { %5240 = vsyncpa [#allocation6], 1 }
 0xaad   :  { %5241 = vsyncpa [#allocation9], 1 }
 0xaae   :  { %5242 = vsyncpa [#allocation12], 1 }
 0xaaf   :  { %5243 = vsyncpa [#allocation4], 1 }
 0xab0   :  { %5245 = vsyncpa [#allocation4 + $0x1], 1 }

</bundles_post_ra>
